<compile_context>
chip_gen: v7x
topology: tpu7x:2x2x1
jax: 0.10.0
libtpu: 0.0.40
codegen_flags: <defaults>
</compile_context>

<pallas_src>
import functools
import math

import jax
import jax.numpy as jnp
from jax.experimental import pallas as pl
from jax.experimental.pallas import tpu as pltpu


_ROW_TILE = 1024  # row-block size for the row-tiled kernels (full rows if smaller)


def _row_grid(m):
    tm = m if m <= _ROW_TILE else _ROW_TILE
    return tm, pl.cdiv(m, tm)


# ============================================================================
# Pallas kernels: row-tiled LayerNorm / Linear and fused variants (bf16 MXU)
# ============================================================================

def _layernorm_kernel(x_ref, g_ref, b_ref, o_ref, *, eps):
    x = x_ref[...].astype(jnp.float32)
    mean = jnp.mean(x, axis=-1, keepdims=True)
    xc = x - mean
    var = jnp.mean(xc * xc, axis=-1, keepdims=True)
    y = xc * jax.lax.rsqrt(var + eps)
    o_ref[...] = (y * g_ref[...] + b_ref[...]).astype(o_ref.dtype)


def layernorm(x, gamma, beta, eps=1e-5, out_dtype=None):
    shape = x.shape
    d = shape[-1]
    x2 = x.reshape(-1, d)
    m = x2.shape[0]
    tm, steps = _row_grid(m)
    out_dtype = x.dtype if out_dtype is None else out_dtype
    out = pl.pallas_call(
        functools.partial(_layernorm_kernel, eps=eps),
        out_shape=jax.ShapeDtypeStruct((m, d), out_dtype),
        grid=(steps,),
        in_specs=[pl.BlockSpec((tm, d), lambda i: (i, 0)),
                  pl.BlockSpec((1, d), lambda i: (0, 0)),
                  pl.BlockSpec((1, d), lambda i: (0, 0))],
        out_specs=pl.BlockSpec((tm, d), lambda i: (i, 0)),
        compiler_params=pltpu.CompilerParams(dimension_semantics=("parallel",)),
    )(x2, gamma.reshape(1, d), beta.reshape(1, d))
    return out.reshape(shape)


def _linear_kernel(x_ref, w_ref, b_ref, o_ref):
    x = x_ref[...].astype(w_ref.dtype)
    y = jnp.dot(x, w_ref[...], preferred_element_type=jnp.float32) + b_ref[...]
    o_ref[...] = y.astype(o_ref.dtype)


def linear(x, w, b):
    shape = x.shape
    k = shape[-1]
    n = w.shape[1]
    x2 = x.reshape(-1, k)
    m = x2.shape[0]
    tm, steps = _row_grid(m)
    out = pl.pallas_call(
        _linear_kernel,
        out_shape=jax.ShapeDtypeStruct((m, n), x.dtype),
        grid=(steps,),
        in_specs=[pl.BlockSpec((tm, k), lambda i: (i, 0)),
                  pl.BlockSpec((k, n), lambda i: (0, 0)),
                  pl.BlockSpec((1, n), lambda i: (0, 0))],
        out_specs=pl.BlockSpec((tm, n), lambda i: (i, 0)),
        compiler_params=pltpu.CompilerParams(dimension_semantics=("parallel",)),
    )(x2, w, b.reshape(1, n))
    return out.reshape(shape[:-1] + (n,))


def _linear_res_ln_kernel(x_ref, w_ref, b_ref, r_ref, g_ref, bt_ref, o_ref, *, eps):
    x = x_ref[...].astype(w_ref.dtype)
    y = jnp.dot(x, w_ref[...], preferred_element_type=jnp.float32) + b_ref[...]
    y = y + r_ref[...].astype(jnp.float32)
    mean = jnp.mean(y, axis=-1, keepdims=True)
    yc = y - mean
    var = jnp.mean(yc * yc, axis=-1, keepdims=True)
    o_ref[...] = (yc * jax.lax.rsqrt(var + eps) * g_ref[...] + bt_ref[...]).astype(o_ref.dtype)


def linear_residual_layernorm(x, w, b, res, gamma, beta, eps=1e-5):
    """LN(res + x @ w + b) -- fuses the IPA output projection, residual add and layer_norm_ipa."""
    k = x.shape[-1]
    n = w.shape[1]
    x2 = x.reshape(-1, k)
    r2 = res.reshape(-1, n)
    m = x2.shape[0]
    tm, steps = _row_grid(m)
    out = pl.pallas_call(
        functools.partial(_linear_res_ln_kernel, eps=eps),
        out_shape=jax.ShapeDtypeStruct((m, n), res.dtype),
        grid=(steps,),
        in_specs=[pl.BlockSpec((tm, k), lambda i: (i, 0)),
                  pl.BlockSpec((k, n), lambda i: (0, 0)),
                  pl.BlockSpec((1, n), lambda i: (0, 0)),
                  pl.BlockSpec((tm, n), lambda i: (i, 0)),
                  pl.BlockSpec((1, n), lambda i: (0, 0)),
                  pl.BlockSpec((1, n), lambda i: (0, 0))],
        out_specs=pl.BlockSpec((tm, n), lambda i: (i, 0)),
        compiler_params=pltpu.CompilerParams(dimension_semantics=("parallel",)),
    )(x2, w, b.reshape(1, n), r2, gamma.reshape(1, n), beta.reshape(1, n))
    return out.reshape(res.shape)


def _transition_kernel(x_ref, w1, b1, w2, b2, w3, b3, g_ref, bt_ref, o_ref, *, eps):
    bf = w1.dtype
    x = x_ref[...].astype(jnp.float32)
    y = jnp.dot(x.astype(bf), w1[...], preferred_element_type=jnp.float32) + b1[...]
    y = jnp.dot(jnp.maximum(y, 0.0).astype(bf), w2[...], preferred_element_type=jnp.float32) + b2[...]
    y = jnp.dot(jnp.maximum(y, 0.0).astype(bf), w3[...], preferred_element_type=jnp.float32) + b3[...]
    y = x + y
    mean = jnp.mean(y, axis=-1, keepdims=True)
    yc = y - mean
    var = jnp.mean(yc * yc, axis=-1, keepdims=True)
    o_ref[...] = (yc * jax.lax.rsqrt(var + eps) * g_ref[...] + bt_ref[...]).astype(o_ref.dtype)


def transition_fused(s, p, eps=1e-5):
    """SingleTransition: LN(s + lin3(relu(lin2(relu(lin1(s)))))) in one kernel."""
    c = s.shape[-1]
    x2 = s.reshape(-1, c)
    m = x2.shape[0]
    tm, steps = _row_grid(m)
    wspec = pl.BlockSpec((c, c), lambda i: (0, 0))
    bspec = pl.BlockSpec((1, c), lambda i: (0, 0))
    out = pl.pallas_call(
        functools.partial(_transition_kernel, eps=eps),
        out_shape=jax.ShapeDtypeStruct((m, c), s.dtype),
        grid=(steps,),
        in_specs=[pl.BlockSpec((tm, c), lambda i: (i, 0)),
                  wspec, bspec, wspec, bspec, wspec, bspec, bspec, bspec],
        out_specs=pl.BlockSpec((tm, c), lambda i: (i, 0)),
        compiler_params=pltpu.CompilerParams(dimension_semantics=("parallel",)),
    )(x2,
      p['tr1_w'], p['tr1_b'].reshape(1, c),
      p['tr2_w'], p['tr2_b'].reshape(1, c),
      p['tr3_w'], p['tr3_b'].reshape(1, c),
      p['tr_ln_g'].reshape(1, c), p['tr_ln_b'].reshape(1, c))
    return out.reshape(s.shape)


def _angle_resnet_kernel(s_ref, si_ref, win, bin_, wini, bini,
                         w1, b1, w2, b2, wo, bo, o_ref, *, nblk):
    bf = win.dtype
    relu = lambda v: jnp.maximum(v, 0.0)
    s = s_ref[...].astype(jnp.float32)
    si = si_ref[...].astype(jnp.float32)
    a = jnp.dot(relu(s).astype(bf), win[...], preferred_element_type=jnp.float32) + bin_[...]
    a = a + jnp.dot(relu(si).astype(bf), wini[...], preferred_element_type=jnp.float32) + bini[...]
    for i in range(nblk):
        x = jnp.dot(relu(a).astype(bf), w1[i], preferred_element_type=jnp.float32) + b1[i]
        x = jnp.dot(relu(x).astype(bf), w2[i], preferred_element_type=jnp.float32) + b2[i]
        a = a + x
    y = jnp.dot(relu(a).astype(bf), wo[...], preferred_element_type=jnp.float32) + bo[...]
    o_ref[...] = y.astype(o_ref.dtype)


def angle_resnet(p, s, s_initial, cfg):
    B, N, c = s.shape
    ch = cfg['c_hidden_ang_res']
    na = cfg['num_angles']
    nblk = cfg['num_ang_res_blocks']
    m = B * N
    tm, steps = _row_grid(m)
    out = pl.pallas_call(
        functools.partial(_angle_resnet_kernel, nblk=nblk),
        out_shape=jax.ShapeDtypeStruct((m, na * 2), jnp.float32),
        grid=(steps,),
        in_specs=[pl.BlockSpec((tm, c), lambda i: (i, 0)),
                  pl.BlockSpec((tm, c), lambda i: (i, 0)),
                  pl.BlockSpec((c, ch), lambda i: (0, 0)),
                  pl.BlockSpec((1, ch), lambda i: (0, 0)),
                  pl.BlockSpec((c, ch), lambda i: (0, 0)),
                  pl.BlockSpec((1, ch), lambda i: (0, 0)),
                  pl.BlockSpec((nblk, ch, ch), lambda i: (0, 0, 0)),
                  pl.BlockSpec((nblk, 1, ch), lambda i: (0, 0, 0)),
                  pl.BlockSpec((nblk, ch, ch), lambda i: (0, 0, 0)),
                  pl.BlockSpec((nblk, 1, ch), lambda i: (0, 0, 0)),
                  pl.BlockSpec((ch, na * 2), lambda i: (0, 0)),
                  pl.BlockSpec((1, na * 2), lambda i: (0, 0))],
        out_specs=pl.BlockSpec((tm, na * 2), lambda i: (i, 0)),
        compiler_params=pltpu.CompilerParams(dimension_semantics=("parallel",)),
    )(s.reshape(m, c), s_initial.reshape(m, c),
      p['ar_in_w'], p['ar_in_b'].reshape(1, ch),
      p['ar_init_w'], p['ar_init_b'].reshape(1, ch),
      p['ar_blk_w1'], p['ar_blk_b1'], p['ar_blk_w2'], p['ar_blk_b2'],
      p['ar_out_w'], p['ar_out_b'].reshape(1, na * 2))
    a = out.reshape(B, N, na, 2)
    denom = jnp.sqrt(jnp.maximum(jnp.sum(a * a, axis=-1, keepdims=True), cfg['eps']))
    return a, a / denom


# ============================================================================
# Pallas kernel: Invariant Point Attention core
#   flash-style over (batch, query-tile, key-tile) with online softmax
# ============================================================================

def _ipa_kernel(qc_ref, kc_ref, v_ref, bias_ref, kn_ref, mq_ref, mk_ref, z_ref,
                ov_ref, oz_ref,
                m_sc, l_sc, accv_sc, p_sc, a_sc, accz_sc, *, num_heads, inf):
    ki = pl.program_id(2)

    @pl.when(ki == 0)
    def _init():
        m_sc[...] = jnp.full_like(m_sc, -jnp.inf)
        l_sc[...] = jnp.zeros_like(l_sc)
        accv_sc[...] = jnp.zeros_like(accv_sc)
        accz_sc[...] = jnp.zeros_like(accz_sc)

    z = z_ref[0]                                           # [TQ, TK, Cz] bf16
    # mask bias built in-kernel from tiny per-tile mask vectors ("safe infinity" keeps it finite)
    mask_bias = inf * (mq_ref[0] * mk_ref[0] - 1.0)        # [TQ, 1]*[1, TK] -> [TQ, TK] f32

    # fused scalar + point logits for ALL heads in one batched MXU contraction:
    # [H, TQ, Ck] . [H, TK, Ck]^T  (Ck = C + 3*Pq channels of [q/sqrt(3C) | sqrt(w)*qp])
    logits_all = jax.lax.dot_general(
        qc_ref[0], kc_ref[0], (((2,), (2,)), ((0,), (0,))),
        preferred_element_type=jnp.float32)                # [H, TQ, TK]

    for h in range(num_heads):
        logits = (logits_all[h] + bias_ref[0, h].astype(jnp.float32)
                  + kn_ref[0, h] + mask_bias)
        # online softmax
        m_prev = m_sc[h]                                   # [TQ, 1]
        m_new = jnp.maximum(m_prev, jnp.max(logits, axis=-1, keepdims=True))
        alpha = jnp.exp(m_prev - m_new)
        p = jnp.exp(logits - m_new)                        # [TQ, TK] f32
        l_sc[h] = alpha * l_sc[h] + jnp.sum(p, axis=-1, keepdims=True)
        m_sc[h] = m_new
        pb = p.astype(z.dtype)
        # scalar + point values in one MXU matmul (contraction = TK)
        accv_sc[h] = alpha * accv_sc[h] + jnp.dot(pb, v_ref[0, h],
                                                  preferred_element_type=jnp.float32)
        # stage probs / alpha (query-major) for the all-head pair aggregation below
        p_sc[:, h, :] = pb
        a_sc[:, h, :] = alpha

    # pair aggregation o_pair[q,h,c] += sum_k p[q,h,k] * z[q,k,c]
    # (z depends on BOTH q and k, so this is inherently a per-query batched matmul)
    pz = jax.lax.dot_general(p_sc[...], z, (((2,), (1,)), ((0,), (0,))),
                             preferred_element_type=jnp.float32)       # [TQ, H, Cz]
    accz_sc[...] = a_sc[...] * accz_sc[...] + pz

    @pl.when(ki == pl.num_programs(2) - 1)
    def _finalize():
        parts = []
        for h in range(num_heads):
            inv = pl.reciprocal(l_sc[h], approx=True)      # [TQ, 1] (EUP)
            parts.append(accv_sc[h] * inv)
            a_sc[:, h, :] = inv
        # lane-dense full-row store of the scalar+point values for all heads
        ov_ref[0] = jnp.concatenate(parts, axis=-1).astype(ov_ref.dtype)
        oz_ref[0] = (accz_sc[...] * a_sc[...]).astype(oz_ref.dtype)


def ipa_attention(qc, kc, vslab, pair_bias, kn, mask, z, inf):
    """qc/kc: [B,H,N,Ck] bf16, vslab: [B,H,N,Cv] bf16, pair_bias: [B,H,N,N] bf16,
    kn: [B,H,1,N] f32, mask: [B,N] f32, z: [B,N,N,Cz] bf16
    -> (ov [B,N,H*Cv] f32, oz [B,N,H,Cz] f32)."""
    B, H, N, Ck = qc.shape
    Cv = vslab.shape[-1]
    Cz = z.shape[-1]
    if N % 128 == 0:
        tk = 128
        tq = 128
        if N % 256 == 0:
            try:
                # v5e/v6e (128 MiB VMEM) can afford 256-row query tiles; v7x (64 MiB) stays at 128.
                if pltpu.get_tpu_info().vmem_capacity_bytes >= (100 << 20):
                    tq = 256
            except Exception:
                pass
    else:
        # small sequences: single full block (large N is padded to 128 by the caller)
        tq = tk = N
    qsteps, ksteps = N // tq, N // tk
    vmem_limit = (32 if tq == 128 else 64) * 1024 * 1024

    mask_col = mask[:, :, None].astype(jnp.float32)        # [B, N, 1]
    mask_row = mask[:, None, :].astype(jnp.float32)        # [B, 1, N]
    f32 = jnp.float32

    return pl.pallas_call(
        functools.partial(_ipa_kernel, num_heads=H, inf=float(inf)),
        out_shape=(jax.ShapeDtypeStruct((B, N, H * Cv), f32),
                   jax.ShapeDtypeStruct((B, N, H, Cz), f32)),
        grid=(B, qsteps, ksteps),
        in_specs=[
            pl.BlockSpec((1, H, tq, Ck), lambda b, q, k: (b, 0, q, 0)),   # q features
            pl.BlockSpec((1, H, tk, Ck), lambda b, q, k: (b, 0, k, 0)),   # k features
            pl.BlockSpec((1, H, tk, Cv), lambda b, q, k: (b, 0, k, 0)),   # values
            pl.BlockSpec((1, H, tq, tk), lambda b, q, k: (b, 0, q, k)),   # pair bias (bf16)
            pl.BlockSpec((1, H, 1, tk), lambda b, q, k: (b, 0, 0, k)),    # -0.5*||kp||^2
            pl.BlockSpec((1, tq, 1), lambda b, q, k: (b, q, 0)),          # query mask
            pl.BlockSpec((1, 1, tk), lambda b, q, k: (b, 0, k)),          # key mask
            pl.BlockSpec((1, tq, tk, Cz), lambda b, q, k: (b, q, k, 0)),  # pair rep z (bf16)
        ],
        out_specs=(
            pl.BlockSpec((1, tq, H * Cv), lambda b, q, k: (b, q, 0)),
            pl.BlockSpec((1, tq, H, Cz), lambda b, q, k: (b, q, 0, 0)),
        ),
        scratch_shapes=[
            pltpu.VMEM((H, tq, 1), f32),            # running max
            pltpu.VMEM((H, tq, 1), f32),            # running denom
            pltpu.VMEM((H, tq, Cv), f32),           # scalar + point value accumulator
            pltpu.VMEM((tq, H, tk), jnp.bfloat16),  # staged probs (query-major, bf16)
            pltpu.VMEM((tq, H, 1), f32),            # staged alpha / inverse denom
            pltpu.VMEM((tq, H, Cz), f32),           # pair accumulator
        ],
        compiler_params=pltpu.CompilerParams(
            dimension_semantics=("parallel", "parallel", "arbitrary"),
            vmem_limit_bytes=vmem_limit),
    )(qc, kc, vslab, pair_bias, kn, mask_col, mask_row, z)


# ============================================================================
# Plain-JAX glue: quaternion / rigid-frame algebra
# ============================================================================

def quat_to_rot(q):
    w, x, y, z = q[..., 0], q[..., 1], q[..., 2], q[..., 3]
    r00 = w * w + x * x - y * y - z * z
    r01 = 2 * (x * y - w * z)
    r02 = 2 * (x * z + w * y)
    r10 = 2 * (x * y + w * z)
    r11 = w * w - x * x + y * y - z * z
    r12 = 2 * (y * z - w * x)
    r20 = 2 * (x * z - w * y)
    r21 = 2 * (y * z + w * x)
    r22 = w * w - x * x - y * y + z * z
    return jnp.stack([jnp.stack([r00, r01, r02], axis=-1),
                      jnp.stack([r10, r11, r12], axis=-1),
                      jnp.stack([r20, r21, r22], axis=-1)], axis=-2)


def quat_multiply_by_vec(q, v):
    w, x, y, z = q[..., 0], q[..., 1], q[..., 2], q[..., 3]
    b, c, d = v[..., 0], v[..., 1], v[..., 2]
    return jnp.stack([-x * b - y * c - z * d,
                      w * b + y * d - z * c,
                      w * c - x * d + z * b,
                      w * d + x * c - y * b], axis=-1)


def rigid_apply(R, t, pts):
    return jnp.einsum('...ij,...j->...i', R, pts) + t


def rigid_invert_apply(R, t, pts):
    return jnp.einsum('...ji,...j->...i', R, pts - t)


def to_tensor_4x4(R, t):
    top = jnp.concatenate([R, t[..., None]], axis=-1)
    bottom = jnp.zeros(R.shape[:-2] + (1, 4), R.dtype).at[..., 0, 3].set(1.0)
    return jnp.concatenate([top, bottom], axis=-2)


def torsion_angles_to_frames(bb_R, bb_t, alpha, aatype, default_frames):
    d4 = default_frames[aatype]                      # [B, N, 8, 4, 4]
    dR = d4[..., :3, :3]
    dt = d4[..., :3, 3]
    B, N = alpha.shape[:2]
    bb_rot = jnp.zeros((B, N, 1, 2), alpha.dtype).at[..., 1].set(1.0)
    alpha8 = jnp.concatenate([bb_rot, alpha], axis=-2)                 # [B, N, 8, 2]
    a0, a1 = alpha8[..., 0], alpha8[..., 1]
    zeros = jnp.zeros_like(a0)
    ones = jnp.ones_like(a0)
    all_rots = jnp.stack([
        jnp.stack([ones, zeros, zeros], axis=-1),
        jnp.stack([zeros, a1, -a0], axis=-1),
        jnp.stack([zeros, a0, a1], axis=-1),
    ], axis=-2)                                                        # [B, N, 8, 3, 3]
    fR = jnp.matmul(dR, all_rots)
    ft = dt

    def compose(R1, t1, R2, t2):
        return (jnp.matmul(R1, R2),
                jnp.squeeze(jnp.matmul(R1, t2[..., None]), -1) + t1)

    c1R, c1t = fR[..., 4, :, :], ft[..., 4, :]
    c2R, c2t = compose(c1R, c1t, fR[..., 5, :, :], ft[..., 5, :])
    c3R, c3t = compose(c2R, c2t, fR[..., 6, :, :], ft[..., 6, :])
    c4R, c4t = compose(c3R, c3t, fR[..., 7, :, :], ft[..., 7, :])

    allR = jnp.concatenate([fR[..., :5, :, :], c2R[..., None, :, :],
                            c3R[..., None, :, :], c4R[..., None, :, :]], axis=-3)
    allt = jnp.concatenate([ft[..., :5, :], c2t[..., None, :],
                            c3t[..., None, :], c4t[..., None, :]], axis=-2)
    gR = jnp.matmul(bb_R[..., None, :, :], allR)
    gt = jnp.squeeze(jnp.matmul(bb_R[..., None, :, :], allt[..., None]), -1) + bb_t[..., None, :]
    return gR, gt


def frames_to_atom14(gR, gt, aatype, group_idx, atom_mask, lit_positions):
    gmask = jax.nn.one_hot(group_idx[aatype], gR.shape[-3], dtype=gR.dtype)    # [B, N, 14, 8]
    R_sel = jnp.einsum('bnag,bngij->bnaij', gmask, gR)
    t_sel = jnp.einsum('bnag,bngi->bnai', gmask, gt)
    lit = lit_positions[aatype]                                                # [B, N, 14, 3]
    pred = jnp.einsum('bnaij,bnaj->bnai', R_sel, lit) + t_sel
    return pred * atom_mask[aatype][..., None]


# ============================================================================
# Invariant Point Attention wrapper (projections fused, kernel-facing layouts)
# ============================================================================

def ipa_features(p, s, z_bf, R, t, pair_bias, mask, cfg):
    """Returns the concatenated IPA features (before the output projection)."""
    B, N, _ = s.shape
    H, C = cfg['num_heads_ipa'], cfg['c_hidden_ipa']
    Pq, Pv = cfg['num_qk_points'], cfg['num_v_points']
    Cz = cfg['c_z']

    # one fused projection for q, kv, q_pts, kv_pts (bf16 weights, f32 accumulation)
    proj = linear(s, p['ipa_proj_w'], p['ipa_proj_b'])
    o1 = H * C
    o2 = o1 + 2 * H * C
    o3 = o2 + 3 * H * Pq
    q = proj[..., :o1].reshape(B, N, H, C)
    kv = proj[..., o1:o2].reshape(B, N, H, 2 * C)
    k, v = kv[..., :C], kv[..., C:]

    def to_points(flat, npts):
        # coord-major channel layout (x block, y block, z block), matching torch.split/stack
        pts = flat.reshape(B, N, 3, H * npts).transpose(0, 1, 3, 2)            # [B, N, H*npts, 3]
        pts = rigid_apply(R[:, :, None], t[:, :, None], pts)                   # to global frame
        return pts.reshape(B, N, H, npts, 3)

    q_pts = to_points(proj[..., o2:o3], Pq)
    kv_pts = to_points(proj[..., o3:], Pq + Pv)
    k_pts, v_pts = kv_pts[..., :Pq, :], kv_pts[..., Pq:, :]

    head_w = jax.nn.softplus(p['ipa_head_w']) * math.sqrt(1.0 / (3.0 * (Pq * 9.0 / 2.0)))
    sw = jnp.sqrt(head_w)[None, None, :, None, None]

    def heads_flat(pts):  # [B, N, H, P, 3] -> [B, H, N, P*3]
        return jnp.transpose(pts, (0, 2, 1, 3, 4)).reshape(B, H, N, -1)

    qp_s = heads_flat(q_pts * sw)
    kp_s = heads_flat(k_pts * sw)
    vp_f = heads_flat(v_pts)

    # fused feature slabs for a single batched MXU contraction in the kernel
    qc = jnp.concatenate(
        [jnp.transpose(q, (0, 2, 1, 3)) * (1.0 / math.sqrt(3.0 * C)), qp_s], axis=-1)
    kc = jnp.concatenate([jnp.transpose(k, (0, 2, 1, 3)), kp_s], axis=-1)
    vslab = jnp.concatenate([jnp.transpose(v, (0, 2, 1, 3)), vp_f], axis=-1)
    kn = (-0.5 * jnp.sum(kp_s * kp_s, axis=-1))[:, :, None, :]                 # [B, H, 1, N] f32

    ov, oz = ipa_attention(qc.astype(jnp.bfloat16), kc.astype(jnp.bfloat16),
                           vslab.astype(jnp.bfloat16), pair_bias, kn, mask,
                           z_bf, cfg['inf'])

    Cv = C + 3 * Pv
    ovr = ov.reshape(B, N, H, Cv)
    o_flat = ovr[..., :C].reshape(B, N, H * C)
    o_pt = ovr[..., C:].reshape(B, N, H, Pv, 3)
    o_pt_local = rigid_invert_apply(R[:, :, None, None], t[:, :, None, None], o_pt)
    o_pt_norm = jnp.sqrt(jnp.sum(o_pt_local ** 2, axis=-1) + cfg['eps']).reshape(B, N, H * Pv)
    o_pt_flat = o_pt_local.reshape(B, N, H * Pv, 3)
    o_pair_flat = oz.reshape(B, N, H * Cz)

    return jnp.concatenate([o_flat, o_pt_flat[..., 0], o_pt_flat[..., 1], o_pt_flat[..., 2],
                            o_pt_norm, o_pair_flat], axis=-1)


# ============================================================================
# Parameter preparation (hoisted out of the block loop): bf16 weights, fusions
# ============================================================================

def prepare_params(p, cfg):
    bf = jnp.bfloat16
    ch = cfg['c_hidden_ang_res']
    nblk = cfg['num_ang_res_blocks']
    q = dict(p)
    # fused IPA input projection (q | kv | q_pts | kv_pts)
    q['ipa_proj_w'] = jnp.concatenate(
        [p['ipa_q_w'], p['ipa_kv_w'], p['ipa_qp_w'], p['ipa_kvp_w']], axis=1).astype(bf)
    q['ipa_proj_b'] = jnp.concatenate(
        [p['ipa_q_b'], p['ipa_kv_b'], p['ipa_qp_b'], p['ipa_kvp_b']], axis=0)
    # fold the sqrt(1/3) pair-bias scale into the bias linear
    s13 = math.sqrt(1.0 / 3.0)
    q['ipa_b_w'] = (p['ipa_b_w'] * s13).astype(bf)
    q['ipa_b_b'] = p['ipa_b_b'] * s13
    # bf16 weights for the MXU (biases stay f32, added after f32 accumulation)
    for k in ('lin_in_w', 'ipa_out_w', 'tr1_w', 'tr2_w', 'tr3_w', 'bb_w',
              'ar_in_w', 'ar_init_w', 'ar_out_w'):
        q[k] = p[k].astype(bf)
    # pre-stacked angle-resnet block weights (hoisted out of the per-block loop)
    q['ar_blk_w1'] = jnp.stack([p[f'ar_{i}_1_w'] for i in range(nblk)]).astype(bf)
    q['ar_blk_b1'] = jnp.stack([p[f'ar_{i}_1_b'] for i in range(nblk)]).reshape(nblk, 1, ch)
    q['ar_blk_w2'] = jnp.stack([p[f'ar_{i}_2_w'] for i in range(nblk)]).astype(bf)
    q['ar_blk_b2'] = jnp.stack([p[f'ar_{i}_2_b'] for i in range(nblk)]).reshape(nblk, 1, ch)
    return q


# ============================================================================
# StructureModule forward
# ============================================================================

def structure_module_forward(params, bufs, s, z, mask, aatype, cfg):
    nb = cfg['num_blocks']
    scale = cfg['scale_factor']
    B, N0 = s.shape[:2]

    # pad N_res to a multiple of 128 (large sequences only) so the IPA kernel keeps its
    # 128x128 flash tiling; padded residues are masked out of attention and sliced off below.
    N = N0
    if N0 > 128 and N0 % 128 != 0:
        N = ((N0 + 127) // 128) * 128
        pad = N - N0
        s = jnp.pad(s, ((0, 0), (0, pad), (0, 0)))
        z = jnp.pad(z, ((0, 0), (0, pad), (0, pad), (0, 0)))
        mask = jnp.pad(mask, ((0, 0), (0, pad)))
        aatype = jnp.pad(aatype, ((0, 0), (0, pad)))

    p = prepare_params(params, cfg)

    s = layernorm(s, p['ln_s_g'], p['ln_s_b'])
    # z layernorm emits bf16 directly (largest tensor: avoid a separate full cast pass)
    z_bf = layernorm(z, p['ln_z_g'], p['ln_z_b'], out_dtype=jnp.bfloat16)
    s_initial = s
    s = linear(s, p['lin_in_w'], p['lin_in_b'])

    # loop-invariant pair bias (depends only on z): computed once, streamed in bf16,
    # head-major layout so the kernel can slice per head along a leading dim
    b_pair = linear(z_bf, p['ipa_b_w'], p['ipa_b_b'])                    # [B, N, N, H] bf16
    pair_bias = jnp.transpose(b_pair, (0, 3, 1, 2))                      # [B, H, N, N] bf16
    mask_f = mask.astype(jnp.float32)

    quats = jnp.broadcast_to(jnp.array([1.0, 0.0, 0.0, 0.0], jnp.float32), (B, N, 4))
    trans = jnp.zeros((B, N, 3), jnp.float32)

    keys = ('sm_frames', 'sm_sidechain_frames', 'sm_unnormalized_angles',
            'sm_angles', 'sm_positions', 'sm_states')
    outs = {k: [] for k in keys}

    for _ in range(nb):
        R = quat_to_rot(quats)
        cat = ipa_features(p, s, z_bf, R, trans, pair_bias, mask_f, cfg)
        # ipa output linear + residual + ipa_dropout(identity) + layer_norm_ipa, fused
        s = linear_residual_layernorm(cat, p['ipa_out_w'], p['ipa_out_b'],
                                      s, p['ln_ipa_g'], p['ln_ipa_b'])
        s = transition_fused(s, p)

        # backbone update: compose_q_update_vec
        upd = linear(s, p['bb_w'], p['bb_b'])                            # [B, N, 6]
        q_vec, t_vec = upd[..., :3], upd[..., 3:]
        new_quats = quats + quat_multiply_by_vec(quats, q_vec)
        new_quats = new_quats / jnp.sqrt(jnp.sum(new_quats ** 2, axis=-1, keepdims=True))
        trans = trans + jnp.einsum('...ij,...j->...i', R, t_vec)         # old rotation applies t_vec
        quats = new_quats
        R_new = quat_to_rot(quats)

        unnorm_ang, ang = angle_resnet(p, s, s_initial, cfg)
        gR, gt = torsion_angles_to_frames(R_new, trans * scale, ang, aatype,
                                          bufs['default_frames'])
        pred_xyz = frames_to_atom14(gR, gt, aatype, bufs['group_idx'],
                                    bufs['atom_mask'], bufs['lit_positions'])

        outs['sm_frames'].append(jnp.concatenate([quats, trans * scale], axis=-1))
        outs['sm_sidechain_frames'].append(to_tensor_4x4(gR, gt))
        outs['sm_unnormalized_angles'].append(unnorm_ang)
        outs['sm_angles'].append(ang)
        outs['sm_positions'].append(pred_xyz)
        outs['sm_states'].append(s)
        # stop_rot_gradient: forward no-op

    result = {k: jnp.stack(v, axis=1) for k, v in outs.items()}
    result['sm_single'] = s
    if N != N0:
        result = {k: (v[:, :N0] if k == 'sm_single' else v[:, :, :N0])
                  for k, v in result.items()}
    return result


# ============================================================================
# Deterministic synthetic parameters / residue-constant buffers
# ============================================================================

def init_params(key, cfg):
    c_s, c_z = cfg['c_s'], cfg['c_z']
    H, C = cfg['num_heads_ipa'], cfg['c_hidden_ipa']
    Pq, Pv = cfg['num_qk_points'], cfg['num_v_points']
    ch, na = cfg['c_hidden_ang_res'], cfg['num_angles']
    keys = iter(jax.random.split(key, 64))

    def lin(fan_in, fan_out, scale=1.0):
        w = jax.random.normal(next(keys), (fan_in, fan_out), jnp.float32) * (scale / math.sqrt(fan_in))
        return w, jnp.zeros((fan_out,), jnp.float32)

    p = {}
    p['ln_s_g'], p['ln_s_b'] = jnp.ones((c_s,)), jnp.zeros((c_s,))
    p['ln_z_g'], p['ln_z_b'] = jnp.ones((c_z,)), jnp.zeros((c_z,))
    p['lin_in_w'], p['lin_in_b'] = lin(c_s, c_s)
    p['ipa_q_w'], p['ipa_q_b'] = lin(c_s, H * C)
    p['ipa_kv_w'], p['ipa_kv_b'] = lin(c_s, 2 * H * C)
    p['ipa_qp_w'], p['ipa_qp_b'] = lin(c_s, 3 * H * Pq)
    p['ipa_kvp_w'], p['ipa_kvp_b'] = lin(c_s, 3 * H * (Pq + Pv))
    p['ipa_b_w'], p['ipa_b_b'] = lin(c_z, H)
    p['ipa_head_w'] = jnp.zeros((H,), jnp.float32)
    p['ipa_out_w'], p['ipa_out_b'] = lin(H * (C + 4 * Pv + c_z), c_s)
    p['ln_ipa_g'], p['ln_ipa_b'] = jnp.ones((c_s,)), jnp.zeros((c_s,))
    p['tr1_w'], p['tr1_b'] = lin(c_s, c_s)
    p['tr2_w'], p['tr2_b'] = lin(c_s, c_s)
    p['tr3_w'], p['tr3_b'] = lin(c_s, c_s)
    p['tr_ln_g'], p['tr_ln_b'] = jnp.ones((c_s,)), jnp.zeros((c_s,))
    p['bb_w'], p['bb_b'] = lin(c_s, 6, scale=0.1)   # small update keeps quats well conditioned
    p['ar_init_w'], p['ar_init_b'] = lin(c_s, ch)
    p['ar_in_w'], p['ar_in_b'] = lin(c_s, ch)
    for i in range(cfg['num_ang_res_blocks']):
        p[f'ar_{i}_1_w'], p[f'ar_{i}_1_b'] = lin(ch, ch)
        p[f'ar_{i}_2_w'], p[f'ar_{i}_2_b'] = lin(ch, ch)
    p['ar_out_w'], p['ar_out_b'] = lin(ch, na * 2)
    return p


def init_buffers(key):
    # Synthetic stand-ins for residue_constants buffers (deterministic, NOT the real tables).
    k1, k2, k3, k4, k5 = jax.random.split(key, 5)
    q = jax.random.normal(k1, (21, 8, 4), jnp.float32)
    q = q / jnp.sqrt(jnp.sum(q ** 2, axis=-1, keepdims=True))
    Rf = quat_to_rot(q)
    tf = jax.random.normal(k2, (21, 8, 3), jnp.float32) * 0.5
    return dict(
        default_frames=to_tensor_4x4(Rf, tf),                                   # [21, 8, 4, 4]
        group_idx=jax.random.randint(k3, (21, 14), 0, 8),                       # [21, 14]
        atom_mask=(jax.random.uniform(k4, (21, 14)) > 0.3).astype(jnp.float32), # [21, 14]
        lit_positions=jax.random.normal(k5, (21, 14, 3), jnp.float32),          # [21, 14, 3]
    )


# ============================================================================
# Main
# ============================================================================

if __name__ == "__main__":
    cfg = dict(c_s=32, c_z=8, c_hidden_ipa=16, c_hidden_ang_res=16, num_heads_ipa=4,
               num_qk_points=4, num_v_points=8, dropout_rate=0.1, num_blocks=2,
               num_ang_res_blocks=2, num_angles=7, scale_factor=10.0, inf=1e5, eps=1e-8)

    key = jax.random.PRNGKey(0)
    kp, kb, ks, kz, ka = jax.random.split(key, 5)
    params = init_params(kp, cfg)
    bufs = init_buffers(kb)

    B, N = 2, 8
    s = jax.random.normal(ks, (B, N, cfg['c_s']), jnp.float32)
    z = jax.random.normal(kz, (B, N, N, cfg['c_z']), jnp.float32)
    mask = jnp.ones((B, N), jnp.float32).at[1, -2:].set(0.0)
    aatype = jax.random.randint(ka, (B, N), 0, 21)

    fwd = jax.jit(functools.partial(structure_module_forward, cfg=cfg))
    out = fwd(params, bufs, s, z, mask, aatype)
    out = jax.tree_util.tree_map(jax.block_until_ready, out)

    nb = cfg['num_blocks']
    assert out['sm_frames'].shape == (B, nb, N, 7)
    assert out['sm_sidechain_frames'].shape == (B, nb, N, 8, 4, 4)
    assert out['sm_unnormalized_angles'].shape == (B, nb, N, 7, 2)
    assert out['sm_angles'].shape == (B, nb, N, 7, 2)
    assert out['sm_positions'].shape == (B, nb, N, 14, 3)
    assert out['sm_states'].shape == (B, nb, N, cfg['c_s'])
    assert out['sm_single'].shape == (B, N, cfg['c_s'])
    assert all(bool(jnp.all(jnp.isfinite(v))) for v in out.values())
    print("KERNEL_OK")
</pallas_src>

<mosaic_0001>
module attributes {stable_mosaic.version = 11 : i64} {
  func.func @_layernorm_kernel(%arg0: i32, %arg1: memref<16x32xf32, #tpu.memory_space<vmem>>, %arg2: memref<1x32xf32, #tpu.memory_space<vmem>>, %arg3: memref<1x32xf32, #tpu.memory_space<vmem>>, %arg4: memref<16x32xf32, #tpu.memory_space<vmem>>) attributes {dimension_semantics = [#tpu.dimension_semantics<parallel>], iteration_bounds = array<i64: 1>, scalar_prefetch = 0 : i64, scratch_operands = 0 : i64, tpu.core_type = #tpu.core_type<tc>, window_params = [{transform_indices = @transform_0, window_bounds = array<i64: 16, 32>}, {pipeline_mode = #tpu.pipeline_mode<synchronous>, transform_indices = @transform_1, window_bounds = array<i64: 1, 32>}, {pipeline_mode = #tpu.pipeline_mode<synchronous>, transform_indices = @transform_2, window_bounds = array<i64: 1, 32>}, {transform_indices = @transform_3, window_bounds = array<i64: 16, 32>}]} {
    %c0 = arith.constant 0 : index
    %c0_0 = arith.constant 0 : index
    %0 = vector.load %arg1[%c0, %c0_0] : memref<16x32xf32, #tpu.memory_space<vmem>>, vector<16x32xf32>
    %cst = arith.constant dense<0.000000e+00> : vector<16xf32>
    %1 = vector.multi_reduction <add>, %0, %cst [1] : vector<16x32xf32> to vector<16xf32>
    %2 = vector.shape_cast %1 : vector<16xf32> to vector<16x1xf32>
    %cst_1 = arith.constant 3.200000e+01 : f32
    %3 = vector.broadcast %cst_1 : f32 to vector<16x1xf32>
    %4 = arith.divf %2, %3 : vector<16x1xf32>
    %5 = vector.broadcast %4 : vector<16x1xf32> to vector<16x32xf32>
    %6 = arith.subf %0, %5 : vector<16x32xf32>
    %7 = arith.mulf %6, %6 : vector<16x32xf32>
    %cst_2 = arith.constant dense<0.000000e+00> : vector<16xf32>
    %8 = vector.multi_reduction <add>, %7, %cst_2 [1] : vector<16x32xf32> to vector<16xf32>
    %9 = vector.shape_cast %8 : vector<16xf32> to vector<16x1xf32>
    %cst_3 = arith.constant 3.200000e+01 : f32
    %10 = vector.broadcast %cst_3 : f32 to vector<16x1xf32>
    %11 = arith.divf %9, %10 : vector<16x1xf32>
    %cst_4 = arith.constant 9.99999974E-6 : f32
    %12 = vector.broadcast %cst_4 : f32 to vector<16x1xf32>
    %13 = arith.addf %11, %12 : vector<16x1xf32>
    %14 = math.rsqrt %13 : vector<16x1xf32>
    %15 = vector.broadcast %14 : vector<16x1xf32> to vector<16x32xf32>
    %16 = arith.mulf %6, %15 : vector<16x32xf32>
    %c0_5 = arith.constant 0 : index
    %c0_6 = arith.constant 0 : index
    %17 = vector.load %arg2[%c0_5, %c0_6] : memref<1x32xf32, #tpu.memory_space<vmem>>, vector<1x32xf32>
    %18 = vector.broadcast %17 : vector<1x32xf32> to vector<16x32xf32>
    %19 = arith.mulf %16, %18 : vector<16x32xf32>
    %c0_7 = arith.constant 0 : index
    %c0_8 = arith.constant 0 : index
    %20 = vector.load %arg3[%c0_7, %c0_8] : memref<1x32xf32, #tpu.memory_space<vmem>>, vector<1x32xf32>
    %21 = vector.broadcast %20 : vector<1x32xf32> to vector<16x32xf32>
    %22 = arith.addf %19, %21 : vector<16x32xf32>
    %c0_9 = arith.constant 0 : index
    %c0_10 = arith.constant 0 : index
    %23 = vector.load %arg4[%c0_9, %c0_10] : memref<16x32xf32, #tpu.memory_space<vmem>>, vector<16x32xf32>
    tpu.vector_store %arg4[%c0_9, %c0_10], %22 {strides = array<i32>} : memref<16x32xf32, #tpu.memory_space<vmem>>, vector<16x32xf32>,
    return
  }
  func.func @transform_0(%arg0: i32) -> (i32, i32) {
    %c0_i32 = arith.constant 0 : i32
    %c0_i32_0 = arith.constant 0 : i32
    return %arg0, %c0_i32 : i32, i32
  }
  func.func @transform_1(%arg0: i32) -> (i32, i32) {
    %c0_i32 = arith.constant 0 : i32
    %c0_i32_0 = arith.constant 0 : i32
    %c0_i32_1 = arith.constant 0 : i32
    return %c0_i32, %c0_i32_0 : i32, i32
  }
  func.func @transform_2(%arg0: i32) -> (i32, i32) {
    %c0_i32 = arith.constant 0 : i32
    %c0_i32_0 = arith.constant 0 : i32
    %c0_i32_1 = arith.constant 0 : i32
    return %c0_i32, %c0_i32_0 : i32, i32
  }
  func.func @transform_3(%arg0: i32) -> (i32, i32) {
    %c0_i32 = arith.constant 0 : i32
    %c0_i32_0 = arith.constant 0 : i32
    return %arg0, %c0_i32 : i32, i32
  }
}

module attributes {stable_mosaic.version = 11 : i64} {
  func.func @_linear_kernel(%arg0: i32, %arg1: memref<16x32xf32, #tpu.memory_space<vmem>>, %arg2: memref<32x32xbf16, #tpu.memory_space<vmem>>, %arg3: memref<1x32xf32, #tpu.memory_space<vmem>>, %arg4: memref<16x32xf32, #tpu.memory_space<vmem>>) attributes {dimension_semantics = [#tpu.dimension_semantics<parallel>], iteration_bounds = array<i64: 1>, scalar_prefetch = 0 : i64, scratch_operands = 0 : i64, tpu.core_type = #tpu.core_type<tc>, window_params = [{transform_indices = @transform_0, window_bounds = array<i64: 16, 32>}, {pipeline_mode = #tpu.pipeline_mode<synchronous>, transform_indices = @transform_1, window_bounds = array<i64: 32, 32>}, {pipeline_mode = #tpu.pipeline_mode<synchronous>, transform_indices = @transform_2, window_bounds = array<i64: 1, 32>}, {transform_indices = @transform_3, window_bounds = array<i64: 16, 32>}]} {
    %c0 = arith.constant 0 : index
    %c0_0 = arith.constant 0 : index
    %0 = vector.load %arg1[%c0, %c0_0] : memref<16x32xf32, #tpu.memory_space<vmem>>, vector<16x32xf32>
    %1 = arith.truncf %0 : vector<16x32xf32> to vector<16x32xbf16>
    %c0_1 = arith.constant 0 : index
    %c0_2 = arith.constant 0 : index
    %2 = vector.load %arg2[%c0_1, %c0_2] : memref<32x32xbf16, #tpu.memory_space<vmem>>, vector<32x32xbf16>
    %cst = arith.constant dense<0.000000e+00> : vector<16x32xf32>
    %3 = tpu.matmul %1, %2, %cst {dimension_numbers = #tpu.dot_dimension_numbers<[1], [0], [0], [1], [0, 0, 1, 1], [], []>} : vector<16x32xbf16>, vector<32x32xbf16>, vector<16x32xf32> -> vector<16x32xf32>
    %c0_3 = arith.constant 0 : index
    %c0_4 = arith.constant 0 : index
    %4 = vector.load %arg3[%c0_3, %c0_4] : memref<1x32xf32, #tpu.memory_space<vmem>>, vector<1x32xf32>
    %5 = vector.broadcast %4 : vector<1x32xf32> to vector<16x32xf32>
    %6 = arith.addf %3, %5 : vector<16x32xf32>
    %c0_5 = arith.constant 0 : index
    %c0_6 = arith.constant 0 : index
    %7 = vector.load %arg4[%c0_5, %c0_6] : memref<16x32xf32, #tpu.memory_space<vmem>>, vector<16x32xf32>
    tpu.vector_store %arg4[%c0_5, %c0_6], %6 {strides = array<i32>} : memref<16x32xf32, #tpu.memory_space<vmem>>, vector<16x32xf32>,
    return
  }
  func.func @transform_0(%arg0: i32) -> (i32, i32) {
    %c0_i32 = arith.constant 0 : i32
    %c0_i32_0 = arith.constant 0 : i32
    return %arg0, %c0_i32 : i32, i32
  }
  func.func @transform_1(%arg0: i32) -> (i32, i32) {
    %c0_i32 = arith.constant 0 : i32
    %c0_i32_0 = arith.constant 0 : i32
    %c0_i32_1 = arith.constant 0 : i32
    return %c0_i32, %c0_i32_0 : i32, i32
  }
  func.func @transform_2(%arg0: i32) -> (i32, i32) {
    %c0_i32 = arith.constant 0 : i32
    %c0_i32_0 = arith.constant 0 : i32
    %c0_i32_1 = arith.constant 0 : i32
    return %c0_i32, %c0_i32_0 : i32, i32
  }
  func.func @transform_3(%arg0: i32) -> (i32, i32) {
    %c0_i32 = arith.constant 0 : i32
    %c0_i32_0 = arith.constant 0 : i32
    return %arg0, %c0_i32 : i32, i32
  }
}

module attributes {stable_mosaic.version = 11 : i64} {
  func.func @_linear_kernel(%arg0: i32, %arg1: memref<16x32xf32, #tpu.memory_space<vmem>>, %arg2: memref<32x384xbf16, #tpu.memory_space<vmem>>, %arg3: memref<1x384xf32, #tpu.memory_space<vmem>>, %arg4: memref<16x384xf32, #tpu.memory_space<vmem>>) attributes {dimension_semantics = [#tpu.dimension_semantics<parallel>], iteration_bounds = array<i64: 1>, scalar_prefetch = 0 : i64, scratch_operands = 0 : i64, tpu.core_type = #tpu.core_type<tc>, window_params = [{transform_indices = @transform_0, window_bounds = array<i64: 16, 32>}, {pipeline_mode = #tpu.pipeline_mode<synchronous>, transform_indices = @transform_1, window_bounds = array<i64: 32, 384>}, {pipeline_mode = #tpu.pipeline_mode<synchronous>, transform_indices = @transform_2, window_bounds = array<i64: 1, 384>}, {transform_indices = @transform_3, window_bounds = array<i64: 16, 384>}]} {
    %c0 = arith.constant 0 : index
    %c0_0 = arith.constant 0 : index
    %0 = vector.load %arg1[%c0, %c0_0] : memref<16x32xf32, #tpu.memory_space<vmem>>, vector<16x32xf32>
    %1 = arith.truncf %0 : vector<16x32xf32> to vector<16x32xbf16>
    %c0_1 = arith.constant 0 : index
    %c0_2 = arith.constant 0 : index
    %2 = vector.load %arg2[%c0_1, %c0_2] : memref<32x384xbf16, #tpu.memory_space<vmem>>, vector<32x384xbf16>
    %cst = arith.constant dense<0.000000e+00> : vector<16x384xf32>
    %3 = tpu.matmul %1, %2, %cst {dimension_numbers = #tpu.dot_dimension_numbers<[1], [0], [0], [1], [0, 0, 1, 1], [], []>} : vector<16x32xbf16>, vector<32x384xbf16>, vector<16x384xf32> -> vector<16x384xf32>
    %c0_3 = arith.constant 0 : index
    %c0_4 = arith.constant 0 : index
    %4 = vector.load %arg3[%c0_3, %c0_4] : memref<1x384xf32, #tpu.memory_space<vmem>>, vector<1x384xf32>
    %5 = vector.broadcast %4 : vector<1x384xf32> to vector<16x384xf32>
    %6 = arith.addf %3, %5 : vector<16x384xf32>
    %c0_5 = arith.constant 0 : index
    %c0_6 = arith.constant 0 : index
    %7 = vector.load %arg4[%c0_5, %c0_6] : memref<16x384xf32, #tpu.memory_space<vmem>>, vector<16x384xf32>
    tpu.vector_store %arg4[%c0_5, %c0_6], %6 {strides = array<i32>} : memref<16x384xf32, #tpu.memory_space<vmem>>, vector<16x384xf32>,
    return
  }
  func.func @transform_0(%arg0: i32) -> (i32, i32) {
    %c0_i32 = arith.constant 0 : i32
    %c0_i32_0 = arith.constant 0 : i32
    return %arg0, %c0_i32 : i32, i32
  }
  func.func @transform_1(%arg0: i32) -> (i32, i32) {
    %c0_i32 = arith.constant 0 : i32
    %c0_i32_0 = arith.constant 0 : i32
    %c0_i32_1 = arith.constant 0 : i32
    return %c0_i32, %c0_i32_0 : i32, i32
  }
  func.func @transform_2(%arg0: i32) -> (i32, i32) {
    %c0_i32 = arith.constant 0 : i32
    %c0_i32_0 = arith.constant 0 : i32
    %c0_i32_1 = arith.constant 0 : i32
    return %c0_i32, %c0_i32_0 : i32, i32
  }
  func.func @transform_3(%arg0: i32) -> (i32, i32) {
    %c0_i32 = arith.constant 0 : i32
    %c0_i32_0 = arith.constant 0 : i32
    return %arg0, %c0_i32 : i32, i32
  }
}

module attributes {stable_mosaic.version = 11 : i64} {
  func.func @_ipa_kernel(%arg0: i32, %arg1: i32, %arg2: i32, %arg3: memref<1x4x8x28xbf16, #tpu.memory_space<vmem>>, %arg4: memref<1x4x8x28xbf16, #tpu.memory_space<vmem>>, %arg5: memref<1x4x8x40xbf16, #tpu.memory_space<vmem>>, %arg6: memref<1x4x8x8xbf16, #tpu.memory_space<vmem>>, %arg7: memref<1x4x1x8xf32, #tpu.memory_space<vmem>>, %arg8: memref<1x8x1xf32, #tpu.memory_space<vmem>>, %arg9: memref<1x1x8xf32, #tpu.memory_space<vmem>>, %arg10: memref<1x8x8x8xbf16, #tpu.memory_space<vmem>>, %arg11: memref<1x8x160xf32, #tpu.memory_space<vmem>>, %arg12: memref<1x8x4x8xf32, #tpu.memory_space<vmem>>, %arg13: memref<4x8x1xf32, #tpu.memory_space<vmem>>, %arg14: memref<4x8x1xf32, #tpu.memory_space<vmem>>, %arg15: memref<4x8x40xf32, #tpu.memory_space<vmem>>, %arg16: memref<8x4x8xbf16, #tpu.memory_space<vmem>>, %arg17: memref<8x4x1xf32, #tpu.memory_space<vmem>>, %arg18: memref<8x4x8xf32, #tpu.memory_space<vmem>>) attributes {dimension_semantics = [#tpu.dimension_semantics<parallel>, #tpu.dimension_semantics<parallel>, #tpu.dimension_semantics<arbitrary>], iteration_bounds = array<i64: 2, 1, 1>, scalar_prefetch = 0 : i64, scratch_operands = 6 : i64, tpu.core_type = #tpu.core_type<tc>, window_params = [{transform_indices = @transform_0, window_bounds = array<i64: 1, 4, 8, 28>}, {transform_indices = @transform_1, window_bounds = array<i64: 1, 4, 8, 28>}, {transform_indices = @transform_2, window_bounds = array<i64: 1, 4, 8, 40>}, {transform_indices = @transform_3, window_bounds = array<i64: 1, 4, 8, 8>}, {transform_indices = @transform_4, window_bounds = array<i64: 1, 4, 1, 8>}, {transform_indices = @transform_5, window_bounds = array<i64: 1, 8, 1>}, {transform_indices = @transform_6, window_bounds = array<i64: 1, 1, 8>}, {transform_indices = @transform_7, window_bounds = array<i64: 1, 8, 8, 8>}, {transform_indices = @transform_8, window_bounds = array<i64: 1, 8, 160>}, {transform_indices = @transform_9, window_bounds = array<i64: 1, 8, 4, 8>}]} {
    %c0_i32 = arith.constant 0 : i32
    %0 = arith.cmpi eq, %arg2, %c0_i32 : i32
    %1 = arith.extui %0 : i1 to i32
    %c0_i32_0 = arith.constant 0 : i32
    %2 = arith.cmpi ne, %1, %c0_i32_0 : i32
    scf.if %2 {
      %cst_188 = arith.constant 0xFF800000 : f32
      %236 = vector.broadcast %cst_188 : f32 to vector<4x8x1xf32>
      %c0_189 = arith.constant 0 : index
      %c0_190 = arith.constant 0 : index
      %c0_191 = arith.constant 0 : index
      %237 = vector.load %arg13[%c0_189, %c0_190, %c0_191] : memref<4x8x1xf32, #tpu.memory_space<vmem>>, vector<4x8x1xf32>
      tpu.vector_store %arg13[%c0_189, %c0_190, %c0_191], %236 {strides = array<i32>} : memref<4x8x1xf32, #tpu.memory_space<vmem>>, vector<4x8x1xf32>,
      %cst_192 = arith.constant 0.000000e+00 : f32
      %238 = vector.broadcast %cst_192 : f32 to vector<4x8x1xf32>
      %c0_193 = arith.constant 0 : index
      %c0_194 = arith.constant 0 : index
      %c0_195 = arith.constant 0 : index
      %239 = vector.load %arg14[%c0_193, %c0_194, %c0_195] : memref<4x8x1xf32, #tpu.memory_space<vmem>>, vector<4x8x1xf32>
      tpu.vector_store %arg14[%c0_193, %c0_194, %c0_195], %238 {strides = array<i32>} : memref<4x8x1xf32, #tpu.memory_space<vmem>>, vector<4x8x1xf32>,
      %cst_196 = arith.constant 0.000000e+00 : f32
      %240 = vector.broadcast %cst_196 : f32 to vector<4x8x40xf32>
      %c0_197 = arith.constant 0 : index
      %c0_198 = arith.constant 0 : index
      %c0_199 = arith.constant 0 : index
      %241 = vector.load %arg15[%c0_197, %c0_198, %c0_199] : memref<4x8x40xf32, #tpu.memory_space<vmem>>, vector<4x8x40xf32>
      tpu.vector_store %arg15[%c0_197, %c0_198, %c0_199], %240 {strides = array<i32>} : memref<4x8x40xf32, #tpu.memory_space<vmem>>, vector<4x8x40xf32>,
      %cst_200 = arith.constant 0.000000e+00 : f32
      %242 = vector.broadcast %cst_200 : f32 to vector<8x4x8xf32>
      %c0_201 = arith.constant 0 : index
      %c0_202 = arith.constant 0 : index
      %c0_203 = arith.constant 0 : index
      %243 = vector.load %arg18[%c0_201, %c0_202, %c0_203] : memref<8x4x8xf32, #tpu.memory_space<vmem>>, vector<8x4x8xf32>
      tpu.vector_store %arg18[%c0_201, %c0_202, %c0_203], %242 {strides = array<i32>} : memref<8x4x8xf32, #tpu.memory_space<vmem>>, vector<8x4x8xf32>,
    } else {
    }
    %c0 = arith.constant 0 : index
    %c0_1 = arith.constant 0 : index
    %c0_2 = arith.constant 0 : index
    %c0_3 = arith.constant 0 : index
    %3 = vector.load %arg10[%c0, %c0_1, %c0_2, %c0_3] : memref<1x8x8x8xbf16, #tpu.memory_space<vmem>>, vector<1x8x8x8xbf16>
    %4 = vector.shape_cast %3 : vector<1x8x8x8xbf16> to vector<8x8x8xbf16>
    %c0_4 = arith.constant 0 : index
    %c0_5 = arith.constant 0 : index
    %c0_6 = arith.constant 0 : index
    %5 = vector.load %arg8[%c0_4, %c0_5, %c0_6] : memref<1x8x1xf32, #tpu.memory_space<vmem>>, vector<1x8x1xf32>
    %6 = vector.shape_cast %5 : vector<1x8x1xf32> to vector<8x1xf32>
    %c0_7 = arith.constant 0 : index
    %c0_8 = arith.constant 0 : index
    %c0_9 = arith.constant 0 : index
    %7 = vector.load %arg9[%c0_7, %c0_8, %c0_9] : memref<1x1x8xf32, #tpu.memory_space<vmem>>, vector<1x1x8xf32>
    %8 = vector.shape_cast %7 : vector<1x1x8xf32> to vector<1x8xf32>
    %9 = vector.broadcast %6 : vector<8x1xf32> to vector<8x8xf32>
    %10 = vector.broadcast %8 : vector<1x8xf32> to vector<8x8xf32>
    %11 = arith.mulf %9, %10 : vector<8x8xf32>
    %cst = arith.constant 1.000000e+00 : f32
    %12 = vector.broadcast %cst : f32 to vector<8x8xf32>
    %13 = arith.subf %11, %12 : vector<8x8xf32>
    %cst_10 = arith.constant 1.000000e+05 : f32
    %14 = vector.broadcast %cst_10 : f32 to vector<8x8xf32>
    %15 = arith.mulf %14, %13 : vector<8x8xf32>
    %c0_11 = arith.constant 0 : index
    %c0_12 = arith.constant 0 : index
    %c0_13 = arith.constant 0 : index
    %c0_14 = arith.constant 0 : index
    %16 = vector.load %arg3[%c0_11, %c0_12, %c0_13, %c0_14] : memref<1x4x8x28xbf16, #tpu.memory_space<vmem>>, vector<1x4x8x28xbf16>
    %17 = vector.shape_cast %16 : vector<1x4x8x28xbf16> to vector<4x8x28xbf16>
    %c0_15 = arith.constant 0 : index
    %c0_16 = arith.constant 0 : index
    %c0_17 = arith.constant 0 : index
    %c0_18 = arith.constant 0 : index
    %18 = vector.load %arg4[%c0_15, %c0_16, %c0_17, %c0_18] : memref<1x4x8x28xbf16, #tpu.memory_space<vmem>>, vector<1x4x8x28xbf16>
    %19 = vector.shape_cast %18 : vector<1x4x8x28xbf16> to vector<4x8x28xbf16>
    %cst_19 = arith.constant dense<0.000000e+00> : vector<4x8x8xf32>
    %20 = tpu.matmul %17, %19, %cst_19 {dimension_numbers = #tpu.dot_dimension_numbers<[2], [2], [1], [1], [0, 0, 0, 1, 1, 1], [0], [0]>} : vector<4x8x28xbf16>, vector<4x8x28xbf16>, vector<4x8x8xf32> -> vector<4x8x8xf32>
    %21 = vector.extract_strided_slice %20 {offsets = [0, 0, 0], sizes = [1, 8, 8], strides = [1, 1, 1]} : vector<4x8x8xf32> to vector<1x8x8xf32>
    %22 = vector.shape_cast %21 : vector<1x8x8xf32> to vector<8x8xf32>
    %c0_20 = arith.constant 0 : index
    %c0_21 = arith.constant 0 : index
    %c0_22 = arith.constant 0 : index
    %c0_23 = arith.constant 0 : index
    %23 = vector.load %arg6[%c0_20, %c0_21, %c0_22, %c0_23] : memref<1x4x8x8xbf16, #tpu.memory_space<vmem>>, vector<1x1x8x8xbf16>
    %24 = vector.shape_cast %23 : vector<1x1x8x8xbf16> to vector<8x8xbf16>
    %25 = arith.extf %24 : vector<8x8xbf16> to vector<8x8xf32>
    %26 = arith.addf %22, %25 : vector<8x8xf32>
    %c0_24 = arith.constant 0 : index
    %c0_25 = arith.constant 0 : index
    %c0_26 = arith.constant 0 : index
    %c0_27 = arith.constant 0 : index
    %27 = vector.load %arg7[%c0_24, %c0_25, %c0_26, %c0_27] : memref<1x4x1x8xf32, #tpu.memory_space<vmem>>, vector<1x1x1x8xf32>
    %28 = vector.shape_cast %27 : vector<1x1x1x8xf32> to vector<1x8xf32>
    %29 = vector.broadcast %28 : vector<1x8xf32> to vector<8x8xf32>
    %30 = arith.addf %26, %29 : vector<8x8xf32>
    %31 = arith.addf %30, %15 : vector<8x8xf32>
    %c0_28 = arith.constant 0 : index
    %c0_29 = arith.constant 0 : index
    %c0_30 = arith.constant 0 : index
    %32 = vector.load %arg13[%c0_28, %c0_29, %c0_30] : memref<4x8x1xf32, #tpu.memory_space<vmem>>, vector<1x8x1xf32>
    %33 = vector.shape_cast %32 : vector<1x8x1xf32> to vector<8x1xf32>
    %cst_31 = arith.constant dense<0xFF800000> : vector<8xf32>
    %34 = vector.multi_reduction <maximumf>, %31, %cst_31 [1] : vector<8x8xf32> to vector<8xf32>
    %35 = vector.shape_cast %34 : vector<8xf32> to vector<8x1xf32>
    %36 = arith.maximumf %33, %35 : vector<8x1xf32>
    %37 = arith.subf %33, %36 : vector<8x1xf32>
    %38 = math.exp %37 : vector<8x1xf32>
    %39 = vector.broadcast %36 : vector<8x1xf32> to vector<8x8xf32>
    %40 = arith.subf %31, %39 : vector<8x8xf32>
    %41 = math.exp %40 : vector<8x8xf32>
    %c0_32 = arith.constant 0 : index
    %c0_33 = arith.constant 0 : index
    %c0_34 = arith.constant 0 : index
    %42 = vector.load %arg14[%c0_32, %c0_33, %c0_34] : memref<4x8x1xf32, #tpu.memory_space<vmem>>, vector<1x8x1xf32>
    %43 = vector.shape_cast %42 : vector<1x8x1xf32> to vector<8x1xf32>
    %44 = arith.mulf %38, %43 : vector<8x1xf32>
    %cst_35 = arith.constant dense<0.000000e+00> : vector<8xf32>
    %45 = vector.multi_reduction <add>, %41, %cst_35 [1] : vector<8x8xf32> to vector<8xf32>
    %46 = vector.shape_cast %45 : vector<8xf32> to vector<8x1xf32>
    %47 = arith.addf %44, %46 : vector<8x1xf32>
    %c0_36 = arith.constant 0 : index
    %c0_37 = arith.constant 0 : index
    %c0_38 = arith.constant 0 : index
    %48 = vector.load %arg14[%c0_36, %c0_37, %c0_38] : memref<4x8x1xf32, #tpu.memory_space<vmem>>, vector<1x8x1xf32>
    %49 = vector.shape_cast %48 : vector<1x8x1xf32> to vector<8x1xf32>
    %50 = vector.shape_cast %47 : vector<8x1xf32> to vector<1x8x1xf32>
    tpu.vector_store %arg14[%c0_36, %c0_37, %c0_38], %50 {strides = array<i32>} : memref<4x8x1xf32, #tpu.memory_space<vmem>>, vector<1x8x1xf32>,
    %c0_39 = arith.constant 0 : index
    %c0_40 = arith.constant 0 : index
    %c0_41 = arith.constant 0 : index
    %51 = vector.load %arg13[%c0_39, %c0_40, %c0_41] : memref<4x8x1xf32, #tpu.memory_space<vmem>>, vector<1x8x1xf32>
    %52 = vector.shape_cast %51 : vector<1x8x1xf32> to vector<8x1xf32>
    %53 = vector.shape_cast %36 : vector<8x1xf32> to vector<1x8x1xf32>
    tpu.vector_store %arg13[%c0_39, %c0_40, %c0_41], %53 {strides = array<i32>} : memref<4x8x1xf32, #tpu.memory_space<vmem>>, vector<1x8x1xf32>,
    %54 = arith.truncf %41 : vector<8x8xf32> to vector<8x8xbf16>
    %c0_42 = arith.constant 0 : index
    %c0_43 = arith.constant 0 : index
    %c0_44 = arith.constant 0 : index
    %55 = vector.load %arg15[%c0_42, %c0_43, %c0_44] : memref<4x8x40xf32, #tpu.memory_space<vmem>>, vector<1x8x40xf32>
    %56 = vector.shape_cast %55 : vector<1x8x40xf32> to vector<8x40xf32>
    %57 = vector.broadcast %38 : vector<8x1xf32> to vector<8x40xf32>
    %58 = arith.mulf %57, %56 : vector<8x40xf32>
    %c0_45 = arith.constant 0 : index
    %c0_46 = arith.constant 0 : index
    %c0_47 = arith.constant 0 : index
    %c0_48 = arith.constant 0 : index
    %59 = vector.load %arg5[%c0_45, %c0_46, %c0_47, %c0_48] : memref<1x4x8x40xbf16, #tpu.memory_space<vmem>>, vector<1x1x8x40xbf16>
    %60 = vector.shape_cast %59 : vector<1x1x8x40xbf16> to vector<8x40xbf16>
    %cst_49 = arith.constant dense<0.000000e+00> : vector<8x40xf32>
    %61 = tpu.matmul %54, %60, %cst_49 {dimension_numbers = #tpu.dot_dimension_numbers<[1], [0], [0], [1], [0, 0, 1, 1], [], []>} : vector<8x8xbf16>, vector<8x40xbf16>, vector<8x40xf32> -> vector<8x40xf32>
    %62 = arith.addf %58, %61 : vector<8x40xf32>
    %c0_50 = arith.constant 0 : index
    %c0_51 = arith.constant 0 : index
    %c0_52 = arith.constant 0 : index
    %63 = vector.load %arg15[%c0_50, %c0_51, %c0_52] : memref<4x8x40xf32, #tpu.memory_space<vmem>>, vector<1x8x40xf32>
    %64 = vector.shape_cast %63 : vector<1x8x40xf32> to vector<8x40xf32>
    %65 = vector.shape_cast %62 : vector<8x40xf32> to vector<1x8x40xf32>
    tpu.vector_store %arg15[%c0_50, %c0_51, %c0_52], %65 {strides = array<i32>} : memref<4x8x40xf32, #tpu.memory_space<vmem>>, vector<1x8x40xf32>,
    %c0_53 = arith.constant 0 : index
    %c0_54 = arith.constant 0 : index
    %c0_55 = arith.constant 0 : index
    %66 = vector.load %arg16[%c0_53, %c0_54, %c0_55] : memref<8x4x8xbf16, #tpu.memory_space<vmem>>, vector<8x1x8xbf16>
    %67 = vector.shape_cast %66 : vector<8x1x8xbf16> to vector<8x8xbf16>
    %68 = vector.shape_cast %54 : vector<8x8xbf16> to vector<8x1x8xbf16>
    tpu.vector_store %arg16[%c0_53, %c0_54, %c0_55], %68 {strides = array<i32>} : memref<8x4x8xbf16, #tpu.memory_space<vmem>>, vector<8x1x8xbf16>,
    %c0_56 = arith.constant 0 : index
    %c0_57 = arith.constant 0 : index
    %c0_58 = arith.constant 0 : index
    %69 = vector.load %arg17[%c0_56, %c0_57, %c0_58] : memref<8x4x1xf32, #tpu.memory_space<vmem>>, vector<8x1x1xf32>
    %70 = vector.shape_cast %69 : vector<8x1x1xf32> to vector<8x1xf32>
    %71 = vector.shape_cast %38 : vector<8x1xf32> to vector<8x1x1xf32>
    tpu.vector_store %arg17[%c0_56, %c0_57, %c0_58], %71 {strides = array<i32>} : memref<8x4x1xf32, #tpu.memory_space<vmem>>, vector<8x1x1xf32>,
    %72 = vector.extract_strided_slice %20 {offsets = [1, 0, 0], sizes = [1, 8, 8], strides = [1, 1, 1]} : vector<4x8x8xf32> to vector<1x8x8xf32>
    %73 = vector.shape_cast %72 : vector<1x8x8xf32> to vector<8x8xf32>
    %c0_59 = arith.constant 0 : index
    %c1 = arith.constant 1 : index
    %c0_60 = arith.constant 0 : index
    %c0_61 = arith.constant 0 : index
    %74 = vector.load %arg6[%c0_59, %c1, %c0_60, %c0_61] : memref<1x4x8x8xbf16, #tpu.memory_space<vmem>>, vector<1x1x8x8xbf16>
    %75 = vector.shape_cast %74 : vector<1x1x8x8xbf16> to vector<8x8xbf16>
    %76 = arith.extf %75 : vector<8x8xbf16> to vector<8x8xf32>
    %77 = arith.addf %73, %76 : vector<8x8xf32>
    %c0_62 = arith.constant 0 : index
    %c1_63 = arith.constant 1 : index
    %c0_64 = arith.constant 0 : index
    %c0_65 = arith.constant 0 : index
    %78 = vector.load %arg7[%c0_62, %c1_63, %c0_64, %c0_65] : memref<1x4x1x8xf32, #tpu.memory_space<vmem>>, vector<1x1x1x8xf32>
    %79 = vector.shape_cast %78 : vector<1x1x1x8xf32> to vector<1x8xf32>
    %80 = vector.broadcast %79 : vector<1x8xf32> to vector<8x8xf32>
    %81 = arith.addf %77, %80 : vector<8x8xf32>
    %82 = arith.addf %81, %15 : vector<8x8xf32>
    %c1_66 = arith.constant 1 : index
    %c0_67 = arith.constant 0 : index
    %c0_68 = arith.constant 0 : index
    %83 = vector.load %arg13[%c1_66, %c0_67, %c0_68] : memref<4x8x1xf32, #tpu.memory_space<vmem>>, vector<1x8x1xf32>
    %84 = vector.shape_cast %83 : vector<1x8x1xf32> to vector<8x1xf32>
    %cst_69 = arith.constant dense<0xFF800000> : vector<8xf32>
    %85 = vector.multi_reduction <maximumf>, %82, %cst_69 [1] : vector<8x8xf32> to vector<8xf32>
    %86 = vector.shape_cast %85 : vector<8xf32> to vector<8x1xf32>
    %87 = arith.maximumf %84, %86 : vector<8x1xf32>
    %88 = arith.subf %84, %87 : vector<8x1xf32>
    %89 = math.exp %88 : vector<8x1xf32>
    %90 = vector.broadcast %87 : vector<8x1xf32> to vector<8x8xf32>
    %91 = arith.subf %82, %90 : vector<8x8xf32>
    %92 = math.exp %91 : vector<8x8xf32>
    %c1_70 = arith.constant 1 : index
    %c0_71 = arith.constant 0 : index
    %c0_72 = arith.constant 0 : index
    %93 = vector.load %arg14[%c1_70, %c0_71, %c0_72] : memref<4x8x1xf32, #tpu.memory_space<vmem>>, vector<1x8x1xf32>
    %94 = vector.shape_cast %93 : vector<1x8x1xf32> to vector<8x1xf32>
    %95 = arith.mulf %89, %94 : vector<8x1xf32>
    %cst_73 = arith.constant dense<0.000000e+00> : vector<8xf32>
    %96 = vector.multi_reduction <add>, %92, %cst_73 [1] : vector<8x8xf32> to vector<8xf32>
    %97 = vector.shape_cast %96 : vector<8xf32> to vector<8x1xf32>
    %98 = arith.addf %95, %97 : vector<8x1xf32>
    %c1_74 = arith.constant 1 : index
    %c0_75 = arith.constant 0 : index
    %c0_76 = arith.constant 0 : index
    %99 = vector.load %arg14[%c1_74, %c0_75, %c0_76] : memref<4x8x1xf32, #tpu.memory_space<vmem>>, vector<1x8x1xf32>
    %100 = vector.shape_cast %99 : vector<1x8x1xf32> to vector<8x1xf32>
    %101 = vector.shape_cast %98 : vector<8x1xf32> to vector<1x8x1xf32>
    tpu.vector_store %arg14[%c1_74, %c0_75, %c0_76], %101 {strides = array<i32>} : memref<4x8x1xf32, #tpu.memory_space<vmem>>, vector<1x8x1xf32>,
    %c1_77 = arith.constant 1 : index
    %c0_78 = arith.constant 0 : index
    %c0_79 = arith.constant 0 : index
    %102 = vector.load %arg13[%c1_77, %c0_78, %c0_79] : memref<4x8x1xf32, #tpu.memory_space<vmem>>, vector<1x8x1xf32>
    %103 = vector.shape_cast %102 : vector<1x8x1xf32> to vector<8x1xf32>
    %104 = vector.shape_cast %87 : vector<8x1xf32> to vector<1x8x1xf32>
    tpu.vector_store %arg13[%c1_77, %c0_78, %c0_79], %104 {strides = array<i32>} : memref<4x8x1xf32, #tpu.memory_space<vmem>>, vector<1x8x1xf32>,
    %105 = arith.truncf %92 : vector<8x8xf32> to vector<8x8xbf16>
    %c1_80 = arith.constant 1 : index
    %c0_81 = arith.constant 0 : index
    %c0_82 = arith.constant 0 : index
    %106 = vector.load %arg15[%c1_80, %c0_81, %c0_82] : memref<4x8x40xf32, #tpu.memory_space<vmem>>, vector<1x8x40xf32>
    %107 = vector.shape_cast %106 : vector<1x8x40xf32> to vector<8x40xf32>
    %108 = vector.broadcast %89 : vector<8x1xf32> to vector<8x40xf32>
    %109 = arith.mulf %108, %107 : vector<8x40xf32>
    %c0_83 = arith.constant 0 : index
    %c1_84 = arith.constant 1 : index
    %c0_85 = arith.constant 0 : index
    %c0_86 = arith.constant 0 : index
    %110 = vector.load %arg5[%c0_83, %c1_84, %c0_85, %c0_86] : memref<1x4x8x40xbf16, #tpu.memory_space<vmem>>, vector<1x1x8x40xbf16>
    %111 = vector.shape_cast %110 : vector<1x1x8x40xbf16> to vector<8x40xbf16>
    %cst_87 = arith.constant dense<0.000000e+00> : vector<8x40xf32>
    %112 = tpu.matmul %105, %111, %cst_87 {dimension_numbers = #tpu.dot_dimension_numbers<[1], [0], [0], [1], [0, 0, 1, 1], [], []>} : vector<8x8xbf16>, vector<8x40xbf16>, vector<8x40xf32> -> vector<8x40xf32>
    %113 = arith.addf %109, %112 : vector<8x40xf32>
    %c1_88 = arith.constant 1 : index
    %c0_89 = arith.constant 0 : index
    %c0_90 = arith.constant 0 : index
    %114 = vector.load %arg15[%c1_88, %c0_89, %c0_90] : memref<4x8x40xf32, #tpu.memory_space<vmem>>, vector<1x8x40xf32>
    %115 = vector.shape_cast %114 : vector<1x8x40xf32> to vector<8x40xf32>
    %116 = vector.shape_cast %113 : vector<8x40xf32> to vector<1x8x40xf32>
    tpu.vector_store %arg15[%c1_88, %c0_89, %c0_90], %116 {strides = array<i32>} : memref<4x8x40xf32, #tpu.memory_space<vmem>>, vector<1x8x40xf32>,
    %c0_91 = arith.constant 0 : index
    %c1_92 = arith.constant 1 : index
    %c0_93 = arith.constant 0 : index
    %117 = vector.load %arg16[%c0_91, %c1_92, %c0_93] : memref<8x4x8xbf16, #tpu.memory_space<vmem>>, vector<8x1x8xbf16>
    %118 = vector.shape_cast %117 : vector<8x1x8xbf16> to vector<8x8xbf16>
    %119 = vector.shape_cast %105 : vector<8x8xbf16> to vector<8x1x8xbf16>
    tpu.vector_store %arg16[%c0_91, %c1_92, %c0_93], %119 {strides = array<i32>} : memref<8x4x8xbf16, #tpu.memory_space<vmem>>, vector<8x1x8xbf16>,
    %c0_94 = arith.constant 0 : index
    %c1_95 = arith.constant 1 : index
    %c0_96 = arith.constant 0 : index
    %120 = vector.load %arg17[%c0_94, %c1_95, %c0_96] : memref<8x4x1xf32, #tpu.memory_space<vmem>>, vector<8x1x1xf32>
    %121 = vector.shape_cast %120 : vector<8x1x1xf32> to vector<8x1xf32>
    %122 = vector.shape_cast %89 : vector<8x1xf32> to vector<8x1x1xf32>
    tpu.vector_store %arg17[%c0_94, %c1_95, %c0_96], %122 {strides = array<i32>} : memref<8x4x1xf32, #tpu.memory_space<vmem>>, vector<8x1x1xf32>,
    %123 = vector.extract_strided_slice %20 {offsets = [2, 0, 0], sizes = [1, 8, 8], strides = [1, 1, 1]} : vector<4x8x8xf32> to vector<1x8x8xf32>
    %124 = vector.shape_cast %123 : vector<1x8x8xf32> to vector<8x8xf32>
    %c0_97 = arith.constant 0 : index
    %c2 = arith.constant 2 : index
    %c0_98 = arith.constant 0 : index
    %c0_99 = arith.constant 0 : index
    %125 = vector.load %arg6[%c0_97, %c2, %c0_98, %c0_99] : memref<1x4x8x8xbf16, #tpu.memory_space<vmem>>, vector<1x1x8x8xbf16>
    %126 = vector.shape_cast %125 : vector<1x1x8x8xbf16> to vector<8x8xbf16>
    %127 = arith.extf %126 : vector<8x8xbf16> to vector<8x8xf32>
    %128 = arith.addf %124, %127 : vector<8x8xf32>
    %c0_100 = arith.constant 0 : index
    %c2_101 = arith.constant 2 : index
    %c0_102 = arith.constant 0 : index
    %c0_103 = arith.constant 0 : index
    %129 = vector.load %arg7[%c0_100, %c2_101, %c0_102, %c0_103] : memref<1x4x1x8xf32, #tpu.memory_space<vmem>>, vector<1x1x1x8xf32>
    %130 = vector.shape_cast %129 : vector<1x1x1x8xf32> to vector<1x8xf32>
    %131 = vector.broadcast %130 : vector<1x8xf32> to vector<8x8xf32>
    %132 = arith.addf %128, %131 : vector<8x8xf32>
    %133 = arith.addf %132, %15 : vector<8x8xf32>
    %c2_104 = arith.constant 2 : index
    %c0_105 = arith.constant 0 : index
    %c0_106 = arith.constant 0 : index
    %134 = vector.load %arg13[%c2_104, %c0_105, %c0_106] : memref<4x8x1xf32, #tpu.memory_space<vmem>>, vector<1x8x1xf32>
    %135 = vector.shape_cast %134 : vector<1x8x1xf32> to vector<8x1xf32>
    %cst_107 = arith.constant dense<0xFF800000> : vector<8xf32>
    %136 = vector.multi_reduction <maximumf>, %133, %cst_107 [1] : vector<8x8xf32> to vector<8xf32>
    %137 = vector.shape_cast %136 : vector<8xf32> to vector<8x1xf32>
    %138 = arith.maximumf %135, %137 : vector<8x1xf32>
    %139 = arith.subf %135, %138 : vector<8x1xf32>
    %140 = math.exp %139 : vector<8x1xf32>
    %141 = vector.broadcast %138 : vector<8x1xf32> to vector<8x8xf32>
    %142 = arith.subf %133, %141 : vector<8x8xf32>
    %143 = math.exp %142 : vector<8x8xf32>
    %c2_108 = arith.constant 2 : index
    %c0_109 = arith.constant 0 : index
    %c0_110 = arith.constant 0 : index
    %144 = vector.load %arg14[%c2_108, %c0_109, %c0_110] : memref<4x8x1xf32, #tpu.memory_space<vmem>>, vector<1x8x1xf32>
    %145 = vector.shape_cast %144 : vector<1x8x1xf32> to vector<8x1xf32>
    %146 = arith.mulf %140, %145 : vector<8x1xf32>
    %cst_111 = arith.constant dense<0.000000e+00> : vector<8xf32>
    %147 = vector.multi_reduction <add>, %143, %cst_111 [1] : vector<8x8xf32> to vector<8xf32>
    %148 = vector.shape_cast %147 : vector<8xf32> to vector<8x1xf32>
    %149 = arith.addf %146, %148 : vector<8x1xf32>
    %c2_112 = arith.constant 2 : index
    %c0_113 = arith.constant 0 : index
    %c0_114 = arith.constant 0 : index
    %150 = vector.load %arg14[%c2_112, %c0_113, %c0_114] : memref<4x8x1xf32, #tpu.memory_space<vmem>>, vector<1x8x1xf32>
    %151 = vector.shape_cast %150 : vector<1x8x1xf32> to vector<8x1xf32>
    %152 = vector.shape_cast %149 : vector<8x1xf32> to vector<1x8x1xf32>
    tpu.vector_store %arg14[%c2_112, %c0_113, %c0_114], %152 {strides = array<i32>} : memref<4x8x1xf32, #tpu.memory_space<vmem>>, vector<1x8x1xf32>,
    %c2_115 = arith.constant 2 : index
    %c0_116 = arith.constant 0 : index
    %c0_117 = arith.constant 0 : index
    %153 = vector.load %arg13[%c2_115, %c0_116, %c0_117] : memref<4x8x1xf32, #tpu.memory_space<vmem>>, vector<1x8x1xf32>
    %154 = vector.shape_cast %153 : vector<1x8x1xf32> to vector<8x1xf32>
    %155 = vector.shape_cast %138 : vector<8x1xf32> to vector<1x8x1xf32>
    tpu.vector_store %arg13[%c2_115, %c0_116, %c0_117], %155 {strides = array<i32>} : memref<4x8x1xf32, #tpu.memory_space<vmem>>, vector<1x8x1xf32>,
    %156 = arith.truncf %143 : vector<8x8xf32> to vector<8x8xbf16>
    %c2_118 = arith.constant 2 : index
    %c0_119 = arith.constant 0 : index
    %c0_120 = arith.constant 0 : index
    %157 = vector.load %arg15[%c2_118, %c0_119, %c0_120] : memref<4x8x40xf32, #tpu.memory_space<vmem>>, vector<1x8x40xf32>
    %158 = vector.shape_cast %157 : vector<1x8x40xf32> to vector<8x40xf32>
    %159 = vector.broadcast %140 : vector<8x1xf32> to vector<8x40xf32>
    %160 = arith.mulf %159, %158 : vector<8x40xf32>
    %c0_121 = arith.constant 0 : index
    %c2_122 = arith.constant 2 : index
    %c0_123 = arith.constant 0 : index
    %c0_124 = arith.constant 0 : index
    %161 = vector.load %arg5[%c0_121, %c2_122, %c0_123, %c0_124] : memref<1x4x8x40xbf16, #tpu.memory_space<vmem>>, vector<1x1x8x40xbf16>
    %162 = vector.shape_cast %161 : vector<1x1x8x40xbf16> to vector<8x40xbf16>
    %cst_125 = arith.constant dense<0.000000e+00> : vector<8x40xf32>
    %163 = tpu.matmul %156, %162, %cst_125 {dimension_numbers = #tpu.dot_dimension_numbers<[1], [0], [0], [1], [0, 0, 1, 1], [], []>} : vector<8x8xbf16>, vector<8x40xbf16>, vector<8x40xf32> -> vector<8x40xf32>
    %164 = arith.addf %160, %163 : vector<8x40xf32>
    %c2_126 = arith.constant 2 : index
    %c0_127 = arith.constant 0 : index
    %c0_128 = arith.constant 0 : index
    %165 = vector.load %arg15[%c2_126, %c0_127, %c0_128] : memref<4x8x40xf32, #tpu.memory_space<vmem>>, vector<1x8x40xf32>
    %166 = vector.shape_cast %165 : vector<1x8x40xf32> to vector<8x40xf32>
    %167 = vector.shape_cast %164 : vector<8x40xf32> to vector<1x8x40xf32>
    tpu.vector_store %arg15[%c2_126, %c0_127, %c0_128], %167 {strides = array<i32>} : memref<4x8x40xf32, #tpu.memory_space<vmem>>, vector<1x8x40xf32>,
    %c0_129 = arith.constant 0 : index
    %c2_130 = arith.constant 2 : index
    %c0_131 = arith.constant 0 : index
    %168 = vector.load %arg16[%c0_129, %c2_130, %c0_131] : memref<8x4x8xbf16, #tpu.memory_space<vmem>>, vector<8x1x8xbf16>
    %169 = vector.shape_cast %168 : vector<8x1x8xbf16> to vector<8x8xbf16>
    %170 = vector.shape_cast %156 : vector<8x8xbf16> to vector<8x1x8xbf16>
    tpu.vector_store %arg16[%c0_129, %c2_130, %c0_131], %170 {strides = array<i32>} : memref<8x4x8xbf16, #tpu.memory_space<vmem>>, vector<8x1x8xbf16>,
    %c0_132 = arith.constant 0 : index
    %c2_133 = arith.constant 2 : index
    %c0_134 = arith.constant 0 : index
    %171 = vector.load %arg17[%c0_132, %c2_133, %c0_134] : memref<8x4x1xf32, #tpu.memory_space<vmem>>, vector<8x1x1xf32>
    %172 = vector.shape_cast %171 : vector<8x1x1xf32> to vector<8x1xf32>
    %173 = vector.shape_cast %140 : vector<8x1xf32> to vector<8x1x1xf32>
    tpu.vector_store %arg17[%c0_132, %c2_133, %c0_134], %173 {strides = array<i32>} : memref<8x4x1xf32, #tpu.memory_space<vmem>>, vector<8x1x1xf32>,
    %174 = vector.extract_strided_slice %20 {offsets = [3, 0, 0], sizes = [1, 8, 8], strides = [1, 1, 1]} : vector<4x8x8xf32> to vector<1x8x8xf32>
    %175 = vector.shape_cast %174 : vector<1x8x8xf32> to vector<8x8xf32>
    %c0_135 = arith.constant 0 : index
    %c3 = arith.constant 3 : index
    %c0_136 = arith.constant 0 : index
    %c0_137 = arith.constant 0 : index
    %176 = vector.load %arg6[%c0_135, %c3, %c0_136, %c0_137] : memref<1x4x8x8xbf16, #tpu.memory_space<vmem>>, vector<1x1x8x8xbf16>
    %177 = vector.shape_cast %176 : vector<1x1x8x8xbf16> to vector<8x8xbf16>
    %178 = arith.extf %177 : vector<8x8xbf16> to vector<8x8xf32>
    %179 = arith.addf %175, %178 : vector<8x8xf32>
    %c0_138 = arith.constant 0 : index
    %c3_139 = arith.constant 3 : index
    %c0_140 = arith.constant 0 : index
    %c0_141 = arith.constant 0 : index
    %180 = vector.load %arg7[%c0_138, %c3_139, %c0_140, %c0_141] : memref<1x4x1x8xf32, #tpu.memory_space<vmem>>, vector<1x1x1x8xf32>
    %181 = vector.shape_cast %180 : vector<1x1x1x8xf32> to vector<1x8xf32>
    %182 = vector.broadcast %181 : vector<1x8xf32> to vector<8x8xf32>
    %183 = arith.addf %179, %182 : vector<8x8xf32>
    %184 = arith.addf %183, %15 : vector<8x8xf32>
    %c3_142 = arith.constant 3 : index
    %c0_143 = arith.constant 0 : index
    %c0_144 = arith.constant 0 : index
    %185 = vector.load %arg13[%c3_142, %c0_143, %c0_144] : memref<4x8x1xf32, #tpu.memory_space<vmem>>, vector<1x8x1xf32>
    %186 = vector.shape_cast %185 : vector<1x8x1xf32> to vector<8x1xf32>
    %cst_145 = arith.constant dense<0xFF800000> : vector<8xf32>
    %187 = vector.multi_reduction <maximumf>, %184, %cst_145 [1] : vector<8x8xf32> to vector<8xf32>
    %188 = vector.shape_cast %187 : vector<8xf32> to vector<8x1xf32>
    %189 = arith.maximumf %186, %188 : vector<8x1xf32>
    %190 = arith.subf %186, %189 : vector<8x1xf32>
    %191 = math.exp %190 : vector<8x1xf32>
    %192 = vector.broadcast %189 : vector<8x1xf32> to vector<8x8xf32>
    %193 = arith.subf %184, %192 : vector<8x8xf32>
    %194 = math.exp %193 : vector<8x8xf32>
    %c3_146 = arith.constant 3 : index
    %c0_147 = arith.constant 0 : index
    %c0_148 = arith.constant 0 : index
    %195 = vector.load %arg14[%c3_146, %c0_147, %c0_148] : memref<4x8x1xf32, #tpu.memory_space<vmem>>, vector<1x8x1xf32>
    %196 = vector.shape_cast %195 : vector<1x8x1xf32> to vector<8x1xf32>
    %197 = arith.mulf %191, %196 : vector<8x1xf32>
    %cst_149 = arith.constant dense<0.000000e+00> : vector<8xf32>
    %198 = vector.multi_reduction <add>, %194, %cst_149 [1] : vector<8x8xf32> to vector<8xf32>
    %199 = vector.shape_cast %198 : vector<8xf32> to vector<8x1xf32>
    %200 = arith.addf %197, %199 : vector<8x1xf32>
    %c3_150 = arith.constant 3 : index
    %c0_151 = arith.constant 0 : index
    %c0_152 = arith.constant 0 : index
    %201 = vector.load %arg14[%c3_150, %c0_151, %c0_152] : memref<4x8x1xf32, #tpu.memory_space<vmem>>, vector<1x8x1xf32>
    %202 = vector.shape_cast %201 : vector<1x8x1xf32> to vector<8x1xf32>
    %203 = vector.shape_cast %200 : vector<8x1xf32> to vector<1x8x1xf32>
    tpu.vector_store %arg14[%c3_150, %c0_151, %c0_152], %203 {strides = array<i32>} : memref<4x8x1xf32, #tpu.memory_space<vmem>>, vector<1x8x1xf32>,
    %c3_153 = arith.constant 3 : index
    %c0_154 = arith.constant 0 : index
    %c0_155 = arith.constant 0 : index
    %204 = vector.load %arg13[%c3_153, %c0_154, %c0_155] : memref<4x8x1xf32, #tpu.memory_space<vmem>>, vector<1x8x1xf32>
    %205 = vector.shape_cast %204 : vector<1x8x1xf32> to vector<8x1xf32>
    %206 = vector.shape_cast %189 : vector<8x1xf32> to vector<1x8x1xf32>
    tpu.vector_store %arg13[%c3_153, %c0_154, %c0_155], %206 {strides = array<i32>} : memref<4x8x1xf32, #tpu.memory_space<vmem>>, vector<1x8x1xf32>,
    %207 = arith.truncf %194 : vector<8x8xf32> to vector<8x8xbf16>
    %c3_156 = arith.constant 3 : index
    %c0_157 = arith.constant 0 : index
    %c0_158 = arith.constant 0 : index
    %208 = vector.load %arg15[%c3_156, %c0_157, %c0_158] : memref<4x8x40xf32, #tpu.memory_space<vmem>>, vector<1x8x40xf32>
    %209 = vector.shape_cast %208 : vector<1x8x40xf32> to vector<8x40xf32>
    %210 = vector.broadcast %191 : vector<8x1xf32> to vector<8x40xf32>
    %211 = arith.mulf %210, %209 : vector<8x40xf32>
    %c0_159 = arith.constant 0 : index
    %c3_160 = arith.constant 3 : index
    %c0_161 = arith.constant 0 : index
    %c0_162 = arith.constant 0 : index
    %212 = vector.load %arg5[%c0_159, %c3_160, %c0_161, %c0_162] : memref<1x4x8x40xbf16, #tpu.memory_space<vmem>>, vector<1x1x8x40xbf16>
    %213 = vector.shape_cast %212 : vector<1x1x8x40xbf16> to vector<8x40xbf16>
    %cst_163 = arith.constant dense<0.000000e+00> : vector<8x40xf32>
    %214 = tpu.matmul %207, %213, %cst_163 {dimension_numbers = #tpu.dot_dimension_numbers<[1], [0], [0], [1], [0, 0, 1, 1], [], []>} : vector<8x8xbf16>, vector<8x40xbf16>, vector<8x40xf32> -> vector<8x40xf32>
    %215 = arith.addf %211, %214 : vector<8x40xf32>
    %c3_164 = arith.constant 3 : index
    %c0_165 = arith.constant 0 : index
    %c0_166 = arith.constant 0 : index
    %216 = vector.load %arg15[%c3_164, %c0_165, %c0_166] : memref<4x8x40xf32, #tpu.memory_space<vmem>>, vector<1x8x40xf32>
    %217 = vector.shape_cast %216 : vector<1x8x40xf32> to vector<8x40xf32>
    %218 = vector.shape_cast %215 : vector<8x40xf32> to vector<1x8x40xf32>
    tpu.vector_store %arg15[%c3_164, %c0_165, %c0_166], %218 {strides = array<i32>} : memref<4x8x40xf32, #tpu.memory_space<vmem>>, vector<1x8x40xf32>,
    %c0_167 = arith.constant 0 : index
    %c3_168 = arith.constant 3 : index
    %c0_169 = arith.constant 0 : index
    %219 = vector.load %arg16[%c0_167, %c3_168, %c0_169] : memref<8x4x8xbf16, #tpu.memory_space<vmem>>, vector<8x1x8xbf16>
    %220 = vector.shape_cast %219 : vector<8x1x8xbf16> to vector<8x8xbf16>
    %221 = vector.shape_cast %207 : vector<8x8xbf16> to vector<8x1x8xbf16>
    tpu.vector_store %arg16[%c0_167, %c3_168, %c0_169], %221 {strides = array<i32>} : memref<8x4x8xbf16, #tpu.memory_space<vmem>>, vector<8x1x8xbf16>,
    %c0_170 = arith.constant 0 : index
    %c3_171 = arith.constant 3 : index
    %c0_172 = arith.constant 0 : index
    %222 = vector.load %arg17[%c0_170, %c3_171, %c0_172] : memref<8x4x1xf32, #tpu.memory_space<vmem>>, vector<8x1x1xf32>
    %223 = vector.shape_cast %222 : vector<8x1x1xf32> to vector<8x1xf32>
    %224 = vector.shape_cast %191 : vector<8x1xf32> to vector<8x1x1xf32>
    tpu.vector_store %arg17[%c0_170, %c3_171, %c0_172], %224 {strides = array<i32>} : memref<8x4x1xf32, #tpu.memory_space<vmem>>, vector<8x1x1xf32>,
    %c0_173 = arith.constant 0 : index
    %c0_174 = arith.constant 0 : index
    %c0_175 = arith.constant 0 : index
    %225 = vector.load %arg16[%c0_173, %c0_174, %c0_175] : memref<8x4x8xbf16, #tpu.memory_space<vmem>>, vector<8x4x8xbf16>
    %cst_176 = arith.constant dense<0.000000e+00> : vector<8x4x8xf32>
    %226 = tpu.matmul %225, %4, %cst_176 {dimension_numbers = #tpu.dot_dimension_numbers<[2], [1], [1], [2], [0, 0, 0, 1, 1, 2], [0], [0]>} : vector<8x4x8xbf16>, vector<8x8x8xbf16>, vector<8x4x8xf32> -> vector<8x4x8xf32>
    %c0_177 = arith.constant 0 : index
    %c0_178 = arith.constant 0 : index
    %c0_179 = arith.constant 0 : index
    %227 = vector.load %arg17[%c0_177, %c0_178, %c0_179] : memref<8x4x1xf32, #tpu.memory_space<vmem>>, vector<8x4x1xf32>
    %c0_180 = arith.constant 0 : index
    %c0_181 = arith.constant 0 : index
    %c0_182 = arith.constant 0 : index
    %228 = vector.load %arg18[%c0_180, %c0_181, %c0_182] : memref<8x4x8xf32, #tpu.memory_space<vmem>>, vector<8x4x8xf32>
    %229 = vector.broadcast %227 : vector<8x4x1xf32> to vector<8x4x8xf32>
    %230 = arith.mulf %229, %228 : vector<8x4x8xf32>
    %231 = arith.addf %230, %226 : vector<8x4x8xf32>
    %c0_183 = arith.constant 0 : index
    %c0_184 = arith.constant 0 : index
    %c0_185 = arith.constant 0 : index
    %232 = vector.load %arg18[%c0_183, %c0_184, %c0_185] : memref<8x4x8xf32, #tpu.memory_space<vmem>>, vector<8x4x8xf32>
    tpu.vector_store %arg18[%c0_183, %c0_184, %c0_185], %231 {strides = array<i32>} : memref<8x4x8xf32, #tpu.memory_space<vmem>>, vector<8x4x8xf32>,
    %c0_i32_186 = arith.constant 0 : i32
    %233 = arith.cmpi eq, %arg2, %c0_i32_186 : i32
    %234 = arith.extui %233 : i1 to i32
    %c0_i32_187 = arith.constant 0 : i32
    %235 = arith.cmpi ne, %234, %c0_i32_187 : i32
    scf.if %235 {
      %c0_188 = arith.constant 0 : index
      %c0_189 = arith.constant 0 : index
      %c0_190 = arith.constant 0 : index
      %236 = vector.load %arg14[%c0_188, %c0_189, %c0_190] : memref<4x8x1xf32, #tpu.memory_space<vmem>>, vector<1x8x1xf32>
      %237 = vector.shape_cast %236 : vector<1x8x1xf32> to vector<8x1xf32>
      %238 = tpu.reciprocal %237 {approx = true} : vector<8x1xf32> -> vector<8x1xf32>
      %c0_191 = arith.constant 0 : index
      %c0_192 = arith.constant 0 : index
      %c0_193 = arith.constant 0 : index
      %239 = vector.load %arg15[%c0_191, %c0_192, %c0_193] : memref<4x8x40xf32, #tpu.memory_space<vmem>>, vector<1x8x40xf32>
      %240 = vector.shape_cast %239 : vector<1x8x40xf32> to vector<8x40xf32>
      %241 = vector.broadcast %238 : vector<8x1xf32> to vector<8x40xf32>
      %242 = arith.mulf %240, %241 : vector<8x40xf32>
      %c0_194 = arith.constant 0 : index
      %c0_195 = arith.constant 0 : index
      %c0_196 = arith.constant 0 : index
      %243 = vector.load %arg17[%c0_194, %c0_195, %c0_196] : memref<8x4x1xf32, #tpu.memory_space<vmem>>, vector<8x1x1xf32>
      %244 = vector.shape_cast %243 : vector<8x1x1xf32> to vector<8x1xf32>
      %245 = vector.shape_cast %238 : vector<8x1xf32> to vector<8x1x1xf32>
      tpu.vector_store %arg17[%c0_194, %c0_195, %c0_196], %245 {strides = array<i32>} : memref<8x4x1xf32, #tpu.memory_space<vmem>>, vector<8x1x1xf32>,
      %c1_197 = arith.constant 1 : index
      %c0_198 = arith.constant 0 : index
      %c0_199 = arith.constant 0 : index
      %246 = vector.load %arg14[%c1_197, %c0_198, %c0_199] : memref<4x8x1xf32, #tpu.memory_space<vmem>>, vector<1x8x1xf32>
      %247 = vector.shape_cast %246 : vector<1x8x1xf32> to vector<8x1xf32>
      %248 = tpu.reciprocal %247 {approx = true} : vector<8x1xf32> -> vector<8x1xf32>
      %c1_200 = arith.constant 1 : index
      %c0_201 = arith.constant 0 : index
      %c0_202 = arith.constant 0 : index
      %249 = vector.load %arg15[%c1_200, %c0_201, %c0_202] : memref<4x8x40xf32, #tpu.memory_space<vmem>>, vector<1x8x40xf32>
      %250 = vector.shape_cast %249 : vector<1x8x40xf32> to vector<8x40xf32>
      %251 = vector.broadcast %248 : vector<8x1xf32> to vector<8x40xf32>
      %252 = arith.mulf %250, %251 : vector<8x40xf32>
      %c0_203 = arith.constant 0 : index
      %c1_204 = arith.constant 1 : index
      %c0_205 = arith.constant 0 : index
      %253 = vector.load %arg17[%c0_203, %c1_204, %c0_205] : memref<8x4x1xf32, #tpu.memory_space<vmem>>, vector<8x1x1xf32>
      %254 = vector.shape_cast %253 : vector<8x1x1xf32> to vector<8x1xf32>
      %255 = vector.shape_cast %248 : vector<8x1xf32> to vector<8x1x1xf32>
      tpu.vector_store %arg17[%c0_203, %c1_204, %c0_205], %255 {strides = array<i32>} : memref<8x4x1xf32, #tpu.memory_space<vmem>>, vector<8x1x1xf32>,
      %c2_206 = arith.constant 2 : index
      %c0_207 = arith.constant 0 : index
      %c0_208 = arith.constant 0 : index
      %256 = vector.load %arg14[%c2_206, %c0_207, %c0_208] : memref<4x8x1xf32, #tpu.memory_space<vmem>>, vector<1x8x1xf32>
      %257 = vector.shape_cast %256 : vector<1x8x1xf32> to vector<8x1xf32>
      %258 = tpu.reciprocal %257 {approx = true} : vector<8x1xf32> -> vector<8x1xf32>
      %c2_209 = arith.constant 2 : index
      %c0_210 = arith.constant 0 : index
      %c0_211 = arith.constant 0 : index
      %259 = vector.load %arg15[%c2_209, %c0_210, %c0_211] : memref<4x8x40xf32, #tpu.memory_space<vmem>>, vector<1x8x40xf32>
      %260 = vector.shape_cast %259 : vector<1x8x40xf32> to vector<8x40xf32>
      %261 = vector.broadcast %258 : vector<8x1xf32> to vector<8x40xf32>
      %262 = arith.mulf %260, %261 : vector<8x40xf32>
      %c0_212 = arith.constant 0 : index
      %c2_213 = arith.constant 2 : index
      %c0_214 = arith.constant 0 : index
      %263 = vector.load %arg17[%c0_212, %c2_213, %c0_214] : memref<8x4x1xf32, #tpu.memory_space<vmem>>, vector<8x1x1xf32>
      %264 = vector.shape_cast %263 : vector<8x1x1xf32> to vector<8x1xf32>
      %265 = vector.shape_cast %258 : vector<8x1xf32> to vector<8x1x1xf32>
      tpu.vector_store %arg17[%c0_212, %c2_213, %c0_214], %265 {strides = array<i32>} : memref<8x4x1xf32, #tpu.memory_space<vmem>>, vector<8x1x1xf32>,
      %c3_215 = arith.constant 3 : index
      %c0_216 = arith.constant 0 : index
      %c0_217 = arith.constant 0 : index
      %266 = vector.load %arg14[%c3_215, %c0_216, %c0_217] : memref<4x8x1xf32, #tpu.memory_space<vmem>>, vector<1x8x1xf32>
      %267 = vector.shape_cast %266 : vector<1x8x1xf32> to vector<8x1xf32>
      %268 = tpu.reciprocal %267 {approx = true} : vector<8x1xf32> -> vector<8x1xf32>
      %c3_218 = arith.constant 3 : index
      %c0_219 = arith.constant 0 : index
      %c0_220 = arith.constant 0 : index
      %269 = vector.load %arg15[%c3_218, %c0_219, %c0_220] : memref<4x8x40xf32, #tpu.memory_space<vmem>>, vector<1x8x40xf32>
      %270 = vector.shape_cast %269 : vector<1x8x40xf32> to vector<8x40xf32>
      %271 = vector.broadcast %268 : vector<8x1xf32> to vector<8x40xf32>
      %272 = arith.mulf %270, %271 : vector<8x40xf32>
      %c0_221 = arith.constant 0 : index
      %c3_222 = arith.constant 3 : index
      %c0_223 = arith.constant 0 : index
      %273 = vector.load %arg17[%c0_221, %c3_222, %c0_223] : memref<8x4x1xf32, #tpu.memory_space<vmem>>, vector<8x1x1xf32>
      %274 = vector.shape_cast %273 : vector<8x1x1xf32> to vector<8x1xf32>
      %275 = vector.shape_cast %268 : vector<8x1xf32> to vector<8x1x1xf32>
      tpu.vector_store %arg17[%c0_221, %c3_222, %c0_223], %275 {strides = array<i32>} : memref<8x4x1xf32, #tpu.memory_space<vmem>>, vector<8x1x1xf32>,
      %276 = tpu.concatenate %242, %252, %262, %272 in 1 : vector<8x40xf32>, vector<8x40xf32>, vector<8x40xf32>, vector<8x40xf32> -> vector<8x160xf32>
      %c0_224 = arith.constant 0 : index
      %c0_225 = arith.constant 0 : index
      %c0_226 = arith.constant 0 : index
      %277 = vector.load %arg11[%c0_224, %c0_225, %c0_226] : memref<1x8x160xf32, #tpu.memory_space<vmem>>, vector<1x8x160xf32>
      %278 = vector.shape_cast %277 : vector<1x8x160xf32> to vector<8x160xf32>
      %279 = vector.shape_cast %276 : vector<8x160xf32> to vector<1x8x160xf32>
      tpu.vector_store %arg11[%c0_224, %c0_225, %c0_226], %279 {strides = array<i32>} : memref<1x8x160xf32, #tpu.memory_space<vmem>>, vector<1x8x160xf32>,
      %c0_227 = arith.constant 0 : index
      %c0_228 = arith.constant 0 : index
      %c0_229 = arith.constant 0 : index
      %280 = vector.load %arg18[%c0_227, %c0_228, %c0_229] : memref<8x4x8xf32, #tpu.memory_space<vmem>>, vector<8x4x8xf32>
      %c0_230 = arith.constant 0 : index
      %c0_231 = arith.constant 0 : index
      %c0_232 = arith.constant 0 : index
      %281 = vector.load %arg17[%c0_230, %c0_231, %c0_232] : memref<8x4x1xf32, #tpu.memory_space<vmem>>, vector<8x4x1xf32>
      %282 = vector.broadcast %281 : vector<8x4x1xf32> to vector<8x4x8xf32>
      %283 = arith.mulf %280, %282 : vector<8x4x8xf32>
      %c0_233 = arith.constant 0 : index
      %c0_234 = arith.constant 0 : index
      %c0_235 = arith.constant 0 : index
      %c0_236 = arith.constant 0 : index
      %284 = vector.load %arg12[%c0_233, %c0_234, %c0_235, %c0_236] : memref<1x8x4x8xf32, #tpu.memory_space<vmem>>, vector<1x8x4x8xf32>
      %285 = vector.shape_cast %284 : vector<1x8x4x8xf32> to vector<8x4x8xf32>
      %286 = vector.shape_cast %283 : vector<8x4x8xf32> to vector<1x8x4x8xf32>
      tpu.vector_store %arg12[%c0_233, %c0_234, %c0_235, %c0_236], %286 {strides = array<i32>} : memref<1x8x4x8xf32, #tpu.memory_space<vmem>>, vector<1x8x4x8xf32>,
    } else {
    }
    return
  }
  func.func @transform_0(%arg0: i32, %arg1: i32, %arg2: i32) -> (i32, i32, i32, i32) {
    %c0_i32 = arith.constant 0 : i32
    %c0_i32_0 = arith.constant 0 : i32
    %c0_i32_1 = arith.constant 0 : i32
    return %arg0, %c0_i32, %arg1, %c0_i32_0 : i32, i32, i32, i32
  }
  func.func @transform_1(%arg0: i32, %arg1: i32, %arg2: i32) -> (i32, i32, i32, i32) {
    %c0_i32 = arith.constant 0 : i32
    %c0_i32_0 = arith.constant 0 : i32
    %c0_i32_1 = arith.constant 0 : i32
    return %arg0, %c0_i32, %arg2, %c0_i32_0 : i32, i32, i32, i32
  }
  func.func @transform_2(%arg0: i32, %arg1: i32, %arg2: i32) -> (i32, i32, i32, i32) {
    %c0_i32 = arith.constant 0 : i32
    %c0_i32_0 = arith.constant 0 : i32
    %c0_i32_1 = arith.constant 0 : i32
    return %arg0, %c0_i32, %arg2, %c0_i32_0 : i32, i32, i32, i32
  }
  func.func @transform_3(%arg0: i32, %arg1: i32, %arg2: i32) -> (i32, i32, i32, i32) {
    %c0_i32 = arith.constant 0 : i32
    %c0_i32_0 = arith.constant 0 : i32
    return %arg0, %c0_i32, %arg1, %arg2 : i32, i32, i32, i32
  }
  func.func @transform_4(%arg0: i32, %arg1: i32, %arg2: i32) -> (i32, i32, i32, i32) {
    %c0_i32 = arith.constant 0 : i32
    %c0_i32_0 = arith.constant 0 : i32
    %c0_i32_1 = arith.constant 0 : i32
    return %arg0, %c0_i32, %c0_i32_0, %arg2 : i32, i32, i32, i32
  }
  func.func @transform_5(%arg0: i32, %arg1: i32, %arg2: i32) -> (i32, i32, i32) {
    %c0_i32 = arith.constant 0 : i32
    %c0_i32_0 = arith.constant 0 : i32
    return %arg0, %arg1, %c0_i32 : i32, i32, i32
  }
  func.func @transform_6(%arg0: i32, %arg1: i32, %arg2: i32) -> (i32, i32, i32) {
    %c0_i32 = arith.constant 0 : i32
    %c0_i32_0 = arith.constant 0 : i32
    return %arg0, %c0_i32, %arg2 : i32, i32, i32
  }
  func.func @transform_7(%arg0: i32, %arg1: i32, %arg2: i32) -> (i32, i32, i32, i32) {
    %c0_i32 = arith.constant 0 : i32
    %c0_i32_0 = arith.constant 0 : i32
    return %arg0, %arg1, %arg2, %c0_i32 : i32, i32, i32, i32
  }
  func.func @transform_8(%arg0: i32, %arg1: i32, %arg2: i32) -> (i32, i32, i32) {
    %c0_i32 = arith.constant 0 : i32
    %c0_i32_0 = arith.constant 0 : i32
    return %arg0, %arg1, %c0_i32 : i32, i32, i32
  }
  func.func @transform_9(%arg0: i32, %arg1: i32, %arg2: i32) -> (i32, i32, i32, i32) {
    %c0_i32 = arith.constant 0 : i32
    %c0_i32_0 = arith.constant 0 : i32
    %c0_i32_1 = arith.constant 0 : i32
    return %arg0, %arg1, %c0_i32, %c0_i32_0 : i32, i32, i32, i32
  }
}

module attributes {stable_mosaic.version = 11 : i64} {
  func.func @_linear_kernel(%arg0: i32, %arg1: memref<128x8xbf16, #tpu.memory_space<vmem>>, %arg2: memref<8x4xbf16, #tpu.memory_space<vmem>>, %arg3: memref<1x4xf32, #tpu.memory_space<vmem>>, %arg4: memref<128x4xbf16, #tpu.memory_space<vmem>>) attributes {dimension_semantics = [#tpu.dimension_semantics<parallel>], iteration_bounds = array<i64: 1>, scalar_prefetch = 0 : i64, scratch_operands = 0 : i64, tpu.core_type = #tpu.core_type<tc>, window_params = [{transform_indices = @transform_0, window_bounds = array<i64: 128, 8>}, {pipeline_mode = #tpu.pipeline_mode<synchronous>, transform_indices = @transform_1, window_bounds = array<i64: 8, 4>}, {pipeline_mode = #tpu.pipeline_mode<synchronous>, transform_indices = @transform_2, window_bounds = array<i64: 1, 4>}, {transform_indices = @transform_3, window_bounds = array<i64: 128, 4>}]} {
    %c0 = arith.constant 0 : index
    %c0_0 = arith.constant 0 : index
    %0 = vector.load %arg1[%c0, %c0_0] : memref<128x8xbf16, #tpu.memory_space<vmem>>, vector<128x8xbf16>
    %c0_1 = arith.constant 0 : index
    %c0_2 = arith.constant 0 : index
    %1 = vector.load %arg2[%c0_1, %c0_2] : memref<8x4xbf16, #tpu.memory_space<vmem>>, vector<8x4xbf16>
    %cst = arith.constant dense<0.000000e+00> : vector<128x4xf32>
    %2 = tpu.matmul %0, %1, %cst {dimension_numbers = #tpu.dot_dimension_numbers<[1], [0], [0], [1], [0, 0, 1, 1], [], []>} : vector<128x8xbf16>, vector<8x4xbf16>, vector<128x4xf32> -> vector<128x4xf32>
    %c0_3 = arith.constant 0 : index
    %c0_4 = arith.constant 0 : index
    %3 = vector.load %arg3[%c0_3, %c0_4] : memref<1x4xf32, #tpu.memory_space<vmem>>, vector<1x4xf32>
    %4 = vector.broadcast %3 : vector<1x4xf32> to vector<128x4xf32>
    %5 = arith.addf %2, %4 : vector<128x4xf32>
    %6 = arith.truncf %5 : vector<128x4xf32> to vector<128x4xbf16>
    %c0_5 = arith.constant 0 : index
    %c0_6 = arith.constant 0 : index
    %7 = vector.load %arg4[%c0_5, %c0_6] : memref<128x4xbf16, #tpu.memory_space<vmem>>, vector<128x4xbf16>
    tpu.vector_store %arg4[%c0_5, %c0_6], %6 {strides = array<i32>} : memref<128x4xbf16, #tpu.memory_space<vmem>>, vector<128x4xbf16>,
    return
  }
  func.func @transform_0(%arg0: i32) -> (i32, i32) {
    %c0_i32 = arith.constant 0 : i32
    %c0_i32_0 = arith.constant 0 : i32
    return %arg0, %c0_i32 : i32, i32
  }
  func.func @transform_1(%arg0: i32) -> (i32, i32) {
    %c0_i32 = arith.constant 0 : i32
    %c0_i32_0 = arith.constant 0 : i32
    %c0_i32_1 = arith.constant 0 : i32
    return %c0_i32, %c0_i32_0 : i32, i32
  }
  func.func @transform_2(%arg0: i32) -> (i32, i32) {
    %c0_i32 = arith.constant 0 : i32
    %c0_i32_0 = arith.constant 0 : i32
    %c0_i32_1 = arith.constant 0 : i32
    return %c0_i32, %c0_i32_0 : i32, i32
  }
  func.func @transform_3(%arg0: i32) -> (i32, i32) {
    %c0_i32 = arith.constant 0 : i32
    %c0_i32_0 = arith.constant 0 : i32
    return %arg0, %c0_i32 : i32, i32
  }
}

module attributes {stable_mosaic.version = 11 : i64} {
  func.func @_layernorm_kernel(%arg0: i32, %arg1: memref<128x8xf32, #tpu.memory_space<vmem>>, %arg2: memref<1x8xf32, #tpu.memory_space<vmem>>, %arg3: memref<1x8xf32, #tpu.memory_space<vmem>>, %arg4: memref<128x8xbf16, #tpu.memory_space<vmem>>) attributes {dimension_semantics = [#tpu.dimension_semantics<parallel>], iteration_bounds = array<i64: 1>, scalar_prefetch = 0 : i64, scratch_operands = 0 : i64, tpu.core_type = #tpu.core_type<tc>, window_params = [{transform_indices = @transform_0, window_bounds = array<i64: 128, 8>}, {pipeline_mode = #tpu.pipeline_mode<synchronous>, transform_indices = @transform_1, window_bounds = array<i64: 1, 8>}, {pipeline_mode = #tpu.pipeline_mode<synchronous>, transform_indices = @transform_2, window_bounds = array<i64: 1, 8>}, {transform_indices = @transform_3, window_bounds = array<i64: 128, 8>}]} {
    %c0 = arith.constant 0 : index
    %c0_0 = arith.constant 0 : index
    %0 = vector.load %arg1[%c0, %c0_0] : memref<128x8xf32, #tpu.memory_space<vmem>>, vector<128x8xf32>
    %cst = arith.constant dense<0.000000e+00> : vector<128xf32>
    %1 = vector.multi_reduction <add>, %0, %cst [1] : vector<128x8xf32> to vector<128xf32>
    %2 = vector.shape_cast %1 : vector<128xf32> to vector<128x1xf32>
    %cst_1 = arith.constant 8.000000e+00 : f32
    %3 = vector.broadcast %cst_1 : f32 to vector<128x1xf32>
    %4 = arith.divf %2, %3 : vector<128x1xf32>
    %5 = vector.broadcast %4 : vector<128x1xf32> to vector<128x8xf32>
    %6 = arith.subf %0, %5 : vector<128x8xf32>
    %7 = arith.mulf %6, %6 : vector<128x8xf32>
    %cst_2 = arith.constant dense<0.000000e+00> : vector<128xf32>
    %8 = vector.multi_reduction <add>, %7, %cst_2 [1] : vector<128x8xf32> to vector<128xf32>
    %9 = vector.shape_cast %8 : vector<128xf32> to vector<128x1xf32>
    %cst_3 = arith.constant 8.000000e+00 : f32
    %10 = vector.broadcast %cst_3 : f32 to vector<128x1xf32>
    %11 = arith.divf %9, %10 : vector<128x1xf32>
    %cst_4 = arith.constant 9.99999974E-6 : f32
    %12 = vector.broadcast %cst_4 : f32 to vector<128x1xf32>
    %13 = arith.addf %11, %12 : vector<128x1xf32>
    %14 = math.rsqrt %13 : vector<128x1xf32>
    %15 = vector.broadcast %14 : vector<128x1xf32> to vector<128x8xf32>
    %16 = arith.mulf %6, %15 : vector<128x8xf32>
    %c0_5 = arith.constant 0 : index
    %c0_6 = arith.constant 0 : index
    %17 = vector.load %arg2[%c0_5, %c0_6] : memref<1x8xf32, #tpu.memory_space<vmem>>, vector<1x8xf32>
    %18 = vector.broadcast %17 : vector<1x8xf32> to vector<128x8xf32>
    %19 = arith.mulf %16, %18 : vector<128x8xf32>
    %c0_7 = arith.constant 0 : index
    %c0_8 = arith.constant 0 : index
    %20 = vector.load %arg3[%c0_7, %c0_8] : memref<1x8xf32, #tpu.memory_space<vmem>>, vector<1x8xf32>
    %21 = vector.broadcast %20 : vector<1x8xf32> to vector<128x8xf32>
    %22 = arith.addf %19, %21 : vector<128x8xf32>
    %23 = arith.truncf %22 : vector<128x8xf32> to vector<128x8xbf16>
    %c0_9 = arith.constant 0 : index
    %c0_10 = arith.constant 0 : index
    %24 = vector.load %arg4[%c0_9, %c0_10] : memref<128x8xbf16, #tpu.memory_space<vmem>>, vector<128x8xbf16>
    tpu.vector_store %arg4[%c0_9, %c0_10], %23 {strides = array<i32>} : memref<128x8xbf16, #tpu.memory_space<vmem>>, vector<128x8xbf16>,
    return
  }
  func.func @transform_0(%arg0: i32) -> (i32, i32) {
    %c0_i32 = arith.constant 0 : i32
    %c0_i32_0 = arith.constant 0 : i32
    return %arg0, %c0_i32 : i32, i32
  }
  func.func @transform_1(%arg0: i32) -> (i32, i32) {
    %c0_i32 = arith.constant 0 : i32
    %c0_i32_0 = arith.constant 0 : i32
    %c0_i32_1 = arith.constant 0 : i32
    return %c0_i32, %c0_i32_0 : i32, i32
  }
  func.func @transform_2(%arg0: i32) -> (i32, i32) {
    %c0_i32 = arith.constant 0 : i32
    %c0_i32_0 = arith.constant 0 : i32
    %c0_i32_1 = arith.constant 0 : i32
    return %c0_i32, %c0_i32_0 : i32, i32
  }
  func.func @transform_3(%arg0: i32) -> (i32, i32) {
    %c0_i32 = arith.constant 0 : i32
    %c0_i32_0 = arith.constant 0 : i32
    return %arg0, %c0_i32 : i32, i32
  }
}

module attributes {stable_mosaic.version = 11 : i64} {
  func.func @_linear_res_ln_kernel(%arg0: i32, %arg1: memref<16x224xf32, #tpu.memory_space<vmem>>, %arg2: memref<224x32xbf16, #tpu.memory_space<vmem>>, %arg3: memref<1x32xf32, #tpu.memory_space<vmem>>, %arg4: memref<16x32xf32, #tpu.memory_space<vmem>>, %arg5: memref<1x32xf32, #tpu.memory_space<vmem>>, %arg6: memref<1x32xf32, #tpu.memory_space<vmem>>, %arg7: memref<16x32xf32, #tpu.memory_space<vmem>>) attributes {dimension_semantics = [#tpu.dimension_semantics<parallel>], iteration_bounds = array<i64: 1>, scalar_prefetch = 0 : i64, scratch_operands = 0 : i64, tpu.core_type = #tpu.core_type<tc>, window_params = [{transform_indices = @transform_0, window_bounds = array<i64: 16, 224>}, {pipeline_mode = #tpu.pipeline_mode<synchronous>, transform_indices = @transform_1, window_bounds = array<i64: 224, 32>}, {pipeline_mode = #tpu.pipeline_mode<synchronous>, transform_indices = @transform_2, window_bounds = array<i64: 1, 32>}, {transform_indices = @transform_3, window_bounds = array<i64: 16, 32>}, {pipeline_mode = #tpu.pipeline_mode<synchronous>, transform_indices = @transform_4, window_bounds = array<i64: 1, 32>}, {pipeline_mode = #tpu.pipeline_mode<synchronous>, transform_indices = @transform_5, window_bounds = array<i64: 1, 32>}, {transform_indices = @transform_6, window_bounds = array<i64: 16, 32>}]} {
    %c0 = arith.constant 0 : index
    %c0_0 = arith.constant 0 : index
    %0 = vector.load %arg1[%c0, %c0_0] : memref<16x224xf32, #tpu.memory_space<vmem>>, vector<16x224xf32>
    %1 = arith.truncf %0 : vector<16x224xf32> to vector<16x224xbf16>
    %c0_1 = arith.constant 0 : index
    %c0_2 = arith.constant 0 : index
    %2 = vector.load %arg2[%c0_1, %c0_2] : memref<224x32xbf16, #tpu.memory_space<vmem>>, vector<224x32xbf16>
    %cst = arith.constant dense<0.000000e+00> : vector<16x32xf32>
    %3 = tpu.matmul %1, %2, %cst {dimension_numbers = #tpu.dot_dimension_numbers<[1], [0], [0], [1], [0, 0, 1, 1], [], []>} : vector<16x224xbf16>, vector<224x32xbf16>, vector<16x32xf32> -> vector<16x32xf32>
    %c0_3 = arith.constant 0 : index
    %c0_4 = arith.constant 0 : index
    %4 = vector.load %arg3[%c0_3, %c0_4] : memref<1x32xf32, #tpu.memory_space<vmem>>, vector<1x32xf32>
    %5 = vector.broadcast %4 : vector<1x32xf32> to vector<16x32xf32>
    %6 = arith.addf %3, %5 : vector<16x32xf32>
    %c0_5 = arith.constant 0 : index
    %c0_6 = arith.constant 0 : index
    %7 = vector.load %arg4[%c0_5, %c0_6] : memref<16x32xf32, #tpu.memory_space<vmem>>, vector<16x32xf32>
    %8 = arith.addf %6, %7 : vector<16x32xf32>
    %cst_7 = arith.constant dense<0.000000e+00> : vector<16xf32>
    %9 = vector.multi_reduction <add>, %8, %cst_7 [1] : vector<16x32xf32> to vector<16xf32>
    %10 = vector.shape_cast %9 : vector<16xf32> to vector<16x1xf32>
    %cst_8 = arith.constant 3.200000e+01 : f32
    %11 = vector.broadcast %cst_8 : f32 to vector<16x1xf32>
    %12 = arith.divf %10, %11 : vector<16x1xf32>
    %13 = vector.broadcast %12 : vector<16x1xf32> to vector<16x32xf32>
    %14 = arith.subf %8, %13 : vector<16x32xf32>
    %15 = arith.mulf %14, %14 : vector<16x32xf32>
    %cst_9 = arith.constant dense<0.000000e+00> : vector<16xf32>
    %16 = vector.multi_reduction <add>, %15, %cst_9 [1] : vector<16x32xf32> to vector<16xf32>
    %17 = vector.shape_cast %16 : vector<16xf32> to vector<16x1xf32>
    %cst_10 = arith.constant 3.200000e+01 : f32
    %18 = vector.broadcast %cst_10 : f32 to vector<16x1xf32>
    %19 = arith.divf %17, %18 : vector<16x1xf32>
    %cst_11 = arith.constant 9.99999974E-6 : f32
    %20 = vector.broadcast %cst_11 : f32 to vector<16x1xf32>
    %21 = arith.addf %19, %20 : vector<16x1xf32>
    %22 = math.rsqrt %21 : vector<16x1xf32>
    %23 = vector.broadcast %22 : vector<16x1xf32> to vector<16x32xf32>
    %24 = arith.mulf %14, %23 : vector<16x32xf32>
    %c0_12 = arith.constant 0 : index
    %c0_13 = arith.constant 0 : index
    %25 = vector.load %arg5[%c0_12, %c0_13] : memref<1x32xf32, #tpu.memory_space<vmem>>, vector<1x32xf32>
    %26 = vector.broadcast %25 : vector<1x32xf32> to vector<16x32xf32>
    %27 = arith.mulf %24, %26 : vector<16x32xf32>
    %c0_14 = arith.constant 0 : index
    %c0_15 = arith.constant 0 : index
    %28 = vector.load %arg6[%c0_14, %c0_15] : memref<1x32xf32, #tpu.memory_space<vmem>>, vector<1x32xf32>
    %29 = vector.broadcast %28 : vector<1x32xf32> to vector<16x32xf32>
    %30 = arith.addf %27, %29 : vector<16x32xf32>
    %c0_16 = arith.constant 0 : index
    %c0_17 = arith.constant 0 : index
    %31 = vector.load %arg7[%c0_16, %c0_17] : memref<16x32xf32, #tpu.memory_space<vmem>>, vector<16x32xf32>
    tpu.vector_store %arg7[%c0_16, %c0_17], %30 {strides = array<i32>} : memref<16x32xf32, #tpu.memory_space<vmem>>, vector<16x32xf32>,
    return
  }
  func.func @transform_0(%arg0: i32) -> (i32, i32) {
    %c0_i32 = arith.constant 0 : i32
    %c0_i32_0 = arith.constant 0 : i32
    return %arg0, %c0_i32 : i32, i32
  }
  func.func @transform_1(%arg0: i32) -> (i32, i32) {
    %c0_i32 = arith.constant 0 : i32
    %c0_i32_0 = arith.constant 0 : i32
    %c0_i32_1 = arith.constant 0 : i32
    return %c0_i32, %c0_i32_0 : i32, i32
  }
  func.func @transform_2(%arg0: i32) -> (i32, i32) {
    %c0_i32 = arith.constant 0 : i32
    %c0_i32_0 = arith.constant 0 : i32
    %c0_i32_1 = arith.constant 0 : i32
    return %c0_i32, %c0_i32_0 : i32, i32
  }
  func.func @transform_3(%arg0: i32) -> (i32, i32) {
    %c0_i32 = arith.constant 0 : i32
    %c0_i32_0 = arith.constant 0 : i32
    return %arg0, %c0_i32 : i32, i32
  }
  func.func @transform_4(%arg0: i32) -> (i32, i32) {
    %c0_i32 = arith.constant 0 : i32
    %c0_i32_0 = arith.constant 0 : i32
    %c0_i32_1 = arith.constant 0 : i32
    return %c0_i32, %c0_i32_0 : i32, i32
  }
  func.func @transform_5(%arg0: i32) -> (i32, i32) {
    %c0_i32 = arith.constant 0 : i32
    %c0_i32_0 = arith.constant 0 : i32
    %c0_i32_1 = arith.constant 0 : i32
    return %c0_i32, %c0_i32_0 : i32, i32
  }
  func.func @transform_6(%arg0: i32) -> (i32, i32) {
    %c0_i32 = arith.constant 0 : i32
    %c0_i32_0 = arith.constant 0 : i32
    return %arg0, %c0_i32 : i32, i32
  }
}

module attributes {stable_mosaic.version = 11 : i64} {
  func.func @_transition_kernel(%arg0: i32, %arg1: memref<16x32xf32, #tpu.memory_space<vmem>>, %arg2: memref<32x32xbf16, #tpu.memory_space<vmem>>, %arg3: memref<1x32xf32, #tpu.memory_space<vmem>>, %arg4: memref<32x32xbf16, #tpu.memory_space<vmem>>, %arg5: memref<1x32xf32, #tpu.memory_space<vmem>>, %arg6: memref<32x32xbf16, #tpu.memory_space<vmem>>, %arg7: memref<1x32xf32, #tpu.memory_space<vmem>>, %arg8: memref<1x32xf32, #tpu.memory_space<vmem>>, %arg9: memref<1x32xf32, #tpu.memory_space<vmem>>, %arg10: memref<16x32xf32, #tpu.memory_space<vmem>>) attributes {dimension_semantics = [#tpu.dimension_semantics<parallel>], iteration_bounds = array<i64: 1>, scalar_prefetch = 0 : i64, scratch_operands = 0 : i64, tpu.core_type = #tpu.core_type<tc>, window_params = [{transform_indices = @transform_0, window_bounds = array<i64: 16, 32>}, {pipeline_mode = #tpu.pipeline_mode<synchronous>, transform_indices = @transform_1, window_bounds = array<i64: 32, 32>}, {pipeline_mode = #tpu.pipeline_mode<synchronous>, transform_indices = @transform_2, window_bounds = array<i64: 1, 32>}, {pipeline_mode = #tpu.pipeline_mode<synchronous>, transform_indices = @transform_3, window_bounds = array<i64: 32, 32>}, {pipeline_mode = #tpu.pipeline_mode<synchronous>, transform_indices = @transform_4, window_bounds = array<i64: 1, 32>}, {pipeline_mode = #tpu.pipeline_mode<synchronous>, transform_indices = @transform_5, window_bounds = array<i64: 32, 32>}, {pipeline_mode = #tpu.pipeline_mode<synchronous>, transform_indices = @transform_6, window_bounds = array<i64: 1, 32>}, {pipeline_mode = #tpu.pipeline_mode<synchronous>, transform_indices = @transform_7, window_bounds = array<i64: 1, 32>}, {pipeline_mode = #tpu.pipeline_mode<synchronous>, transform_indices = @transform_8, window_bounds = array<i64: 1, 32>}, {transform_indices = @transform_9, window_bounds = array<i64: 16, 32>}]} {
    %c0 = arith.constant 0 : index
    %c0_0 = arith.constant 0 : index
    %0 = vector.load %arg1[%c0, %c0_0] : memref<16x32xf32, #tpu.memory_space<vmem>>, vector<16x32xf32>
    %1 = arith.truncf %0 : vector<16x32xf32> to vector<16x32xbf16>
    %c0_1 = arith.constant 0 : index
    %c0_2 = arith.constant 0 : index
    %2 = vector.load %arg2[%c0_1, %c0_2] : memref<32x32xbf16, #tpu.memory_space<vmem>>, vector<32x32xbf16>
    %cst = arith.constant dense<0.000000e+00> : vector<16x32xf32>
    %3 = tpu.matmul %1, %2, %cst {dimension_numbers = #tpu.dot_dimension_numbers<[1], [0], [0], [1], [0, 0, 1, 1], [], []>} : vector<16x32xbf16>, vector<32x32xbf16>, vector<16x32xf32> -> vector<16x32xf32>
    %c0_3 = arith.constant 0 : index
    %c0_4 = arith.constant 0 : index
    %4 = vector.load %arg3[%c0_3, %c0_4] : memref<1x32xf32, #tpu.memory_space<vmem>>, vector<1x32xf32>
    %5 = vector.broadcast %4 : vector<1x32xf32> to vector<16x32xf32>
    %6 = arith.addf %3, %5 : vector<16x32xf32>
    %cst_5 = arith.constant 0.000000e+00 : f32
    %7 = vector.broadcast %cst_5 : f32 to vector<16x32xf32>
    %8 = arith.maximumf %6, %7 : vector<16x32xf32>
    %9 = arith.truncf %8 : vector<16x32xf32> to vector<16x32xbf16>
    %c0_6 = arith.constant 0 : index
    %c0_7 = arith.constant 0 : index
    %10 = vector.load %arg4[%c0_6, %c0_7] : memref<32x32xbf16, #tpu.memory_space<vmem>>, vector<32x32xbf16>
    %cst_8 = arith.constant dense<0.000000e+00> : vector<16x32xf32>
    %11 = tpu.matmul %9, %10, %cst_8 {dimension_numbers = #tpu.dot_dimension_numbers<[1], [0], [0], [1], [0, 0, 1, 1], [], []>} : vector<16x32xbf16>, vector<32x32xbf16>, vector<16x32xf32> -> vector<16x32xf32>
    %c0_9 = arith.constant 0 : index
    %c0_10 = arith.constant 0 : index
    %12 = vector.load %arg5[%c0_9, %c0_10] : memref<1x32xf32, #tpu.memory_space<vmem>>, vector<1x32xf32>
    %13 = vector.broadcast %12 : vector<1x32xf32> to vector<16x32xf32>
    %14 = arith.addf %11, %13 : vector<16x32xf32>
    %cst_11 = arith.constant 0.000000e+00 : f32
    %15 = vector.broadcast %cst_11 : f32 to vector<16x32xf32>
    %16 = arith.maximumf %14, %15 : vector<16x32xf32>
    %17 = arith.truncf %16 : vector<16x32xf32> to vector<16x32xbf16>
    %c0_12 = arith.constant 0 : index
    %c0_13 = arith.constant 0 : index
    %18 = vector.load %arg6[%c0_12, %c0_13] : memref<32x32xbf16, #tpu.memory_space<vmem>>, vector<32x32xbf16>
    %cst_14 = arith.constant dense<0.000000e+00> : vector<16x32xf32>
    %19 = tpu.matmul %17, %18, %cst_14 {dimension_numbers = #tpu.dot_dimension_numbers<[1], [0], [0], [1], [0, 0, 1, 1], [], []>} : vector<16x32xbf16>, vector<32x32xbf16>, vector<16x32xf32> -> vector<16x32xf32>
    %c0_15 = arith.constant 0 : index
    %c0_16 = arith.constant 0 : index
    %20 = vector.load %arg7[%c0_15, %c0_16] : memref<1x32xf32, #tpu.memory_space<vmem>>, vector<1x32xf32>
    %21 = vector.broadcast %20 : vector<1x32xf32> to vector<16x32xf32>
    %22 = arith.addf %19, %21 : vector<16x32xf32>
    %23 = arith.addf %0, %22 : vector<16x32xf32>
    %cst_17 = arith.constant dense<0.000000e+00> : vector<16xf32>
    %24 = vector.multi_reduction <add>, %23, %cst_17 [1] : vector<16x32xf32> to vector<16xf32>
    %25 = vector.shape_cast %24 : vector<16xf32> to vector<16x1xf32>
    %cst_18 = arith.constant 3.200000e+01 : f32
    %26 = vector.broadcast %cst_18 : f32 to vector<16x1xf32>
    %27 = arith.divf %25, %26 : vector<16x1xf32>
    %28 = vector.broadcast %27 : vector<16x1xf32> to vector<16x32xf32>
    %29 = arith.subf %23, %28 : vector<16x32xf32>
    %30 = arith.mulf %29, %29 : vector<16x32xf32>
    %cst_19 = arith.constant dense<0.000000e+00> : vector<16xf32>
    %31 = vector.multi_reduction <add>, %30, %cst_19 [1] : vector<16x32xf32> to vector<16xf32>
    %32 = vector.shape_cast %31 : vector<16xf32> to vector<16x1xf32>
    %cst_20 = arith.constant 3.200000e+01 : f32
    %33 = vector.broadcast %cst_20 : f32 to vector<16x1xf32>
    %34 = arith.divf %32, %33 : vector<16x1xf32>
    %cst_21 = arith.constant 9.99999974E-6 : f32
    %35 = vector.broadcast %cst_21 : f32 to vector<16x1xf32>
    %36 = arith.addf %34, %35 : vector<16x1xf32>
    %37 = math.rsqrt %36 : vector<16x1xf32>
    %38 = vector.broadcast %37 : vector<16x1xf32> to vector<16x32xf32>
    %39 = arith.mulf %29, %38 : vector<16x32xf32>
    %c0_22 = arith.constant 0 : index
    %c0_23 = arith.constant 0 : index
    %40 = vector.load %arg8[%c0_22, %c0_23] : memref<1x32xf32, #tpu.memory_space<vmem>>, vector<1x32xf32>
    %41 = vector.broadcast %40 : vector<1x32xf32> to vector<16x32xf32>
    %42 = arith.mulf %39, %41 : vector<16x32xf32>
    %c0_24 = arith.constant 0 : index
    %c0_25 = arith.constant 0 : index
    %43 = vector.load %arg9[%c0_24, %c0_25] : memref<1x32xf32, #tpu.memory_space<vmem>>, vector<1x32xf32>
    %44 = vector.broadcast %43 : vector<1x32xf32> to vector<16x32xf32>
    %45 = arith.addf %42, %44 : vector<16x32xf32>
    %c0_26 = arith.constant 0 : index
    %c0_27 = arith.constant 0 : index
    %46 = vector.load %arg10[%c0_26, %c0_27] : memref<16x32xf32, #tpu.memory_space<vmem>>, vector<16x32xf32>
    tpu.vector_store %arg10[%c0_26, %c0_27], %45 {strides = array<i32>} : memref<16x32xf32, #tpu.memory_space<vmem>>, vector<16x32xf32>,
    return
  }
  func.func @transform_0(%arg0: i32) -> (i32, i32) {
    %c0_i32 = arith.constant 0 : i32
    %c0_i32_0 = arith.constant 0 : i32
    return %arg0, %c0_i32 : i32, i32
  }
  func.func @transform_1(%arg0: i32) -> (i32, i32) {
    %c0_i32 = arith.constant 0 : i32
    %c0_i32_0 = arith.constant 0 : i32
    %c0_i32_1 = arith.constant 0 : i32
    return %c0_i32, %c0_i32_0 : i32, i32
  }
  func.func @transform_2(%arg0: i32) -> (i32, i32) {
    %c0_i32 = arith.constant 0 : i32
    %c0_i32_0 = arith.constant 0 : i32
    %c0_i32_1 = arith.constant 0 : i32
    return %c0_i32, %c0_i32_0 : i32, i32
  }
  func.func @transform_3(%arg0: i32) -> (i32, i32) {
    %c0_i32 = arith.constant 0 : i32
    %c0_i32_0 = arith.constant 0 : i32
    %c0_i32_1 = arith.constant 0 : i32
    return %c0_i32, %c0_i32_0 : i32, i32
  }
  func.func @transform_4(%arg0: i32) -> (i32, i32) {
    %c0_i32 = arith.constant 0 : i32
    %c0_i32_0 = arith.constant 0 : i32
    %c0_i32_1 = arith.constant 0 : i32
    return %c0_i32, %c0_i32_0 : i32, i32
  }
  func.func @transform_5(%arg0: i32) -> (i32, i32) {
    %c0_i32 = arith.constant 0 : i32
    %c0_i32_0 = arith.constant 0 : i32
    %c0_i32_1 = arith.constant 0 : i32
    return %c0_i32, %c0_i32_0 : i32, i32
  }
  func.func @transform_6(%arg0: i32) -> (i32, i32) {
    %c0_i32 = arith.constant 0 : i32
    %c0_i32_0 = arith.constant 0 : i32
    %c0_i32_1 = arith.constant 0 : i32
    return %c0_i32, %c0_i32_0 : i32, i32
  }
  func.func @transform_7(%arg0: i32) -> (i32, i32) {
    %c0_i32 = arith.constant 0 : i32
    %c0_i32_0 = arith.constant 0 : i32
    %c0_i32_1 = arith.constant 0 : i32
    return %c0_i32, %c0_i32_0 : i32, i32
  }
  func.func @transform_8(%arg0: i32) -> (i32, i32) {
    %c0_i32 = arith.constant 0 : i32
    %c0_i32_0 = arith.constant 0 : i32
    %c0_i32_1 = arith.constant 0 : i32
    return %c0_i32, %c0_i32_0 : i32, i32
  }
  func.func @transform_9(%arg0: i32) -> (i32, i32) {
    %c0_i32 = arith.constant 0 : i32
    %c0_i32_0 = arith.constant 0 : i32
    return %arg0, %c0_i32 : i32, i32
  }
}

module attributes {stable_mosaic.version = 11 : i64} {
  func.func @_linear_kernel(%arg0: i32, %arg1: memref<16x32xf32, #tpu.memory_space<vmem>>, %arg2: memref<32x6xbf16, #tpu.memory_space<vmem>>, %arg3: memref<1x6xf32, #tpu.memory_space<vmem>>, %arg4: memref<16x6xf32, #tpu.memory_space<vmem>>) attributes {dimension_semantics = [#tpu.dimension_semantics<parallel>], iteration_bounds = array<i64: 1>, scalar_prefetch = 0 : i64, scratch_operands = 0 : i64, tpu.core_type = #tpu.core_type<tc>, window_params = [{transform_indices = @transform_0, window_bounds = array<i64: 16, 32>}, {pipeline_mode = #tpu.pipeline_mode<synchronous>, transform_indices = @transform_1, window_bounds = array<i64: 32, 6>}, {pipeline_mode = #tpu.pipeline_mode<synchronous>, transform_indices = @transform_2, window_bounds = array<i64: 1, 6>}, {transform_indices = @transform_3, window_bounds = array<i64: 16, 6>}]} {
    %c0 = arith.constant 0 : index
    %c0_0 = arith.constant 0 : index
    %0 = vector.load %arg1[%c0, %c0_0] : memref<16x32xf32, #tpu.memory_space<vmem>>, vector<16x32xf32>
    %1 = arith.truncf %0 : vector<16x32xf32> to vector<16x32xbf16>
    %c0_1 = arith.constant 0 : index
    %c0_2 = arith.constant 0 : index
    %2 = vector.load %arg2[%c0_1, %c0_2] : memref<32x6xbf16, #tpu.memory_space<vmem>>, vector<32x6xbf16>
    %cst = arith.constant dense<0.000000e+00> : vector<16x6xf32>
    %3 = tpu.matmul %1, %2, %cst {dimension_numbers = #tpu.dot_dimension_numbers<[1], [0], [0], [1], [0, 0, 1, 1], [], []>} : vector<16x32xbf16>, vector<32x6xbf16>, vector<16x6xf32> -> vector<16x6xf32>
    %c0_3 = arith.constant 0 : index
    %c0_4 = arith.constant 0 : index
    %4 = vector.load %arg3[%c0_3, %c0_4] : memref<1x6xf32, #tpu.memory_space<vmem>>, vector<1x6xf32>
    %5 = vector.broadcast %4 : vector<1x6xf32> to vector<16x6xf32>
    %6 = arith.addf %3, %5 : vector<16x6xf32>
    %c0_5 = arith.constant 0 : index
    %c0_6 = arith.constant 0 : index
    %7 = vector.load %arg4[%c0_5, %c0_6] : memref<16x6xf32, #tpu.memory_space<vmem>>, vector<16x6xf32>
    tpu.vector_store %arg4[%c0_5, %c0_6], %6 {strides = array<i32>} : memref<16x6xf32, #tpu.memory_space<vmem>>, vector<16x6xf32>,
    return
  }
  func.func @transform_0(%arg0: i32) -> (i32, i32) {
    %c0_i32 = arith.constant 0 : i32
    %c0_i32_0 = arith.constant 0 : i32
    return %arg0, %c0_i32 : i32, i32
  }
  func.func @transform_1(%arg0: i32) -> (i32, i32) {
    %c0_i32 = arith.constant 0 : i32
    %c0_i32_0 = arith.constant 0 : i32
    %c0_i32_1 = arith.constant 0 : i32
    return %c0_i32, %c0_i32_0 : i32, i32
  }
  func.func @transform_2(%arg0: i32) -> (i32, i32) {
    %c0_i32 = arith.constant 0 : i32
    %c0_i32_0 = arith.constant 0 : i32
    %c0_i32_1 = arith.constant 0 : i32
    return %c0_i32, %c0_i32_0 : i32, i32
  }
  func.func @transform_3(%arg0: i32) -> (i32, i32) {
    %c0_i32 = arith.constant 0 : i32
    %c0_i32_0 = arith.constant 0 : i32
    return %arg0, %c0_i32 : i32, i32
  }
}

module attributes {stable_mosaic.version = 11 : i64} {
  func.func @_angle_resnet_kernel(%arg0: i32, %arg1: memref<16x32xf32, #tpu.memory_space<vmem>>, %arg2: memref<16x32xf32, #tpu.memory_space<vmem>>, %arg3: memref<32x16xbf16, #tpu.memory_space<vmem>>, %arg4: memref<1x16xf32, #tpu.memory_space<vmem>>, %arg5: memref<32x16xbf16, #tpu.memory_space<vmem>>, %arg6: memref<1x16xf32, #tpu.memory_space<vmem>>, %arg7: memref<2x16x16xbf16, #tpu.memory_space<vmem>>, %arg8: memref<2x1x16xf32, #tpu.memory_space<vmem>>, %arg9: memref<2x16x16xbf16, #tpu.memory_space<vmem>>, %arg10: memref<2x1x16xf32, #tpu.memory_space<vmem>>, %arg11: memref<16x14xbf16, #tpu.memory_space<vmem>>, %arg12: memref<1x14xf32, #tpu.memory_space<vmem>>, %arg13: memref<16x14xf32, #tpu.memory_space<vmem>>) attributes {dimension_semantics = [#tpu.dimension_semantics<parallel>], iteration_bounds = array<i64: 1>, scalar_prefetch = 0 : i64, scratch_operands = 0 : i64, tpu.core_type = #tpu.core_type<tc>, window_params = [{transform_indices = @transform_0, window_bounds = array<i64: 16, 32>}, {transform_indices = @transform_1, window_bounds = array<i64: 16, 32>}, {pipeline_mode = #tpu.pipeline_mode<synchronous>, transform_indices = @transform_2, window_bounds = array<i64: 32, 16>}, {pipeline_mode = #tpu.pipeline_mode<synchronous>, transform_indices = @transform_3, window_bounds = array<i64: 1, 16>}, {pipeline_mode = #tpu.pipeline_mode<synchronous>, transform_indices = @transform_4, window_bounds = array<i64: 32, 16>}, {pipeline_mode = #tpu.pipeline_mode<synchronous>, transform_indices = @transform_5, window_bounds = array<i64: 1, 16>}, {pipeline_mode = #tpu.pipeline_mode<synchronous>, transform_indices = @transform_6, window_bounds = array<i64: 2, 16, 16>}, {pipeline_mode = #tpu.pipeline_mode<synchronous>, transform_indices = @transform_7, window_bounds = array<i64: 2, 1, 16>}, {pipeline_mode = #tpu.pipeline_mode<synchronous>, transform_indices = @transform_8, window_bounds = array<i64: 2, 16, 16>}, {pipeline_mode = #tpu.pipeline_mode<synchronous>, transform_indices = @transform_9, window_bounds = array<i64: 2, 1, 16>}, {pipeline_mode = #tpu.pipeline_mode<synchronous>, transform_indices = @transform_10, window_bounds = array<i64: 16, 14>}, {pipeline_mode = #tpu.pipeline_mode<synchronous>, transform_indices = @transform_11, window_bounds = array<i64: 1, 14>}, {transform_indices = @transform_12, window_bounds = array<i64: 16, 14>}]} {
    %c0 = arith.constant 0 : index
    %c0_0 = arith.constant 0 : index
    %0 = vector.load %arg1[%c0, %c0_0] : memref<16x32xf32, #tpu.memory_space<vmem>>, vector<16x32xf32>
    %c0_1 = arith.constant 0 : index
    %c0_2 = arith.constant 0 : index
    %1 = vector.load %arg2[%c0_1, %c0_2] : memref<16x32xf32, #tpu.memory_space<vmem>>, vector<16x32xf32>
    %cst = arith.constant 0.000000e+00 : f32
    %2 = vector.broadcast %cst : f32 to vector<16x32xf32>
    %3 = arith.maximumf %0, %2 : vector<16x32xf32>
    %4 = arith.truncf %3 : vector<16x32xf32> to vector<16x32xbf16>
    %c0_3 = arith.constant 0 : index
    %c0_4 = arith.constant 0 : index
    %5 = vector.load %arg3[%c0_3, %c0_4] : memref<32x16xbf16, #tpu.memory_space<vmem>>, vector<32x16xbf16>
    %cst_5 = arith.constant dense<0.000000e+00> : vector<16x16xf32>
    %6 = tpu.matmul %4, %5, %cst_5 {dimension_numbers = #tpu.dot_dimension_numbers<[1], [0], [0], [1], [0, 0, 1, 1], [], []>} : vector<16x32xbf16>, vector<32x16xbf16>, vector<16x16xf32> -> vector<16x16xf32>
    %c0_6 = arith.constant 0 : index
    %c0_7 = arith.constant 0 : index
    %7 = vector.load %arg4[%c0_6, %c0_7] : memref<1x16xf32, #tpu.memory_space<vmem>>, vector<1x16xf32>
    %8 = vector.broadcast %7 : vector<1x16xf32> to vector<16x16xf32>
    %9 = arith.addf %6, %8 : vector<16x16xf32>
    %cst_8 = arith.constant 0.000000e+00 : f32
    %10 = vector.broadcast %cst_8 : f32 to vector<16x32xf32>
    %11 = arith.maximumf %1, %10 : vector<16x32xf32>
    %12 = arith.truncf %11 : vector<16x32xf32> to vector<16x32xbf16>
    %c0_9 = arith.constant 0 : index
    %c0_10 = arith.constant 0 : index
    %13 = vector.load %arg5[%c0_9, %c0_10] : memref<32x16xbf16, #tpu.memory_space<vmem>>, vector<32x16xbf16>
    %cst_11 = arith.constant dense<0.000000e+00> : vector<16x16xf32>
    %14 = tpu.matmul %12, %13, %cst_11 {dimension_numbers = #tpu.dot_dimension_numbers<[1], [0], [0], [1], [0, 0, 1, 1], [], []>} : vector<16x32xbf16>, vector<32x16xbf16>, vector<16x16xf32> -> vector<16x16xf32>
    %15 = arith.addf %9, %14 : vector<16x16xf32>
    %c0_12 = arith.constant 0 : index
    %c0_13 = arith.constant 0 : index
    %16 = vector.load %arg6[%c0_12, %c0_13] : memref<1x16xf32, #tpu.memory_space<vmem>>, vector<1x16xf32>
    %17 = vector.broadcast %16 : vector<1x16xf32> to vector<16x16xf32>
    %18 = arith.addf %15, %17 : vector<16x16xf32>
    %cst_14 = arith.constant 0.000000e+00 : f32
    %19 = vector.broadcast %cst_14 : f32 to vector<16x16xf32>
    %20 = arith.maximumf %18, %19 : vector<16x16xf32>
    %21 = arith.truncf %20 : vector<16x16xf32> to vector<16x16xbf16>
    %c0_15 = arith.constant 0 : index
    %c0_16 = arith.constant 0 : index
    %c0_17 = arith.constant 0 : index
    %22 = vector.load %arg7[%c0_15, %c0_16, %c0_17] : memref<2x16x16xbf16, #tpu.memory_space<vmem>>, vector<1x16x16xbf16>
    %23 = vector.shape_cast %22 : vector<1x16x16xbf16> to vector<16x16xbf16>
    %cst_18 = arith.constant dense<0.000000e+00> : vector<16x16xf32>
    %24 = tpu.matmul %21, %23, %cst_18 {dimension_numbers = #tpu.dot_dimension_numbers<[1], [0], [0], [1], [0, 0, 1, 1], [], []>} : vector<16x16xbf16>, vector<16x16xbf16>, vector<16x16xf32> -> vector<16x16xf32>
    %c0_19 = arith.constant 0 : index
    %c0_20 = arith.constant 0 : index
    %c0_21 = arith.constant 0 : index
    %25 = vector.load %arg8[%c0_19, %c0_20, %c0_21] : memref<2x1x16xf32, #tpu.memory_space<vmem>>, vector<1x1x16xf32>
    %26 = vector.shape_cast %25 : vector<1x1x16xf32> to vector<1x16xf32>
    %27 = vector.broadcast %26 : vector<1x16xf32> to vector<16x16xf32>
    %28 = arith.addf %24, %27 : vector<16x16xf32>
    %cst_22 = arith.constant 0.000000e+00 : f32
    %29 = vector.broadcast %cst_22 : f32 to vector<16x16xf32>
    %30 = arith.maximumf %28, %29 : vector<16x16xf32>
    %31 = arith.truncf %30 : vector<16x16xf32> to vector<16x16xbf16>
    %c0_23 = arith.constant 0 : index
    %c0_24 = arith.constant 0 : index
    %c0_25 = arith.constant 0 : index
    %32 = vector.load %arg9[%c0_23, %c0_24, %c0_25] : memref<2x16x16xbf16, #tpu.memory_space<vmem>>, vector<1x16x16xbf16>
    %33 = vector.shape_cast %32 : vector<1x16x16xbf16> to vector<16x16xbf16>
    %cst_26 = arith.constant dense<0.000000e+00> : vector<16x16xf32>
    %34 = tpu.matmul %31, %33, %cst_26 {dimension_numbers = #tpu.dot_dimension_numbers<[1], [0], [0], [1], [0, 0, 1, 1], [], []>} : vector<16x16xbf16>, vector<16x16xbf16>, vector<16x16xf32> -> vector<16x16xf32>
    %c0_27 = arith.constant 0 : index
    %c0_28 = arith.constant 0 : index
    %c0_29 = arith.constant 0 : index
    %35 = vector.load %arg10[%c0_27, %c0_28, %c0_29] : memref<2x1x16xf32, #tpu.memory_space<vmem>>, vector<1x1x16xf32>
    %36 = vector.shape_cast %35 : vector<1x1x16xf32> to vector<1x16xf32>
    %37 = vector.broadcast %36 : vector<1x16xf32> to vector<16x16xf32>
    %38 = arith.addf %34, %37 : vector<16x16xf32>
    %39 = arith.addf %18, %38 : vector<16x16xf32>
    %cst_30 = arith.constant 0.000000e+00 : f32
    %40 = vector.broadcast %cst_30 : f32 to vector<16x16xf32>
    %41 = arith.maximumf %39, %40 : vector<16x16xf32>
    %42 = arith.truncf %41 : vector<16x16xf32> to vector<16x16xbf16>
    %c1 = arith.constant 1 : index
    %c0_31 = arith.constant 0 : index
    %c0_32 = arith.constant 0 : index
    %43 = vector.load %arg7[%c1, %c0_31, %c0_32] : memref<2x16x16xbf16, #tpu.memory_space<vmem>>, vector<1x16x16xbf16>
    %44 = vector.shape_cast %43 : vector<1x16x16xbf16> to vector<16x16xbf16>
    %cst_33 = arith.constant dense<0.000000e+00> : vector<16x16xf32>
    %45 = tpu.matmul %42, %44, %cst_33 {dimension_numbers = #tpu.dot_dimension_numbers<[1], [0], [0], [1], [0, 0, 1, 1], [], []>} : vector<16x16xbf16>, vector<16x16xbf16>, vector<16x16xf32> -> vector<16x16xf32>
    %c1_34 = arith.constant 1 : index
    %c0_35 = arith.constant 0 : index
    %c0_36 = arith.constant 0 : index
    %46 = vector.load %arg8[%c1_34, %c0_35, %c0_36] : memref<2x1x16xf32, #tpu.memory_space<vmem>>, vector<1x1x16xf32>
    %47 = vector.shape_cast %46 : vector<1x1x16xf32> to vector<1x16xf32>
    %48 = vector.broadcast %47 : vector<1x16xf32> to vector<16x16xf32>
    %49 = arith.addf %45, %48 : vector<16x16xf32>
    %cst_37 = arith.constant 0.000000e+00 : f32
    %50 = vector.broadcast %cst_37 : f32 to vector<16x16xf32>
    %51 = arith.maximumf %49, %50 : vector<16x16xf32>
    %52 = arith.truncf %51 : vector<16x16xf32> to vector<16x16xbf16>
    %c1_38 = arith.constant 1 : index
    %c0_39 = arith.constant 0 : index
    %c0_40 = arith.constant 0 : index
    %53 = vector.load %arg9[%c1_38, %c0_39, %c0_40] : memref<2x16x16xbf16, #tpu.memory_space<vmem>>, vector<1x16x16xbf16>
    %54 = vector.shape_cast %53 : vector<1x16x16xbf16> to vector<16x16xbf16>
    %cst_41 = arith.constant dense<0.000000e+00> : vector<16x16xf32>
    %55 = tpu.matmul %52, %54, %cst_41 {dimension_numbers = #tpu.dot_dimension_numbers<[1], [0], [0], [1], [0, 0, 1, 1], [], []>} : vector<16x16xbf16>, vector<16x16xbf16>, vector<16x16xf32> -> vector<16x16xf32>
    %c1_42 = arith.constant 1 : index
    %c0_43 = arith.constant 0 : index
    %c0_44 = arith.constant 0 : index
    %56 = vector.load %arg10[%c1_42, %c0_43, %c0_44] : memref<2x1x16xf32, #tpu.memory_space<vmem>>, vector<1x1x16xf32>
    %57 = vector.shape_cast %56 : vector<1x1x16xf32> to vector<1x16xf32>
    %58 = vector.broadcast %57 : vector<1x16xf32> to vector<16x16xf32>
    %59 = arith.addf %55, %58 : vector<16x16xf32>
    %60 = arith.addf %39, %59 : vector<16x16xf32>
    %cst_45 = arith.constant 0.000000e+00 : f32
    %61 = vector.broadcast %cst_45 : f32 to vector<16x16xf32>
    %62 = arith.maximumf %60, %61 : vector<16x16xf32>
    %63 = arith.truncf %62 : vector<16x16xf32> to vector<16x16xbf16>
    %c0_46 = arith.constant 0 : index
    %c0_47 = arith.constant 0 : index
    %64 = vector.load %arg11[%c0_46, %c0_47] : memref<16x14xbf16, #tpu.memory_space<vmem>>, vector<16x14xbf16>
    %cst_48 = arith.constant dense<0.000000e+00> : vector<16x14xf32>
    %65 = tpu.matmul %63, %64, %cst_48 {dimension_numbers = #tpu.dot_dimension_numbers<[1], [0], [0], [1], [0, 0, 1, 1], [], []>} : vector<16x16xbf16>, vector<16x14xbf16>, vector<16x14xf32> -> vector<16x14xf32>
    %c0_49 = arith.constant 0 : index
    %c0_50 = arith.constant 0 : index
    %66 = vector.load %arg12[%c0_49, %c0_50] : memref<1x14xf32, #tpu.memory_space<vmem>>, vector<1x14xf32>
    %67 = vector.broadcast %66 : vector<1x14xf32> to vector<16x14xf32>
    %68 = arith.addf %65, %67 : vector<16x14xf32>
    %c0_51 = arith.constant 0 : index
    %c0_52 = arith.constant 0 : index
    %69 = vector.load %arg13[%c0_51, %c0_52] : memref<16x14xf32, #tpu.memory_space<vmem>>, vector<16x14xf32>
    tpu.vector_store %arg13[%c0_51, %c0_52], %68 {strides = array<i32>} : memref<16x14xf32, #tpu.memory_space<vmem>>, vector<16x14xf32>,
    return
  }
  func.func @transform_0(%arg0: i32) -> (i32, i32) {
    %c0_i32 = arith.constant 0 : i32
    %c0_i32_0 = arith.constant 0 : i32
    return %arg0, %c0_i32 : i32, i32
  }
  func.func @transform_1(%arg0: i32) -> (i32, i32) {
    %c0_i32 = arith.constant 0 : i32
    %c0_i32_0 = arith.constant 0 : i32
    return %arg0, %c0_i32 : i32, i32
  }
  func.func @transform_2(%arg0: i32) -> (i32, i32) {
    %c0_i32 = arith.constant 0 : i32
    %c0_i32_0 = arith.constant 0 : i32
    %c0_i32_1 = arith.constant 0 : i32
    return %c0_i32, %c0_i32_0 : i32, i32
  }
  func.func @transform_3(%arg0: i32) -> (i32, i32) {
    %c0_i32 = arith.constant 0 : i32
    %c0_i32_0 = arith.constant 0 : i32
    %c0_i32_1 = arith.constant 0 : i32
    return %c0_i32, %c0_i32_0 : i32, i32
  }
  func.func @transform_4(%arg0: i32) -> (i32, i32) {
    %c0_i32 = arith.constant 0 : i32
    %c0_i32_0 = arith.constant 0 : i32
    %c0_i32_1 = arith.constant 0 : i32
    return %c0_i32, %c0_i32_0 : i32, i32
  }
  func.func @transform_5(%arg0: i32) -> (i32, i32) {
    %c0_i32 = arith.constant 0 : i32
    %c0_i32_0 = arith.constant 0 : i32
    %c0_i32_1 = arith.constant 0 : i32
    return %c0_i32, %c0_i32_0 : i32, i32
  }
  func.func @transform_6(%arg0: i32) -> (i32, i32, i32) {
    %c0_i32 = arith.constant 0 : i32
    %c0_i32_0 = arith.constant 0 : i32
    %c0_i32_1 = arith.constant 0 : i32
    %c0_i32_2 = arith.constant 0 : i32
    return %c0_i32, %c0_i32_0, %c0_i32_1 : i32, i32, i32
  }
  func.func @transform_7(%arg0: i32) -> (i32, i32, i32) {
    %c0_i32 = arith.constant 0 : i32
    %c0_i32_0 = arith.constant 0 : i32
    %c0_i32_1 = arith.constant 0 : i32
    %c0_i32_2 = arith.constant 0 : i32
    return %c0_i32, %c0_i32_0, %c0_i32_1 : i32, i32, i32
  }
  func.func @transform_8(%arg0: i32) -> (i32, i32, i32) {
    %c0_i32 = arith.constant 0 : i32
    %c0_i32_0 = arith.constant 0 : i32
    %c0_i32_1 = arith.constant 0 : i32
    %c0_i32_2 = arith.constant 0 : i32
    return %c0_i32, %c0_i32_0, %c0_i32_1 : i32, i32, i32
  }
  func.func @transform_9(%arg0: i32) -> (i32, i32, i32) {
    %c0_i32 = arith.constant 0 : i32
    %c0_i32_0 = arith.constant 0 : i32
    %c0_i32_1 = arith.constant 0 : i32
    %c0_i32_2 = arith.constant 0 : i32
    return %c0_i32, %c0_i32_0, %c0_i32_1 : i32, i32, i32
  }
  func.func @transform_10(%arg0: i32) -> (i32, i32) {
    %c0_i32 = arith.constant 0 : i32
    %c0_i32_0 = arith.constant 0 : i32
    %c0_i32_1 = arith.constant 0 : i32
    return %c0_i32, %c0_i32_0 : i32, i32
  }
  func.func @transform_11(%arg0: i32) -> (i32, i32) {
    %c0_i32 = arith.constant 0 : i32
    %c0_i32_0 = arith.constant 0 : i32
    %c0_i32_1 = arith.constant 0 : i32
    return %c0_i32, %c0_i32_0 : i32, i32
  }
  func.func @transform_12(%arg0: i32) -> (i32, i32) {
    %c0_i32 = arith.constant 0 : i32
    %c0_i32_0 = arith.constant 0 : i32
    return %arg0, %c0_i32 : i32, i32
  }
}

</mosaic_0001>

<bundles_post_ra>
// kernel: structure_module_forward.16
= control target key start
LH: loop header
LB: loop body
LE: loop exit
PB: predicated region body
PF: predicated region fallthrough
CT: control target
= control target key end

     0   :  { %vm16_vm0 = vcmask 261120   ;;  %s118_s0 = inlined_call_operand.vmem [shape: f32[16,32], index: 0, kind: input, shape index: {}]   ;;  %s119_s1 = inlined_call_operand.vmem [shape: f32[1,32], index: 1, kind: input, shape index: {}]   ;;  %s120_s2 = inlined_call_operand.vmem [shape: f32[1,32], index: 2, kind: input, shape index: {}]   ;;  %s121_s3 = inlined_call_operand.vmem [shape: f32[16,32], index: 3, kind: output, shape index: {}]  }
   0x1   :  { %v14_v0 = vld [vmem:[%s118_s0] sm:$0xff]  ;;  %v15_v1 = vld [vmem:[%s118_s0 + $0x8] sm:$0xff] }
   0x2   :  { %v17_v2 = vsel %vm16_vm0, %v14_v0, 0.0  ;;  %v20_v3 = vsel %vm16_vm0, %v15_v1, 0.0  ;;  %v68_v21 = vld [vmem:[%s119_s1] ss:$0 sm:$0xff] }
   0x3   :  { %18 = vadd.xlane.f32.xlu0 %v17_v2  ;;  %v69_v23 = vld [vmem:[%s120_s2] ss:$0 sm:$0xff] }
   0x7   :  { %21 = vadd.xlane.f32.xlu0 %v20_v3 }
  0x90   :  { %v19_v4 = vpop.xlane.xlu0 %18 }
  0x91   :  { %v24_v5 = vmul.f32 0.03125, %v19_v4 }
  0x93   :  { %v26_v6 = vsub.f32 %v14_v0, %v24_v5 }
  0x94   :  { %v22_v7 = vpop.xlane.xlu0 %21 }
  0x95   :  { %v25_v8 = vmul.f32 0.03125, %v22_v7  ;;  %v28_v9 = vmul.f32 %v26_v6, %v26_v6 }
  0x97   :  { %v27_v10 = vsub.f32 %v15_v1, %v25_v8  ;;  %v30_v11 = vsel %vm16_vm0, %v28_v9, 0.0 }
  0x98   :  { %31 = vadd.xlane.f32.xlu1 %v30_v11 }
  0x99   :  { %v29_v12 = vmul.f32 %v27_v10, %v27_v10 }
  0x9b   :  { %v33_v13 = vsel %vm16_vm0, %v29_v12, 0.0 }
  0x9c   :  { %34 = vadd.xlane.f32.xlu1 %v33_v13 }
 0x125   :  { %v32_v14 = vpop.xlane.xlu1 %31 }
 0x126   :  { %v36_v15 = vmul.f32 0.03125, %v32_v14 }
 0x128   :  { %v38_v16 = vadd.f32 1e-05, %v36_v15 }
 0x129   :  { %v35_v17 = vpop.xlane.xlu1 %34 }
 0x12a   :  { %70 = vrsqrt.f32 %v38_v16  ;;  %v37_v18 = vmul.f32 0.03125, %v35_v17 }
 0x12c   :  { %v39_v19 = vadd.f32 1e-05, %v37_v18 }
 0x12e   :  { %72 = vrsqrt.f32 %v39_v19 }
 0x134   :  { %v71_v20 = vpop.eup %70 }
 0x135   :  { %v42_v22 = vmul.f32 %v71_v20, %v26_v6 }
 0x137   :  { %v51_v24 = vmul.f32 %v68_v21, %v42_v22 }
 0x138   :  { %v73_v25 = vpop.eup %72 }
 0x139   :  { %v60_v26 = vadd.f32 %v69_v23, %v51_v24  ;;  %v43_v27 = vmul.f32 %v73_v25, %v27_v10 }
 0x13b   :  { %62 = vst.msk [vmem:[%s121_s3] sm:$0xff] %vm16_vm0, %v60_v26  ;;  %v52_v28 = vmul.f32 %v68_v21, %v43_v27 }
 0x13d   :  { %v61_v29 = vadd.f32 %v69_v23, %v52_v28 }
 0x13f   :  { %63 = vst.msk [vmem:[%s121_s3 + $0x8] sm:$0xff] %vm16_vm0, %v61_v29 }

// kernel: structure_module_forward.18
= control target key start
LH: loop header
LB: loop body
LE: loop exit
PB: predicated region body
PF: predicated region fallthrough
CT: control target
= control target key end

     0   :  { %v111_v0 = vmov 0.0   ;;  %vm112_vm0 = vmmov 0   ;;  %vm41_vm1 = vcmask 261120   ;;  %s154_s1 = inlined_call_operand.vmem [shape: bf16[32,32], index: 1, kind: input, shape index: {}]   ;;  %s155_s0 = inlined_call_operand.vmem [shape: f32[16,32], index: 0, kind: input, shape index: {}]   ;;  %s156_s2 = inlined_call_operand.vmem [shape: f32[1,32], index: 2, kind: input, shape index: {}]   ;;  %s157_s3 = inlined_call_operand.vmem [shape: f32[16,32], index: 3, kind: output, shape index: {}]  }
   0x1   :  { %99 = vmatprep.subr.bf16.mxu0 %v111_v0  ;;  %v109_v1 = vld [vmem:[%s154_s1] sm:$0xff]   ;;  %103 = vmatprep.mubr.msk.bf16.mxu0 %vm112_vm0, %v111_v0  ;;  %v110_v2 = vld [vmem:[%s154_s1 + $0x8] sm:$0xff]  }
   0x2   :  { %100 = vmatpush3.bf16.msra.mxu0 %v109_v1  ;;  %v15_v3 = vld [vmem:[%s155_s0] sm:$0xff]  ;;  %v16_v4 = vld [vmem:[%s155_s0 + $0x8] sm:$0xff] }
   0x3   :  { %101 = vmatprep.subr.bf16.mxu0 %v111_v0  ;;  %v17_v5 = vpack.c.bf16 %v16_v4, %v15_v3  ;;  %v92_v6 = vld [vmem:[%s156_s2] ss:$0 sm:$0xff] }
   0x6   :  { %102 = vmatpush3.bf16.msra.mxu0 %v110_v2 }
   0x9   :  { %104 = vmatmul.mubr.msk.bf16.vlgmr.msra.gmra.mrb[0].mxu0 %vm41_vm1, %v17_v5 }
  0xdc   :  { %v79_v7 = vpop.f32.mrb[0].mxu0 }
  0xdd   :  { %v80_v8 = vadd.f32 %v92_v6, %v79_v7  ;;  %v105_v9 = vpop.f32.mrb[1].mxu0 }
  0xde   :  { %v82_v10 = vpop.f32.mrb[2].mxu0 }
  0xdf   :  { %86 = vst.msk [vmem:[%s157_s3] sm:$0xff] %vm41_vm1, %v80_v8  ;;  %v83_v11 = vadd.f32 %v92_v6, %v82_v10  ;;  %v106_v12 = vpop.f32.mrb[3].mxu0 }
  0xe1   :  { %87 = vst.msk [vmem:[%s157_s3 + $0x8] sm:$0xff] %vm41_vm1, %v83_v11 }

// kernel: structure_module_forward.20
= control target key start
LH: loop header
LB: loop body
LE: loop exit
PB: predicated region body
PF: predicated region fallthrough
CT: control target
= control target key end

     0   :  { %v203_v0 = vmov 0.0   ;;  %vm204_vm0 = vmmov 0   ;;  %v205_v3 = vmov 0   ;;  %vm75_vm1 = vcmask 261120   ;;  %s271_s1 = inlined_call_operand.vmem [shape: bf16[32,384], index: 1, kind: input, shape index: {}]   ;;  %s272_s0 = inlined_call_operand.vmem [shape: f32[16,32], index: 0, kind: input, shape index: {}]   ;;  %s273_s2 = inlined_call_operand.vmem [shape: f32[1,384], index: 2, kind: input, shape index: {}]   ;;  %s274_s3 = inlined_call_operand.vmem [shape: f32[16,384], index: 3, kind: output, shape index: {}]  }
   0x1   :  { %184 = vmatprep.subr.bf16.mxu1 %v203_v0  ;;  %v195_v1 = vld [vmem:[%s271_s1 + $0x4] ss:$12 sps:$4 sm:$0xff]   ;;  %188 = vmatprep.mubr.msk.bf16.mxu1 %vm204_vm0, %v203_v0  ;;  %v197_v2 = vld [vmem:[%s271_s1 + $0x8] ss:$12 sps:$4 sm:$0xff]   ;;  %v198_v4 = vld [vmem:[%s271_s1] ss:$12 sps:$4 sm:$0xff]   ;;  %v28_v11 = vlaneseq }
   0x2   :  { %111 = vmatprep.mubr.bf16.mxu0 %v205_v3  ;;  %79 = vmatprep.subr.bf16.mxu0 %v195_v1  ;;  %v199_v5 = vld [vmem:[%s271_s1 + $0x1c] ss:$12 sps:$4 sm:$0xff]   ;;  %v201_v6 = vld [vmem:[%s271_s1 + $0x20] ss:$12 sps:$4 sm:$0xff]   ;;  %v202_v7 = vld [vmem:[%s271_s1 + $0x18] ss:$12 sps:$4 sm:$0xff]  }
   0x3   :  { %185 = vmatpush3.bf16.msra.mxu1 %v197_v2  ;;  %80 = vmatpush1.bf16.msra.mxu0 %v198_v4  ;;  %v15_v8 = vld [vmem:[%s272_s0] sm:$0xff]  ;;  %v16_v9 = vld [vmem:[%s272_s0 + $0x8] sm:$0xff]  ;;  %v29_v12 = vshrl.u32 %v28_v11, 7 }
   0x4   :  { %186 = vmatprep.subr.bf16.mxu1 %v203_v0  ;;  %81 = vmatprep.subr.bf16.mxu0 %v199_v5  ;;  %v17_v10 = vpack.c.bf16 %v16_v9, %v15_v8  ;;  %v26_v14 = vld [vmem:[%s273_s2] sm:$0x7] }
   0x5   :  { %v38_v13 = vsub.s32 2, %v29_v12  ;;  %v30_v15 = vsub.s32 0, %v29_v12  ;;  %v34_v16 = vsub.s32 1, %v29_v12 }
   0x7   :  { %187 = vmatpush3.bf16.msra.mxu1 %v201_v6  ;;  %82 = vmatpush1.bf16.msra.mxu0 %v202_v7  ;;  %v39_v17 = vrot.slane %v26_v14, %v38_v13  ;;  %v31_v18 = vrot.slane %v26_v14, %v30_v15  ;;  %v35_v19 = vrot.slane %v26_v14, %v34_v16 }
   0xa   :  { %189 = vmatmul.mubr.msk.bf16.vlgmr.msra.gmra.mrb[0].mxu1 %vm75_vm1, %v17_v10  ;;  %179 = vmatmul.mubr.msk.bf16.vlgmr.msra.gmra.mrb[0].mxu0 %vm75_vm1, %v17_v10 }
  0xdd   :  { %v156_v20 = vpop.f32.mrb[0].mxu1  ;;  %v113_v22 = vpop.f32.mrb[0].mxu0 }
  0xde   :  { %v157_v21 = vadd.f32 %v156_v20, %v39_v17  ;;  %v190_v23 = vpop.f32.mrb[1].mxu1  ;;  %v114_v24 = vadd.f32 %v113_v22, %v31_v18  ;;  %v115_v25 = vpop.f32.mrb[1].mxu0 }
  0xdf   :  { %v159_v26 = vpop.f32.mrb[2].mxu1  ;;  %v116_v27 = vadd.f32 %v115_v25, %v35_v19  ;;  %v117_v29 = vpop.f32.mrb[2].mxu0 }
  0xe0   :  { %165 = vst [vmem:[%s274_s3 + $0x10] sm:$0xff] %v157_v21  ;;  %v160_v28 = vadd.f32 %v159_v26, %v39_v17  ;;  %v191_v30 = vpop.f32.mrb[3].mxu1  ;;  %163 = vst [vmem:[%s274_s3] sm:$0xff] %v114_v24  ;;  %v118_v31 = vadd.f32 %v117_v29, %v31_v18  ;;  %v119_v32 = vpop.f32.mrb[3].mxu0 }
  0xe1   :  { %164 = vst [vmem:[%s274_s3 + $0x8] sm:$0xff] %v116_v27  ;;  %v120_v33 = vadd.f32 %v119_v32, %v35_v19 }
  0xe2   :  { %168 = vst [vmem:[%s274_s3 + $0x28] sm:$0xff] %v160_v28  ;;  %166 = vst [vmem:[%s274_s3 + $0x18] sm:$0xff] %v118_v31 }
  0xe3   :  { %167 = vst [vmem:[%s274_s3 + $0x20] sm:$0xff] %v120_v33 }

// kernel: structure_module_forward.19
= control target key start
LH: loop header
LB: loop body
LE: loop exit
PB: predicated region body
PF: predicated region fallthrough
CT: control target
= control target key end

     0   :  { %vm104_vm0 = vcmask 1043456   ;;  %vm79_vm1 = vcmask 64512   ;;  %vm269_vm2 = vcmask 27648   ;;  %s500_s1 = inlined_call_operand.vmem [shape: bf16[8,4], index: 1, kind: input, shape index: {}]   ;;  %s501_s0 = inlined_call_operand.vmem [shape: bf16[128,8], index: 0, kind: input, shape index: {}]   ;;  %s502_s2 = inlined_call_operand.vmem [shape: f32[1,4], index: 2, kind: input, shape index: {}]   ;;  %s503_s3 = inlined_call_operand.vmem [shape: bf16[128,4], index: 3, kind: output, shape index: {}]  }
   0x1   :  { %v31_v0 = vld [vmem:[%s500_s1] sm:$0xf]  ;;  %v372_v4 = vld [vmem:[%s501_s0 + $0x8] sm:$0xff]   ;;  %v374_v6 = vld [vmem:[%s501_s0 + $0x10] sm:$0xff]  }
   0x2   :  { %368 = vmatprep.subr.msk.bf16.mxu0 %vm104_vm0, %v31_v0  ;;  %369 = vmatprep.subr.msk.bf16.mxu1 %vm104_vm0, %v31_v0  ;;  %v106_v1 = vsel %vm104_vm0, %v31_v0, 0  ;;  %v370_v2 = vld [vmem:[%s501_s0] sm:$0xff]   ;;  %v373_v5 = vld [vmem:[%s501_s0 + $0x28] sm:$0xff]   ;;  %v375_v7 = vld [vmem:[%s501_s0 + $0x30] sm:$0xff]  }
   0x3   :  { %349 = vmatpush3.bf16.msra.mxu0 %v106_v1  ;;  %367 = vmatpush3.bf16.msra.mxu1 %v106_v1  ;;  %v371_v3 = vld [vmem:[%s501_s0 + $0x20] sm:$0xff]   ;;  %v376_v8 = vld [vmem:[%s501_s0 + $0x18] sm:$0xff]  }
   0x4   :  { %350 = vmatprep.mubr.msk.bf16.mxu0 %vm79_vm1, %v370_v2  ;;  %358 = vmatprep.mubr.msk.bf16.mxu1 %vm79_vm1, %v371_v3  ;;  %v377_v9 = vld [vmem:[%s501_s0 + $0x38] sm:$0xff]   ;;  %v290_v10 = vld [vmem:[%s502_s2] ss:$0 sm:$0xff] }
   0x6   :  { %351 = vmatmul.mubr.msk.bf16.vlgmr.msra.gmra.mrb[0].mxu0 %vm79_vm1, %v372_v4  ;;  %359 = vmatmul.mubr.msk.bf16.vlgmr.msra.gmra.mrb[0].mxu1 %vm79_vm1, %v373_v5 }
   0x7   :  { %354 = vmatprep.mubr.msk.bf16.mxu0 %vm79_vm1, %v374_v6  ;;  %362 = vmatprep.mubr.msk.bf16.mxu1 %vm79_vm1, %v375_v7 }
   0xe   :  { %355 = vmatmul.mubr.msk.bf16.gmra.mrb[4].mxu0 %vm79_vm1, %v376_v8  ;;  %363 = vmatmul.mubr.msk.bf16.gmra.mrb[4].mxu1 %vm79_vm1, %v377_v9 }
  0xd9   :  { %v352_v11 = vpop.f32.mrb[0].mxu0  ;;  %v360_v13 = vpop.f32.mrb[0].mxu1 }
  0xda   :  { %v151_v12 = vadd.f32 %v352_v11, %v290_v10  ;;  %v142_v14 = vpop.f32.mrb[1].mxu0  ;;  %v183_v15 = vadd.f32 %v360_v13, %v290_v10  ;;  %v174_v17 = vpop.f32.mrb[1].mxu1 }
  0xdb   :  { %v143_v16 = vadd.f32 %v290_v10, %v142_v14  ;;  %v353_v18 = vpop.f32.mrb[2].mxu0  ;;  %v175_v20 = vadd.f32 %v290_v10, %v174_v17  ;;  %v361_v22 = vpop.f32.mrb[2].mxu1 }
  0xdc   :  { %v325_v19 = vpack.c.bf16 %v151_v12, %v151_v12  ;;  %v154_v21 = vadd.f32 %v353_v18, %v290_v10  ;;  %v145_v23 = vpop.f32.mrb[3].mxu0  ;;  %v333_v24 = vpack.c.bf16 %v183_v15, %v183_v15  ;;  %v186_v26 = vadd.f32 %v361_v22, %v290_v10  ;;  %v177_v28 = vpop.f32.mrb[3].mxu1 }
  0xdd   :  { %v323_v25 = vpack.c.bf16 %v143_v16, %v143_v16  ;;  %v146_v27 = vadd.f32 %v290_v10, %v145_v23  ;;  %v331_v29 = vpack.c.bf16 %v175_v20, %v175_v20  ;;  %v178_v31 = vadd.f32 %v290_v10, %v177_v28 }
  0xde   :  { %272 = vst.msk [vmem:[%s503_s3 + $0x8] sm:$0xf] %vm269_vm2, %v325_v19  ;;  %v326_v30 = vpack.c.bf16 %v154_v21, %v154_v21  ;;  %280 = vst.msk [vmem:[%s503_s3 + $0x28] sm:$0xf] %vm269_vm2, %v333_v24  ;;  %v334_v32 = vpack.c.bf16 %v186_v26, %v186_v26 }
  0xdf   :  { %270 = vst.msk [vmem:[%s503_s3] sm:$0xf] %vm269_vm2, %v323_v25  ;;  %v324_v33 = vpack.c.bf16 %v146_v27, %v146_v27  ;;  %278 = vst.msk [vmem:[%s503_s3 + $0x20] sm:$0xf] %vm269_vm2, %v331_v29  ;;  %v332_v34 = vpack.c.bf16 %v178_v31, %v178_v31 }
  0xe0   :  { %273 = vst.msk [vmem:[%s503_s3 + $0xc] sm:$0xf] %vm269_vm2, %v326_v30  ;;  %281 = vst.msk [vmem:[%s503_s3 + $0x2c] sm:$0xf] %vm269_vm2, %v334_v32 }
  0xe1   :  { %271 = vst.msk [vmem:[%s503_s3 + $0x4] sm:$0xf] %vm269_vm2, %v324_v33  ;;  %v356_v35 = vpop.f32.mrb[4].mxu0  ;;  %279 = vst.msk [vmem:[%s503_s3 + $0x24] sm:$0xf] %vm269_vm2, %v332_v34  ;;  %v364_v37 = vpop.f32.mrb[4].mxu1 }
  0xe2   :  { %v167_v36 = vadd.f32 %v356_v35, %v290_v10  ;;  %v158_v38 = vpop.f32.mrb[5].mxu0  ;;  %v199_v39 = vadd.f32 %v364_v37, %v290_v10  ;;  %v190_v41 = vpop.f32.mrb[5].mxu1 }
  0xe3   :  { %v159_v40 = vadd.f32 %v290_v10, %v158_v38  ;;  %v357_v42 = vpop.f32.mrb[6].mxu0  ;;  %v191_v44 = vadd.f32 %v290_v10, %v190_v41  ;;  %v365_v46 = vpop.f32.mrb[6].mxu1 }
  0xe4   :  { %v329_v43 = vpack.c.bf16 %v167_v36, %v167_v36  ;;  %v170_v45 = vadd.f32 %v357_v42, %v290_v10  ;;  %v161_v47 = vpop.f32.mrb[7].mxu0  ;;  %v337_v48 = vpack.c.bf16 %v199_v39, %v199_v39  ;;  %v202_v50 = vadd.f32 %v365_v46, %v290_v10  ;;  %v193_v52 = vpop.f32.mrb[7].mxu1 }
  0xe5   :  { %v327_v49 = vpack.c.bf16 %v159_v40, %v159_v40  ;;  %v162_v51 = vadd.f32 %v290_v10, %v161_v47  ;;  %v335_v53 = vpack.c.bf16 %v191_v44, %v191_v44  ;;  %v194_v55 = vadd.f32 %v290_v10, %v193_v52 }
  0xe6   :  { %276 = vst.msk [vmem:[%s503_s3 + $0x18] sm:$0xf] %vm269_vm2, %v329_v43  ;;  %v330_v54 = vpack.c.bf16 %v170_v45, %v170_v45  ;;  %284 = vst.msk [vmem:[%s503_s3 + $0x38] sm:$0xf] %vm269_vm2, %v337_v48  ;;  %v338_v56 = vpack.c.bf16 %v202_v50, %v202_v50 }
  0xe7   :  { %274 = vst.msk [vmem:[%s503_s3 + $0x10] sm:$0xf] %vm269_vm2, %v327_v49  ;;  %v328_v57 = vpack.c.bf16 %v162_v51, %v162_v51  ;;  %282 = vst.msk [vmem:[%s503_s3 + $0x30] sm:$0xf] %vm269_vm2, %v335_v53  ;;  %v336_v58 = vpack.c.bf16 %v194_v55, %v194_v55 }
  0xe8   :  { %277 = vst.msk [vmem:[%s503_s3 + $0x1c] sm:$0xf] %vm269_vm2, %v330_v54  ;;  %285 = vst.msk [vmem:[%s503_s3 + $0x3c] sm:$0xf] %vm269_vm2, %v338_v56 }
  0xe9   :  { %275 = vst.msk [vmem:[%s503_s3 + $0x14] sm:$0xf] %vm269_vm2, %v328_v57  ;;  %283 = vst.msk [vmem:[%s503_s3 + $0x34] sm:$0xf] %vm269_vm2, %v336_v58 }

// kernel: structure_module_forward.17
= control target key start
LH: loop header
LB: loop body
LE: loop exit
PB: predicated region body
PF: predicated region fallthrough
CT: control target
= control target key end

     0   :  { %vm30_vm0 = vcmask 64512   ;;  %vm350_vm1 = vcmask 60416   ;;  %s763_s0 = inlined_call_operand.vmem [shape: f32[128,8], index: 0, kind: input, shape index: {}]   ;;  %s764_s1 = inlined_call_operand.vmem [shape: f32[1,8], index: 1, kind: input, shape index: {}]   ;;  %s765_s2 = inlined_call_operand.vmem [shape: f32[1,8], index: 2, kind: input, shape index: {}]   ;;  %s766_s3 = inlined_call_operand.vmem [shape: bf16[128,8], index: 3, kind: output, shape index: {}]  }
   0x1   :  { %v14_v0 = vld [vmem:[%s763_s0] sm:$0xff]  ;;  %v16_v1 = vld [vmem:[%s763_s0 + $0x10] sm:$0xff]  ;;  %v15_v2 = vld [vmem:[%s763_s0 + $0x8] sm:$0xff] }
   0x2   :  { %v31_v3 = vsel %vm30_vm0, %v14_v0, 0.0  ;;  %v37_v4 = vsel %vm30_vm0, %v16_v1, 0.0  ;;  %v17_v5 = vld [vmem:[%s763_s0 + $0x18] sm:$0xff]  ;;  %v34_v6 = vsel %vm30_vm0, %v15_v2, 0.0  ;;  %v18_v8 = vld [vmem:[%s763_s0 + $0x20] sm:$0xff]  ;;  %v19_v9 = vld [vmem:[%s763_s0 + $0x28] sm:$0xff] }
   0x3   :  { %32 = vadd.xlane.f32.xlu0 %v31_v3  ;;  %38 = vadd.xlane.f32.xlu1 %v37_v4  ;;  %v40_v7 = vsel %vm30_vm0, %v17_v5, 0.0  ;;  %v43_v10 = vsel %vm30_vm0, %v18_v8, 0.0  ;;  %v46_v11 = vsel %vm30_vm0, %v19_v9, 0.0  ;;  %v484_v12 = vld [vmem:[%s763_s0 + $0x30] sm:$0xff]  ;;  %v489_v13 = vld [vmem:[%s763_s0 + $0x38] sm:$0xff]  ;;  %v498_v16 = vld [vmem:[%s763_s0 + $0x40] sm:$0xff] }
   0x4   :  { %v49_v14 = vsel %vm30_vm0, %v484_v12, 0.0  ;;  %v52_v15 = vsel %vm30_vm0, %v489_v13, 0.0  ;;  %v503_v17 = vld [vmem:[%s763_s0 + $0x48] sm:$0xff]  ;;  %v55_v18 = vsel %vm30_vm0, %v498_v16, 0.0  ;;  %v512_v20 = vld [vmem:[%s763_s0 + $0x50] sm:$0xff]  ;;  %v517_v21 = vld [vmem:[%s763_s0 + $0x58] sm:$0xff] }
   0x5   :  { %v58_v19 = vsel %vm30_vm0, %v503_v17, 0.0  ;;  %v61_v22 = vsel %vm30_vm0, %v512_v20, 0.0  ;;  %v64_v23 = vsel %vm30_vm0, %v517_v21, 0.0  ;;  %v526_v24 = vld [vmem:[%s763_s0 + $0x60] sm:$0xff]  ;;  %v531_v25 = vld [vmem:[%s763_s0 + $0x68] sm:$0xff]  ;;  %v540_v28 = vld [vmem:[%s763_s0 + $0x70] sm:$0xff] }
   0x6   :  { %v67_v26 = vsel %vm30_vm0, %v526_v24, 0.0  ;;  %v70_v27 = vsel %vm30_vm0, %v531_v25, 0.0  ;;  %v545_v29 = vld [vmem:[%s763_s0 + $0x78] sm:$0xff]  ;;  %v73_v30 = vsel %vm30_vm0, %v540_v28, 0.0 }
   0x7   :  { %35 = vadd.xlane.f32.xlu0 %v34_v6  ;;  %41 = vadd.xlane.f32.xlu1 %v40_v7  ;;  %v76_v31 = vsel %vm30_vm0, %v545_v29, 0.0 }
   0xb   :  { %44 = vadd.xlane.f32.xlu0 %v43_v10  ;;  %47 = vadd.xlane.f32.xlu1 %v46_v11 }
   0xf   :  { %50 = vadd.xlane.f32.xlu0 %v49_v14  ;;  %53 = vadd.xlane.f32.xlu1 %v52_v15 }
  0x13   :  { %56 = vadd.xlane.f32.xlu0 %v55_v18  ;;  %59 = vadd.xlane.f32.xlu1 %v58_v19 }
  0x17   :  { %62 = vadd.xlane.f32.xlu0 %v61_v22  ;;  %65 = vadd.xlane.f32.xlu1 %v64_v23 }
  0x1b   :  { %68 = vadd.xlane.f32.xlu0 %v67_v26  ;;  %71 = vadd.xlane.f32.xlu1 %v70_v27 }
  0x1f   :  { %74 = vadd.xlane.f32.xlu0 %v73_v30  ;;  %77 = vadd.xlane.f32.xlu1 %v76_v31 }
  0x90   :  { %v33_v32 = vpop.xlane.xlu0 %32  ;;  %v39_v33 = vpop.xlane.xlu1 %38 }
  0x91   :  { %v80_v34 = vmul.f32 0.125, %v33_v32  ;;  %v82_v35 = vmul.f32 0.125, %v39_v33 }
  0x93   :  { %v551_v36 = vsub.f32 %v14_v0, %v80_v34  ;;  %v553_v37 = vsub.f32 %v16_v1, %v82_v35 }
  0x94   :  { %v36_v38 = vpop.xlane.xlu0 %35  ;;  %v42_v39 = vpop.xlane.xlu1 %41 }
  0x95   :  { %v81_v40 = vmul.f32 0.125, %v36_v38  ;;  %v83_v41 = vmul.f32 0.125, %v42_v39  ;;  %v112_v42 = vmul.f32 %v551_v36, %v551_v36  ;;  %v114_v43 = vmul.f32 %v553_v37, %v553_v37 }
  0x97   :  { %v559_v44 = vsub.f32 %v15_v2, %v81_v40  ;;  %v561_v45 = vsub.f32 %v17_v5, %v83_v41  ;;  %v128_v46 = vsel %vm30_vm0, %v112_v42, 0.0  ;;  %v134_v49 = vsel %vm30_vm0, %v114_v43, 0.0 }
  0x98   :  { %129 = vadd.xlane.f32.xlu0 %v128_v46  ;;  %v45_v47 = vpop.xlane.xlu0 %44  ;;  %v48_v48 = vpop.xlane.xlu1 %47 }
  0x99   :  { %v84_v50 = vmul.f32 0.125, %v45_v47  ;;  %v85_v51 = vmul.f32 0.125, %v48_v48  ;;  %v113_v52 = vmul.f32 %v559_v44, %v559_v44  ;;  %v115_v53 = vmul.f32 %v561_v45, %v561_v45 }
  0x9b   :  { %v569_v54 = vsub.f32 %v18_v8, %v84_v50  ;;  %v571_v55 = vsub.f32 %v19_v9, %v85_v51  ;;  %v131_v56 = vsel %vm30_vm0, %v113_v52, 0.0  ;;  %v137_v59 = vsel %vm30_vm0, %v115_v53, 0.0 }
  0x9c   :  { %135 = vadd.xlane.f32.xlu0 %v134_v49  ;;  %132 = vadd.xlane.f32.xlu1 %v131_v56  ;;  %v51_v57 = vpop.xlane.xlu0 %50  ;;  %v54_v58 = vpop.xlane.xlu1 %53 }
  0x9d   :  { %v86_v60 = vmul.f32 0.125, %v51_v57  ;;  %v87_v61 = vmul.f32 0.125, %v54_v58  ;;  %v116_v62 = vmul.f32 %v569_v54, %v569_v54  ;;  %v117_v63 = vmul.f32 %v571_v55, %v571_v55 }
  0x9f   :  { %v580_v0 = vsub.f32 %v484_v12, %v86_v60  ;;  %v583_v1 = vsub.f32 %v489_v13, %v87_v61  ;;  %v140_v2 = vsel %vm30_vm0, %v116_v62, 0.0  ;;  %v143_v5 = vsel %vm30_vm0, %v117_v63, 0.0 }
  0xa0   :  { %138 = vadd.xlane.f32.xlu1 %v137_v59  ;;  %141 = vadd.xlane.f32.xlu0 %v140_v2  ;;  %v57_v3 = vpop.xlane.xlu0 %56  ;;  %v60_v4 = vpop.xlane.xlu1 %59 }
  0xa1   :  { %v88_v6 = vmul.f32 0.125, %v57_v3  ;;  %v89_v7 = vmul.f32 0.125, %v60_v4  ;;  %v118_v8 = vmul.f32 %v580_v0, %v580_v0  ;;  %v119_v9 = vmul.f32 %v583_v1, %v583_v1 }
  0xa3   :  { %v592_v10 = vsub.f32 %v498_v16, %v88_v6  ;;  %v595_v11 = vsub.f32 %v503_v17, %v89_v7  ;;  %v146_v12 = vsel %vm30_vm0, %v118_v8, 0.0  ;;  %v149_v15 = vsel %vm30_vm0, %v119_v9, 0.0 }
  0xa4   :  { %144 = vadd.xlane.f32.xlu1 %v143_v5  ;;  %147 = vadd.xlane.f32.xlu0 %v146_v12  ;;  %v63_v13 = vpop.xlane.xlu0 %62  ;;  %v66_v14 = vpop.xlane.xlu1 %65 }
  0xa5   :  { %v90_v18 = vmul.f32 0.125, %v63_v13  ;;  %v91_v19 = vmul.f32 0.125, %v66_v14  ;;  %v120_v22 = vmul.f32 %v592_v10, %v592_v10  ;;  %v121_v16 = vmul.f32 %v595_v11, %v595_v11  ;;  %v644_v14 = vld [vmem:[%s764_s1] ss:$0 sm:$0xff] }
  0xa7   :  { %v604_v23 = vsub.f32 %v512_v20, %v90_v18  ;;  %v607_v17 = vsub.f32 %v517_v21, %v91_v19  ;;  %v152_v26 = vsel %vm30_vm0, %v120_v22, 0.0  ;;  %v155_v31 = vsel %vm30_vm0, %v121_v16, 0.0 }
  0xa8   :  { %150 = vadd.xlane.f32.xlu1 %v149_v15  ;;  %153 = vadd.xlane.f32.xlu0 %v152_v26  ;;  %v69_v27 = vpop.xlane.xlu0 %68  ;;  %v72_v30 = vpop.xlane.xlu1 %71  ;;  %v650_v26 = vld [vmem:[%s765_s2] ss:$0 sm:$0xff] }
  0xa9   :  { %v92_v32 = vmul.f32 0.125, %v69_v27  ;;  %v93_v33 = vmul.f32 0.125, %v72_v30  ;;  %v122_v34 = vmul.f32 %v604_v23, %v604_v23  ;;  %v123_v20 = vmul.f32 %v607_v17, %v607_v17 }
  0xab   :  { %v616_v35 = vsub.f32 %v526_v24, %v92_v32  ;;  %v619_v21 = vsub.f32 %v531_v25, %v93_v33  ;;  %v158_v38 = vsel %vm30_vm0, %v122_v34, 0.0  ;;  %v161_v41 = vsel %vm30_vm0, %v123_v20, 0.0 }
  0xac   :  { %156 = vadd.xlane.f32.xlu1 %v155_v31  ;;  %159 = vadd.xlane.f32.xlu0 %v158_v38  ;;  %v75_v39 = vpop.xlane.xlu0 %74  ;;  %v78_v40 = vpop.xlane.xlu1 %77 }
  0xad   :  { %v94_v42 = vmul.f32 0.125, %v75_v39  ;;  %v95_v43 = vmul.f32 0.125, %v78_v40  ;;  %v124_v46 = vmul.f32 %v616_v35, %v616_v35  ;;  %v125_v24 = vmul.f32 %v619_v21, %v619_v21 }
  0xaf   :  { %v628_v47 = vsub.f32 %v540_v28, %v94_v42  ;;  %v631_v25 = vsub.f32 %v545_v29, %v95_v43  ;;  %v164_v48 = vsel %vm30_vm0, %v124_v46, 0.0  ;;  %v167_v49 = vsel %vm30_vm0, %v125_v24, 0.0 }
  0xb0   :  { %162 = vadd.xlane.f32.xlu1 %v161_v41  ;;  %165 = vadd.xlane.f32.xlu0 %v164_v48 }
  0xb1   :  { %v126_v50 = vmul.f32 %v628_v47, %v628_v47  ;;  %v127_v51 = vmul.f32 %v631_v25, %v631_v25 }
  0xb3   :  { %v170_v52 = vsel %vm30_vm0, %v126_v50, 0.0  ;;  %v173_v28 = vsel %vm30_vm0, %v127_v51, 0.0 }
  0xb4   :  { %168 = vadd.xlane.f32.xlu1 %v167_v49  ;;  %171 = vadd.xlane.f32.xlu0 %v170_v52 }
  0xb8   :  { %174 = vadd.xlane.f32.xlu1 %v173_v28 }
 0x125   :  { %v130_v29 = vpop.xlane.xlu0 %129 }
 0x126   :  { %v176_v53 = vmul.f32 0.125, %v130_v29 }
 0x128   :  { %v192_v56 = vadd.f32 1e-05, %v176_v53 }
 0x129   :  { %v133_v57 = vpop.xlane.xlu1 %132  ;;  %v136_v58 = vpop.xlane.xlu0 %135 }
 0x12a   :  { %405 = vrsqrt.f32 %v192_v56  ;;  %v177_v59 = vmul.f32 0.125, %v133_v57  ;;  %v178_v60 = vmul.f32 0.125, %v136_v58 }
 0x12c   :  { %v193_v61 = vadd.f32 1e-05, %v177_v59  ;;  %v194_v62 = vadd.f32 1e-05, %v178_v60 }
 0x12d   :  { %v139_v63 = vpop.xlane.xlu1 %138  ;;  %v142_v2 = vpop.xlane.xlu0 %141 }
 0x12e   :  { %407 = vrsqrt.f32 %v193_v61  ;;  %v179_v3 = vmul.f32 0.125, %v139_v63  ;;  %v180_v4 = vmul.f32 0.125, %v142_v2 }
 0x12f   :  { %409 = vrsqrt.f32 %v194_v62 }
 0x130   :  { %v195_v5 = vadd.f32 1e-05, %v179_v3  ;;  %v196_v6 = vadd.f32 1e-05, %v180_v4 }
 0x131   :  { %v145_v7 = vpop.xlane.xlu1 %144  ;;  %v148_v8 = vpop.xlane.xlu0 %147 }
 0x132   :  { %411 = vrsqrt.f32 %v195_v5  ;;  %v181_v9 = vmul.f32 0.125, %v145_v7  ;;  %v182_v12 = vmul.f32 0.125, %v148_v8 }
 0x133   :  { %413 = vrsqrt.f32 %v196_v6 }
 0x134   :  { %v406_v13 = vpop.eup %405  ;;  %v197_v15 = vadd.f32 1e-05, %v181_v9  ;;  %v198_v18 = vadd.f32 1e-05, %v182_v12 }
 0x135   :  { %v224_v19 = vmul.f32 %v406_v13, %v551_v36  ;;  %v151_v22 = vpop.xlane.xlu1 %150  ;;  %v154_v16 = vpop.xlane.xlu0 %153 }
 0x136   :  { %415 = vrsqrt.f32 %v197_v15  ;;  %v183_v27 = vmul.f32 0.125, %v151_v22  ;;  %v184_v30 = vmul.f32 0.125, %v154_v16 }
 0x137   :  { %v247_v31 = vmul.f32 %v644_v14, %v224_v19  ;;  %417 = vrsqrt.f32 %v198_v18 }
 0x138   :  { %v408_v32 = vpop.eup %407  ;;  %v199_v33 = vadd.f32 1e-05, %v183_v27  ;;  %v200_v34 = vadd.f32 1e-05, %v184_v30 }
 0x139   :  { %v410_v20 = vpop.eup %409  ;;  %v270_v36 = vadd.f32 %v650_v26, %v247_v31  ;;  %v225_v38 = vmul.f32 %v408_v32, %v559_v44  ;;  %v157_v39 = vpop.xlane.xlu1 %156 }
 0x13a   :  { %v160_v40 = vpop.xlane.xlu0 %159  ;;  %v226_v41 = vmul.f32 %v410_v20, %v553_v37  ;;  %419 = vrsqrt.f32 %v199_v33  ;;  %v185_v42 = vmul.f32 0.125, %v157_v39 }
 0x13b   :  { %v186_v43 = vmul.f32 0.125, %v160_v40  ;;  %v389_v46 = vpack.c.bf16 %v270_v36, %v270_v36  ;;  %v248_v24 = vmul.f32 %v644_v14, %v225_v38  ;;  %421 = vrsqrt.f32 %v200_v34 }
 0x13c   :  { %v412_v48 = vpop.eup %411  ;;  %v249_v49 = vmul.f32 %v644_v14, %v226_v41  ;;  %v201_v50 = vadd.f32 1e-05, %v185_v42 }
 0x13d   :  { %v202_v51 = vadd.f32 1e-05, %v186_v43  ;;  %v414_v52 = vpop.eup %413  ;;  %351 = vst.msk [vmem:[%s766_s3] sm:$0xf] %vm350_vm1, %v389_v46  ;;  %v271_v37 = vadd.f32 %v650_v26, %v248_v24  ;;  %v227_v44 = vmul.f32 %v412_v48, %v561_v45  ;;  %v163_v28 = vpop.xlane.xlu1 %162 }
 0x13e   :  { %v166_v29 = vpop.xlane.xlu0 %165  ;;  %v272_v53 = vadd.f32 %v650_v26, %v249_v49  ;;  %v228_v56 = vmul.f32 %v414_v52, %v569_v54  ;;  %423 = vrsqrt.f32 %v201_v50  ;;  %v187_v57 = vmul.f32 0.125, %v163_v28 }
 0x13f   :  { %v390_v58 = vpack.c.bf16 %v271_v37, %v271_v37  ;;  %v250_v59 = vmul.f32 %v644_v14, %v227_v44  ;;  %425 = vrsqrt.f32 %v202_v51  ;;  %v188_v60 = vmul.f32 0.125, %v166_v29 }
 0x140   :  { %v416_v61 = vpop.eup %415  ;;  %v391_v62 = vpack.c.bf16 %v272_v53, %v272_v53  ;;  %v251_v63 = vmul.f32 %v644_v14, %v228_v56  ;;  %v203_v2 = vadd.f32 1e-05, %v187_v57 }
 0x141   :  { %v418_v3 = vpop.eup %417  ;;  %352 = vst.msk [vmem:[%s766_s3 + $0x4] sm:$0xf] %vm350_vm1, %v390_v58  ;;  %v273_v45 = vadd.f32 %v650_v26, %v250_v59  ;;  %v229_v54 = vmul.f32 %v416_v61, %v571_v55  ;;  %v204_v4 = vadd.f32 1e-05, %v188_v60  ;;  %v169_v5 = vpop.xlane.xlu1 %168 }
 0x142   :  { %v172_v6 = vpop.xlane.xlu0 %171  ;;  %353 = vst.msk [vmem:[%s766_s3 + $0x8] sm:$0xf] %vm350_vm1, %v391_v62  ;;  %v274_v7 = vadd.f32 %v650_v26, %v251_v63  ;;  %v230_v8 = vmul.f32 %v418_v3, %v580_v0  ;;  %427 = vrsqrt.f32 %v203_v2  ;;  %v189_v9 = vmul.f32 0.125, %v169_v5 }
 0x143   :  { %v392_v12 = vpack.c.bf16 %v273_v45, %v273_v45  ;;  %v252_v13 = vmul.f32 %v644_v14, %v229_v54  ;;  %429 = vrsqrt.f32 %v204_v4  ;;  %v190_v15 = vmul.f32 0.125, %v172_v6 }
 0x144   :  { %v420_v55 = vpop.eup %419  ;;  %v393_v18 = vpack.c.bf16 %v274_v7, %v274_v7  ;;  %v253_v19 = vmul.f32 %v644_v14, %v230_v8  ;;  %v205_v22 = vadd.f32 1e-05, %v189_v9 }
 0x145   :  { %v422_v16 = vpop.eup %421  ;;  %354 = vst.msk [vmem:[%s766_s3 + $0xc] sm:$0xf] %vm350_vm1, %v392_v12  ;;  %v275_v0 = vadd.f32 %v650_v26, %v252_v13  ;;  %v231_v27 = vmul.f32 %v420_v55, %v583_v1  ;;  %v206_v30 = vadd.f32 1e-05, %v190_v15  ;;  %v175_v31 = vpop.xlane.xlu1 %174 }
 0x146   :  { %355 = vst.msk [vmem:[%s766_s3 + $0x10] sm:$0xf] %vm350_vm1, %v393_v18  ;;  %v276_v32 = vadd.f32 %v650_v26, %v253_v19  ;;  %v232_v33 = vmul.f32 %v422_v16, %v592_v10  ;;  %431 = vrsqrt.f32 %v205_v22  ;;  %v191_v34 = vmul.f32 0.125, %v175_v31 }
 0x147   :  { %v394_v20 = vpack.c.bf16 %v275_v0, %v275_v0  ;;  %v254_v36 = vmul.f32 %v644_v14, %v231_v27  ;;  %433 = vrsqrt.f32 %v206_v30 }
 0x148   :  { %v424_v38 = vpop.eup %423  ;;  %v395_v39 = vpack.c.bf16 %v276_v32, %v276_v32  ;;  %v255_v1 = vmul.f32 %v644_v14, %v232_v33  ;;  %v207_v40 = vadd.f32 1e-05, %v191_v34 }
 0x149   :  { %v426_v41 = vpop.eup %425  ;;  %356 = vst.msk [vmem:[%s766_s3 + $0x14] sm:$0xf] %vm350_vm1, %v394_v20  ;;  %v277_v42 = vadd.f32 %v650_v26, %v254_v36  ;;  %v233_v10 = vmul.f32 %v424_v38, %v595_v11 }
 0x14a   :  { %357 = vst.msk [vmem:[%s766_s3 + $0x18] sm:$0xf] %vm350_vm1, %v395_v39  ;;  %v278_v43 = vadd.f32 %v650_v26, %v255_v1  ;;  %v234_v46 = vmul.f32 %v426_v41, %v604_v23  ;;  %435 = vrsqrt.f32 %v207_v40 }
 0x14b   :  { %v396_v24 = vpack.c.bf16 %v277_v42, %v277_v42  ;;  %v256_v48 = vmul.f32 %v644_v14, %v233_v10 }
 0x14c   :  { %v428_v49 = vpop.eup %427  ;;  %v397_v50 = vpack.c.bf16 %v278_v43, %v278_v43  ;;  %v257_v51 = vmul.f32 %v644_v14, %v234_v46 }
 0x14d   :  { %v430_v52 = vpop.eup %429  ;;  %358 = vst.msk [vmem:[%s766_s3 + $0x1c] sm:$0xf] %vm350_vm1, %v396_v24  ;;  %v279_v11 = vadd.f32 %v650_v26, %v256_v48  ;;  %v235_v37 = vmul.f32 %v428_v49, %v607_v17 }
 0x14e   :  { %359 = vst.msk [vmem:[%s766_s3 + $0x20] sm:$0xf] %vm350_vm1, %v397_v50  ;;  %v280_v23 = vadd.f32 %v650_v26, %v257_v51  ;;  %v236_v44 = vmul.f32 %v430_v52, %v616_v35 }
 0x14f   :  { %v398_v28 = vpack.c.bf16 %v279_v11, %v279_v11  ;;  %v258_v29 = vmul.f32 %v644_v14, %v235_v37 }
 0x150   :  { %v432_v53 = vpop.eup %431  ;;  %v399_v56 = vpack.c.bf16 %v280_v23, %v280_v23  ;;  %v259_v57 = vmul.f32 %v644_v14, %v236_v44 }
 0x151   :  { %v434_v58 = vpop.eup %433  ;;  %360 = vst.msk [vmem:[%s766_s3 + $0x24] sm:$0xf] %vm350_vm1, %v398_v28  ;;  %v281_v17 = vadd.f32 %v650_v26, %v258_v29  ;;  %v237_v59 = vmul.f32 %v432_v53, %v619_v21 }
 0x152   :  { %361 = vst.msk [vmem:[%s766_s3 + $0x28] sm:$0xf] %vm350_vm1, %v399_v56  ;;  %v282_v35 = vadd.f32 %v650_v26, %v259_v57  ;;  %v238_v60 = vmul.f32 %v434_v58, %v628_v47 }
 0x153   :  { %v400_v61 = vpack.c.bf16 %v281_v17, %v281_v17  ;;  %v260_v62 = vmul.f32 %v644_v14, %v237_v59 }
 0x154   :  { %v436_v63 = vpop.eup %435  ;;  %v401_v2 = vpack.c.bf16 %v282_v35, %v282_v35  ;;  %v261_v3 = vmul.f32 %v644_v14, %v238_v60 }
 0x155   :  { %362 = vst.msk [vmem:[%s766_s3 + $0x2c] sm:$0xf] %vm350_vm1, %v400_v61  ;;  %v283_v21 = vadd.f32 %v650_v26, %v260_v62  ;;  %v239_v45 = vmul.f32 %v436_v63, %v631_v25 }
 0x156   :  { %363 = vst.msk [vmem:[%s766_s3 + $0x30] sm:$0xf] %vm350_vm1, %v401_v2  ;;  %v284_v47 = vadd.f32 %v650_v26, %v261_v3 }
 0x157   :  { %v402_v54 = vpack.c.bf16 %v283_v21, %v283_v21  ;;  %v262_v4 = vmul.f32 %v644_v14, %v239_v45 }
 0x158   :  { %v403_v5 = vpack.c.bf16 %v284_v47, %v284_v47 }
 0x159   :  { %364 = vst.msk [vmem:[%s766_s3 + $0x34] sm:$0xf] %vm350_vm1, %v402_v54  ;;  %v285_v6 = vadd.f32 %v650_v26, %v262_v4 }
 0x15a   :  { %365 = vst.msk [vmem:[%s766_s3 + $0x38] sm:$0xf] %vm350_vm1, %v403_v5 }
 0x15b   :  { %v404_v25 = vpack.c.bf16 %v285_v6, %v285_v6 }
 0x15d   :  { %366 = vst.msk [vmem:[%s766_s3 + $0x3c] sm:$0xf] %vm350_vm1, %v404_v25 }

// kernel: structure_module_forward.21
= control target key start
LH: loop header
LB: loop body
LE: loop exit
PB: predicated region body
PF: predicated region fallthrough
CT: control target
= control target key end

     0   :  { %s5102_s0 = inlined_call_operand.hbm [shape: bf16[2,4,8,28], index: 0, kind: input, shape index: {}]   ;;  %s5103_s1 = inlined_call_operand.hbm [shape: bf16[2,4,8,28], index: 1, kind: input, shape index: {}]   ;;  %s5104_s2 = inlined_call_operand.hbm [shape: bf16[2,4,8,40], index: 2, kind: input, shape index: {}]   ;;  %s5105_s3 = inlined_call_operand.hbm [shape: bf16[2,4,8,8], index: 3, kind: input, shape index: {}]   ;;  %s5106_s4 = inlined_call_operand.hbm [shape: f32[2,4,1,8], index: 4, kind: input, shape index: {}]   ;;  %s5107_s5 = inlined_call_operand.hbm [shape: f32[2,8,1], index: 5, kind: input, shape index: {}]   ;;  %s5108_s6 = inlined_call_operand.hbm [shape: f32[2,1,8], index: 6, kind: input, shape index: {}]   ;;  %s5109_s7 = inlined_call_operand.hbm [shape: bf16[2,8,8,8], index: 7, kind: input, shape index: {}]   ;;  %s5110_s8 = inlined_call_operand.hbm [shape: f32[2,8,160], index: 8, kind: output, shape index: {0}]   ;;  %s5111_s9 = inlined_call_operand.hbm [shape: f32[2,8,4,8], index: 9, kind: output, shape index: {1}]  }
   0x1   :  { %5134 = sst [smem:[#allocation40_spill]] %s5103_s1 }
   0x2   :  { %5135 = sst [smem:[#allocation41_spill]] %s5105_s3 }
   0x3   :  { %5136 = sst [smem:[#allocation42_spill]] %s5107_s5 }
   0x4   :  { %5137 = sst [smem:[#allocation43_spill]] %s5110_s8 }
   0x5   :  { %5138 = sst [smem:[#allocation44_spill]] %s5111_s9 }
   0x6   :  { %15 = vsyncpa [#allocation9], 0 }
   0x7   :  { %17 = vsyncpa [#allocation9 + $0x1], 0 }
   0x8   :  { %18 = vsyncpa [#allocation12], 0 }
   0x9   :  { %20 = vsyncpa [#allocation12 + $0x1], 0 }
   0xa   :  { %21 = vsyncpa [#allocation15], 0 }
   0xb   :  { %23 = vsyncpa [#allocation15 + $0x1], 0 }
   0xc   :  { %24 = vsyncpa [#allocation18], 0 }
   0xd   :  { %26 = vsyncpa [#allocation18 + $0x1], 0 }
   0xe   :  { %27 = vsyncpa [#allocation21], 0 }
   0xf   :  { %29 = vsyncpa [#allocation21 + $0x1], 0 }
  0x10   :  { %30 = vsyncpa [#allocation10], 0 }
  0x11   :  { %32 = vsyncpa [#allocation10 + $0x1], 0 }
  0x12   :  { %33 = vsyncpa [#allocation24], 0 }
  0x13   :  { %35 = vsyncpa [#allocation24 + $0x1], 0  ;;  %s4095_s30 = smov 0   ;;  %s4097_s10 = smov 0  }
  0x14   :  { %s4099_s11 = smov 0   ;;  %s4101_s12 = smov 0  }
  0x15   :  { %s4103_s13 = smov 0   ;;  %s4105_s14 = smov 0  }
  0x16 LB: > { %5139 = sst [smem:[#allocation32_spill]] %s3998_s30  ;;  %s4126_s15 = sadd.s32 4294967295, %s4018_s14   ;;  %s4018_s14 = sphi %s4105_s14, %s41_s14   ;;  %s4014_s13 = sphi %s4103_s13, %s5194_s13   ;;  %s4010_s12 = sphi %s4101_s12, %s5193_s12   ;;  %s4006_s11 = sphi %s4099_s11, %s5189_s11   ;;  %s4002_s10 = sphi %s4097_s10, %s5192_s10   ;;  %s3998_s30 = sphi %s4095_s30, %s5191_s30  }
  0x17   : > { %5140 = sst [smem:[#allocation33_spill]] %s4006_s11  ;;  %s3280_s16 = sadd.s32 4294967294, %s4018_s14  }
  0x18   : > { %5141 = sst [smem:[#allocation34_spill]] %s4010_s12  ;;  %s60_s17 = sadd.s32 1, %s4014_s13 }
  0x19   : > { %5142 = sst [smem:[#allocation35_spill]] %s4018_s14  ;;  %s69_s18 = sadd.s32 1, %s4006_s11 }
  0x1a   : > { %p62_p0 = scmp.ge.s32.totalorder %s60_s17, 2  ;;  %p76_p1 = scmp.ne.s32.totalorder %s4006_s11, %s4002_s10 }
  0x1b   : > { %p77_p2 = scmp.eq.s32.totalorder %s4018_s14, 0  ;;  %p82_p3 = scmp.ne.s32.totalorder %s4002_s10, %s3998_s30 }
  0x1c   : > { %s5196_s17 = smov (%p62_p0, %s60_s17), 0  ;;  %p83_p5 = scmp.eq.s32.totalorder %s4126_s15, 0 }
  0x1d   : > { %5143 = sst [smem:[#allocation36_spill]] %s5196_s17  ;;  %p4138_p4 = por %p77_p2, %p76_p1 }
  0x1e   : > { %s64_s20 = ssub.s32 %s4014_s13, %s5196_s17  ;;  %p308_p6 = scmp.eq.s32.totalorder %s4126_s15, 1 }
  0x1f   : > { %p67_p7 = scmp.eq.s32.totalorder %s64_s20, 0  ;;  %p4146_p8 = por %p83_p5, %p82_p3 }
  0x20   : > { %p4150_p9 = por %p308_p6, %p76_p1  ;;  %p314_p10 = scmp.eq.s32.totalorder %s3280_s16, 1 }
  0x21   : > { %s5145_s21 = scalar_select %p4146_p8, 1, 0 }
  0x22   : > { %s5146_s22 = scalar_select %p4150_p9, 1, 0 }
  0x23   : > { %s4155_s23 = scalar_select %p67_p7, %s4006_s11, %s69_s18  }
  0x24   : > { %5147 = sst [smem:[#allocation37_spill]] %s5146_s22  ;;  %p4157_p11 = por %p314_p10, %p82_p3 }
  0x25   : > { %5148 = sst [smem:[#allocation38_spill]] %s4155_s23  ;;  %p3557_p13 = scmp.lt.s32.totalorder %s4018_s14, 2 }
  0x26   : > { %s5149_s24 = scalar_select %p4157_p11, 1, 0 }
  0x27   : > { %s4164_s25 = sand.u32 1, %s4006_s11   ;;  %s4170_s27 = sshll.u32 %s4014_s13, 8 }
  0x28   : > { %5150 = sst [smem:[#allocation39_spill]] %s5149_s24  ;;  %s4167_s26 = sshll.u32 %s4164_s25, 4 }
  0x29   : > { %p4174_p0 = pnand %p3557_p13, %p4138_p4  ;;  %s4179_s29 = sand.u32 1, %s4018_s14  }
  0x2a   : > { %s5152_s1 = sld [smem:[#allocation40_spill]]  ;;  %s388_s17 = scalar_lea.vmem [#allocation11], %s4167_s26 }
  0x2b   : > { %s5151_s28 = scalar_select %p4174_p0, 1, 0 }
  0x2c   : > { %s396_s19 = sshll.u32 %s388_s17, 4  ;;  %p4197_p4 = pneg %p4174_p0  ;;  %s4189_s19 = int_to_ptr.vmem [resolvable:$true] %s396_s19 }
  0x30   : > { %s4185_s20 = scalar_lea.hbm %s5152_s1, %s4170_s27  ;;  %s3653_s17 = scalar_lea.hbm %s5152_s1, 512 }
  0x31   : > { %s3648_s11 = scalar_lea.hbm %s4185_s20, 256  ;;  %p3654_p7 = scmp.lt.u32.totalorder %s4185_s20, %s5152_s1 }
  0x32   : > { %p3649_p3 = scmp.ne.s32.totalorder %s4185_s20, %s3648_s11  ;;  %p3655_p10 = scmp.lt.u32.totalorder %s3653_s17, %s3648_s11 }
  0x33   : > { %p3657_p12 = scmp.lt.u32.totalorder %s3648_s11, %s4185_s20 }
  0x34   : > { %p3651_p5 = pnand %p4197_p4, %p3649_p3  ;;  %p3656_p13 = por %p3655_p10, %p3654_p7 }
  0x36   : > { %p3652_p6 = pneg %p3651_p5  ;;  %p3658_p1 = por %p3657_p12, %p3656_p13 }
  0x38   : > { %p3659_p2 = pnand %p3658_p1, %p3652_p6 }
  0x3a   : > { %3662 = shalt.err (!%p3659_p2)
}
  0x3b   : > { %s3663_s23 = scalar_lea.vmem %s4189_s19, 256  ;;  %s4020_s16 = smov [#allocation11]  }
  0x3c   : > { %p3664_p3 = scmp.ne.s32.totalorder %s4189_s19, %s3663_s23  ;;  %s3668_s18 = sshll.u32 %s4020_s16, 4  ;;  %s3669_s18 = int_to_ptr.vmem [resolvable:$false] %s3668_s18 }
  0x3d   : > { %s3670_s9 = scalar_lea.vmem %s3669_s18, 512  ;;  %p3671_p9 = scmp.lt.s32.totalorder %s4189_s19, %s3669_s18 }
  0x3e   : > { %p3666_p5 = pnand %p3664_p3, %p4197_p4  ;;  %p3672_p8 = scmp.lt.s32.totalorder %s3670_s9, %s3663_s23 }
  0x40   : > { %p3667_p11 = pneg %p3666_p5  ;;  %p3673_p7 = por %p3672_p8, %p3671_p9 }
  0x42   : > { %p3674_p10 = pnand %p3673_p7, %p3667_p11 }
  0x44   : > { %3677 = shalt.err (!%p3674_p10)
}
  0x45   : > { %s5120_s30 = smov 64   ;;  %s5122_s11 = smov 4  }
  0x46   : > { %s5154_s23 = scalar_lea.sflag [#allocation12], %s4179_s29  ;;  %p5155_p8 = scmp.lt.s32.totalorder %s4018_s14, 3 }
  0x47   : > { %3531 = dma.hbm_to_vmem [thread:$0]  (!%p4174_p0), %s4185_s20, 256, %s4189_s19, %s5154_s23, %s5120_s30, %s5120_s30, %s5122_s11  }
  0x48   : > { %p5156_p9 = scmp.ge.s32.totalorder %s4018_s14, 1  ;;  %s5158_s3 = sld [smem:[#allocation41_spill]] }
  0x49   : > { %s432_s1 = scalar_lea.vmem [#allocation14], %s4167_s26  ;;  %s3298_s20 = sshll.u32 %s4164_s25, 3 }
  0x4a   : > { %p4229_p11 = pnand %p5156_p9, %p5155_p8  ;;  %s441_s8 = sshll.u32 %s432_s1, 4  ;;  %s4240_s8 = int_to_ptr.vmem [resolvable:$true] %s441_s8 }
  0x4b   : > { %s5129_s19 = scalar_lea.sflag [#allocation15], %s4179_s29 }
  0x4c   : > { %s5157_s17 = scalar_select %p4229_p11, 1, 0 }
  0x4e   : > { %s4237_s9 = scalar_lea.hbm %s5158_s3, %s4170_s27  ;;  %s3683_s16 = scalar_lea.hbm %s5158_s3, 512 }
  0x4f   : > { %s3678_s23 = scalar_lea.hbm %s4237_s9, 256  ;;  %p3684_p6 = scmp.lt.u32.totalorder %s4237_s9, %s5158_s3 }
  0x50   : > { %p3679_p12 = scmp.ne.s32.totalorder %s4237_s9, %s3678_s23  ;;  %p3685_p13 = scmp.lt.u32.totalorder %s3683_s16, %s3678_s23 }
  0x51   : > { %p3687_p5 = scmp.lt.u32.totalorder %s3678_s23, %s4237_s9 }
  0x52   : > { %p3681_p1 = pnand %p3679_p12, %p4197_p4  ;;  %p3686_p3 = por %p3685_p13, %p3684_p6 }
  0x54   : > { %p3682_p2 = pneg %p3681_p1  ;;  %p3688_p7 = por %p3687_p5, %p3686_p3 }
  0x56   : > { %p3689_p10 = pnand %p3688_p7, %p3682_p2 }
  0x58   : > { %3692 = shalt.err (!%p3689_p10)
}
  0x59   : > { %s3693_s1 = scalar_lea.vmem %s4240_s8, 256  ;;  %s4023_s30 = smov [#allocation14]  }
  0x5a   : > { %p3694_p8 = scmp.ne.s32.totalorder %s4240_s8, %s3693_s1  ;;  %s3698_s11 = sshll.u32 %s4023_s30, 4  ;;  %s3699_s11 = int_to_ptr.vmem [resolvable:$false] %s3698_s11 }
  0x5b   : > { %s3700_s14 = scalar_lea.vmem %s3699_s11, 512  ;;  %p3701_p1 = scmp.lt.s32.totalorder %s4240_s8, %s3699_s11 }
  0x5c   : > { %p3696_p9 = pnand %p3694_p8, %p4197_p4  ;;  %p3702_p11 = scmp.lt.s32.totalorder %s3700_s14, %s3693_s1 }
  0x5e   : > { %p3697_p12 = pneg %p3696_p9  ;;  %p3703_p6 = por %p3702_p11, %p3701_p1 }
  0x60   : > { %p3704_p13 = pnand %p3703_p6, %p3697_p12 }
  0x62   : > { %3707 = shalt.err (!%p3704_p13)
}
  0x63   : > { %s5159_s23 = smov 4   ;;  %s5160_s16 = smov 64  }
  0x64   : > { %3537 = dma.hbm_to_vmem [thread:$0]  (!%p4174_p0), %s4237_s9, 256, %s4240_s8, %s5129_s19, %s5160_s16, %s5160_s16, %s5159_s23  }
  0x65   : > { %s3299_s18 = sshll.u32 %s4014_s13, 7  ;;  %s5161_s5 = sld [smem:[#allocation42_spill]] }
  0x66   : > { %s477_s14 = scalar_lea.vmem [#allocation17], %s3298_s20  ;;  %s5132_s22 = scalar_lea.sflag [#allocation18], %s4179_s29 }
  0x67   : > { %s485_s3 = sshll.u32 %s477_s14, 4  ;;  %s486_s3 = int_to_ptr.vmem [resolvable:$true] %s485_s3 }
  0x6b   : > { %s4274_s11 = scalar_lea.hbm %s5161_s5, %s3299_s18  ;;  %s3713_s30 = scalar_lea.hbm %s5161_s5, 256 }
  0x6c   : > { %s3708_s12 = scalar_lea.hbm %s4274_s11, 128  ;;  %p3714_p5 = scmp.lt.u32.totalorder %s4274_s11, %s5161_s5 }
  0x6d   : > { %p3709_p11 = scmp.ne.s32.totalorder %s4274_s11, %s3708_s12  ;;  %p3715_p7 = scmp.lt.u32.totalorder %s3713_s30, %s3708_s12 }
  0x6e   : > { %p3717_p8 = scmp.lt.u32.totalorder %s3708_s12, %s4274_s11 }
  0x6f   : > { %p3711_p2 = pnand %p3709_p11, %p4197_p4  ;;  %p3716_p10 = por %p3715_p7, %p3714_p5 }
  0x71   : > { %p3712_p3 = pneg %p3711_p2  ;;  %p3718_p9 = por %p3717_p8, %p3716_p10 }
  0x73   : > { %p3719_p12 = pnand %p3718_p9, %p3712_p3 }
  0x75   : > { %3722 = shalt.err (!%p3719_p12)
}
  0x76   : > { %s3723_s20 = scalar_lea.vmem %s486_s3, 128  ;;  %s4024_s14 = smov [#allocation17]  }
  0x77   : > { %p3724_p1 = scmp.ne.s32.totalorder %s486_s3, %s3723_s20  ;;  %s3728_s19 = sshll.u32 %s4024_s14, 4  ;;  %s3729_s19 = int_to_ptr.vmem [resolvable:$false] %s3728_s19 }
  0x78   : > { %s3730_s8 = scalar_lea.vmem %s3729_s19, 256  ;;  %p3731_p11 = scmp.lt.s32.totalorder %s486_s3, %s3729_s19 }
  0x79   : > { %p3726_p6 = pnand %p3724_p1, %p4197_p4  ;;  %p3732_p2 = scmp.lt.s32.totalorder %s3730_s8, %s3723_s20 }
  0x7b   : > { %p3727_p13 = pneg %p3726_p6  ;;  %p3733_p0 = por %p3732_p2, %p3731_p11 }
  0x7d   : > { %p3734_p5 = pnand %p3733_p0, %p3727_p13 }
  0x7f   : > { %3737 = shalt.err (!%p3734_p5)
}
  0x80   : > { %p5162_p7 = scmp.ne.s32.totalorder %s5151_s28, 0  ;;  %s4302_s30 = scalar_lea.hbm %s5102_s0, %s4170_s27 }
  0x81   : > { %s366_s19 = scalar_lea.vmem [#allocation8], %s4167_s26  ;;  %s4311_s14 = scalar_lea.hbm %s5104_s2, %s4170_s27 }
  0x82   : > { %3543 = dma.hbm_to_vmem [thread:$0]  (!%p5162_p7), %s4274_s11, 128, %s486_s3, %s5132_s22  }
  0x83   : > { %s374_s18 = sshll.u32 %s366_s19, 4  ;;  %s363_s8 = scalar_lea.sflag [#allocation9], %s4164_s25  ;;  %s4305_s18 = int_to_ptr.vmem [resolvable:$true] %s374_s18 }
  0x84   : > { %s3738_s3 = scalar_lea.hbm %s4302_s30, 256  ;;  %s3743_s9 = scalar_lea.hbm %s5102_s0, 512 }
  0x85   : > { %p3739_p0 = scmp.ne.s32.totalorder %s4302_s30, %s3738_s3  ;;  %p3744_p8 = scmp.lt.u32.totalorder %s4302_s30, %s5102_s0 }
  0x86   : > { %p3745_p9 = scmp.lt.u32.totalorder %s3743_s9, %s3738_s3  ;;  %p3747_p1 = scmp.lt.u32.totalorder %s3738_s3, %s4302_s30 }
  0x87   : > { %p3741_p3 = pnand %p3739_p0, %p4197_p4 }
  0x88   : > { %p3746_p12 = por %p3745_p9, %p3744_p8 }
  0x89   : > { %p3742_p10 = pneg %p3741_p3 }
  0x8a   : > { %p3748_p6 = por %p3747_p1, %p3746_p12 }
  0x8c   : > { %p3749_p13 = pnand %p3748_p6, %p3742_p10 }
  0x8e   : > { %3752 = shalt.err (!%p3749_p13)
}
  0x8f   : > { %s3753_s27 = scalar_lea.vmem %s4305_s18, 256  ;;  %s4025_s19 = smov [#allocation8]  }
  0x90   : > { %p3754_p11 = scmp.ne.s32.totalorder %s4305_s18, %s3753_s27  ;;  %s3758_s1 = sshll.u32 %s4025_s19, 4  ;;  %s3759_s1 = int_to_ptr.vmem [resolvable:$false] %s3758_s1 }
  0x91   : > { %s3760_s5 = scalar_lea.vmem %s3759_s1, 512  ;;  %p3761_p0 = scmp.lt.s32.totalorder %s4305_s18, %s3759_s1 }
  0x92   : > { %p3756_p2 = pnand %p3754_p11, %p4197_p4  ;;  %p3762_p3 = scmp.lt.s32.totalorder %s3760_s5, %s3753_s27 }
  0x94   : > { %p3757_p5 = pneg %p3756_p2  ;;  %p3763_p8 = por %p3762_p3, %p3761_p0 }
  0x96   : > { %p3764_p9 = pnand %p3763_p8, %p3757_p5 }
  0x98   : > { %3767 = shalt.err (!%p3764_p9)
}
  0x99   : > { %3528 = dma.hbm_to_vmem [thread:$0]  (!%p5162_p7), %s4302_s30, 256, %s4305_s18, %s363_s8, %s5160_s16, %s5160_s16, %s5159_s23  }
  0x9a   : > { %s410_s22 = scalar_lea.vmem [#allocation13], %s4167_s26  ;;  %s3295_s3 = sshll.u32 %s4164_s25, 2 }
  0x9b   : > { %s418_s20 = sshll.u32 %s410_s22, 4  ;;  %s3768_s11 = scalar_lea.hbm %s4311_s14, 256  ;;  %s4342_s20 = int_to_ptr.vmem [resolvable:$true] %s418_s20 }
  0x9c   : > { %p3769_p10 = scmp.ne.s32.totalorder %s4311_s14, %s3768_s11  ;;  %s3773_s27 = scalar_lea.hbm %s5104_s2, 512 }
  0x9d   : > { %p3774_p6 = scmp.lt.u32.totalorder %s4311_s14, %s5104_s2  ;;  %p3775_p13 = scmp.lt.u32.totalorder %s3773_s27, %s3768_s11 }
  0x9e   : > { %p3771_p12 = pnand %p3769_p10, %p4197_p4  ;;  %p3777_p2 = scmp.lt.u32.totalorder %s3768_s11, %s4311_s14 }
  0x9f   : > { %p3776_p11 = por %p3775_p13, %p3774_p6 }
  0xa0   : > { %p3772_p1 = pneg %p3771_p12 }
  0xa1   : > { %p3778_p5 = por %p3777_p2, %p3776_p11 }
  0xa3   : > { %p3779_p0 = pnand %p3778_p5, %p3772_p1 }
  0xa5   : > { %3782 = shalt.err (!%p3779_p0)
}
  0xa6   : > { %s3783_s26 = scalar_lea.vmem %s4342_s20, 256  ;;  %s4026_s30 = smov [#allocation13]  }
  0xa7   : > { %p3784_p3 = scmp.ne.s32.totalorder %s4342_s20, %s3783_s26  ;;  %s3788_s18 = sshll.u32 %s4026_s30, 4  ;;  %s3789_s18 = int_to_ptr.vmem [resolvable:$false] %s3788_s18 }
  0xa8   : > { %s3790_s8 = scalar_lea.vmem %s3789_s18, 512  ;;  %p3791_p10 = scmp.lt.s32.totalorder %s4342_s20, %s3789_s18 }
  0xa9   : > { %p3786_p8 = pnand %p3784_p3, %p4197_p4  ;;  %p3792_p12 = scmp.lt.s32.totalorder %s3790_s8, %s3783_s26 }
  0xab   : > { %p3787_p9 = pneg %p3786_p8  ;;  %p3793_p6 = por %p3792_p12, %p3791_p10 }
  0xad   : > { %p3794_p13 = pnand %p3793_p6, %p3787_p9 }
  0xaf   : > { %3797 = shalt.err (!%p3794_p13)
}
  0xb0   : > { %s5163_s5 = scalar_lea.sflag [#allocation12], %s4179_s29  ;;  %s3373_s22 = sshll.u32 %s4014_s13, 6 }
  0xb1   : > { %3534 = dma.hbm_to_vmem [thread:$0]  (!%p5162_p7), %s4311_s14, 256, %s4342_s20, %s5163_s5, %s5160_s16, %s5160_s16, %s5159_s23  }
  0xb2   : > { %s455_s11 = scalar_lea.vmem [#allocation16], %s3295_s3  ;;  %s4376_s19 = scalar_lea.hbm %s5106_s4, %s3373_s22 }
  0xb3   : > { %s463_s12 = sshll.u32 %s455_s11, 4  ;;  %s3798_s1 = scalar_lea.hbm %s4376_s19, 64  ;;  %s4378_s12 = int_to_ptr.vmem [resolvable:$true] %s463_s12 }
  0xb4   : > { %p3799_p1 = scmp.ne.s32.totalorder %s4376_s19, %s3798_s1  ;;  %s3803_s3 = scalar_lea.hbm %s5106_s4, 128 }
  0xb5   : > { %p3804_p5 = scmp.lt.u32.totalorder %s4376_s19, %s5106_s4  ;;  %p3805_p0 = scmp.lt.u32.totalorder %s3803_s3, %s3798_s1 }
  0xb6   : > { %p3801_p11 = pnand %p3799_p1, %p4197_p4  ;;  %p3807_p8 = scmp.lt.u32.totalorder %s3798_s1, %s4376_s19 }
  0xb7   : > { %p3806_p3 = por %p3805_p0, %p3804_p5 }
  0xb8   : > { %p3802_p2 = pneg %p3801_p11 }
  0xb9   : > { %p3808_p9 = por %p3807_p8, %p3806_p3 }
  0xbb   : > { %p3809_p10 = pnand %p3808_p9, %p3802_p2 }
  0xbd   : > { %3812 = shalt.err (!%p3809_p10)
}
  0xbe   : > { %s3813_s18 = scalar_lea.vmem %s4378_s12, 64  ;;  %s4027_s8 = smov [#allocation16]  }
  0xbf   : > { %p3814_p12 = scmp.ne.s32.totalorder %s4378_s12, %s3813_s18  ;;  %s3818_s5 = sshll.u32 %s4027_s8, 4  ;;  %s3819_s5 = int_to_ptr.vmem [resolvable:$false] %s3818_s5 }
  0xc0   : > { %s3820_s22 = scalar_lea.vmem %s3819_s5, 128  ;;  %p3821_p1 = scmp.lt.s32.totalorder %s4378_s12, %s3819_s5 }
  0xc1   : > { %p3816_p6 = pnand %p3814_p12, %p4197_p4  ;;  %p3822_p11 = scmp.lt.s32.totalorder %s3820_s22, %s3813_s18 }
  0xc3   : > { %p3817_p13 = pneg %p3816_p6  ;;  %p3823_p5 = por %p3822_p11, %p3821_p1 }
  0xc5   : > { %p3824_p0 = pnand %p3823_p5, %p3817_p13 }
  0xc7   : > { %3827 = shalt.err (!%p3824_p0)
}
  0xc8   : > { %s4028_s11 = smov 16   ;;  %s4029_s9 = smov 1  }
  0xc9   : > { %s5164_s27 = scalar_lea.sflag [#allocation15], %s4179_s29  ;;  %s3300_s1 = sshll.u32 %s4014_s13, 4 }
  0xca   : > { %3540 = dma.hbm_to_vmem [thread:$0]  (!%p5162_p7), %s4376_s19, 64, %s4378_s12, %s5164_s27, %s4028_s11, %s4028_s11, %s4029_s9  }
  0xcb   : > { %s4407_s3 = scalar_lea.hbm %s5108_s6, %s3300_s1  ;;  %s495_s26 = scalar_lea.vmem [#allocation19], %s4164_s25 }
  0xcc   : > { %s503_s30 = sshll.u32 %s495_s26, 4  ;;  %s3828_s18 = scalar_lea.hbm %s4407_s3, 16  ;;  %s504_s30 = int_to_ptr.vmem [resolvable:$true] %s503_s30 }
  0xcd   : > { %p3829_p2 = scmp.ne.s32.totalorder %s4407_s3, %s3828_s18  ;;  %s3833_s19 = scalar_lea.hbm %s5108_s6, 32 }
  0xce   : > { %p3834_p9 = scmp.lt.u32.totalorder %s4407_s3, %s5108_s6  ;;  %p3835_p10 = scmp.lt.u32.totalorder %s3833_s19, %s3828_s18 }
  0xcf   : > { %p3831_p3 = pnand %p3829_p2, %p4197_p4  ;;  %p3837_p6 = scmp.lt.u32.totalorder %s3828_s18, %s4407_s3 }
  0xd0   : > { %p3836_p12 = por %p3835_p10, %p3834_p9 }
  0xd1   : > { %p3832_p8 = pneg %p3831_p3 }
  0xd2   : > { %p3838_p13 = por %p3837_p6, %p3836_p12 }
  0xd4   : > { %p3839_p1 = pnand %p3838_p13, %p3832_p8 }
  0xd6   : > { %3842 = shalt.err (!%p3839_p1)
}
  0xd7   : > { %s3843_s11 = scalar_lea.vmem %s504_s30, 16  ;;  %s4030_s9 = smov [#allocation19]  }
  0xd8   : > { %p3844_p11 = scmp.ne.s32.totalorder %s504_s30, %s3843_s11  ;;  %s3848_s27 = sshll.u32 %s4030_s9, 4  ;;  %s3849_s27 = int_to_ptr.vmem [resolvable:$false] %s3848_s27 }
  0xd9   : > { %s3850_s1 = scalar_lea.vmem %s3849_s27, 32  ;;  %p3851_p2 = scmp.lt.s32.totalorder %s504_s30, %s3849_s27 }
  0xda   : > { %p3846_p5 = pnand %p3844_p11, %p4197_p4  ;;  %p3852_p3 = scmp.lt.s32.totalorder %s3850_s1, %s3843_s11 }
  0xdc   : > { %p3847_p0 = pneg %p3846_p5  ;;  %p3853_p7 = por %p3852_p3, %p3851_p2 }
  0xde   : > { %p3854_p9 = pnand %p3853_p7, %p3847_p0 }
  0xe0   : > { %3857 = shalt.err (!%p3854_p9)
}
  0xe1   : > { %p5165_p10 = scmp.ne.s32.totalorder %s5151_s28, 0  ;;  %s5166_s14 = scalar_lea.sflag [#allocation18], %s4179_s29 }
  0xe2   : > { %s3301_s20 = sshll.u32 %s4164_s25, 5  ;;  %s3374_s26 = sshll.u32 %s4014_s13, 9 }
  0xe3   : > { %3546 = dma.hbm_to_vmem [thread:$0]  (!%p5165_p10), %s4407_s3, 16, %s504_s30, %s5166_s14  }
  0xe4   : > { %s4434_s12 = scalar_lea.hbm %s5109_s7, %s3374_s26  ;;  %s514_s19 = scalar_lea.vmem [#allocation20], %s3301_s20 }
  0xe5   : > { %s524_s5 = sshll.u32 %s514_s19, 4  ;;  %s511_s29 = scalar_lea.sflag [#allocation21], %s4164_s25  ;;  %s4436_s5 = int_to_ptr.vmem [resolvable:$true] %s524_s5 }
  0xe6   : > { %s3858_s22 = scalar_lea.hbm %s4434_s12, 512  ;;  %s3863_s11 = scalar_lea.hbm %s5109_s7, 1024 }
  0xe7   : > { %p3859_p7 = scmp.ne.s32.totalorder %s4434_s12, %s3858_s22  ;;  %p3864_p6 = scmp.lt.u32.totalorder %s4434_s12, %s5109_s7 }
  0xe8   : > { %p3865_p13 = scmp.lt.u32.totalorder %s3863_s11, %s3858_s22  ;;  %p3867_p11 = scmp.lt.u32.totalorder %s3858_s22, %s4434_s12 }
  0xe9   : > { %p3861_p8 = pnand %p3859_p7, %p4197_p4 }
  0xea   : > { %p3866_p1 = por %p3865_p13, %p3864_p6 }
  0xeb   : > { %p3862_p12 = pneg %p3861_p8 }
  0xec   : > { %p3868_p5 = por %p3867_p11, %p3866_p1 }
  0xee   : > { %p3869_p0 = pnand %p3868_p5, %p3862_p12 }
  0xf0   : > { %3872 = shalt.err (!%p3869_p0)
}
  0xf1   : > { %s3873_s1 = scalar_lea.vmem %s4436_s5, 512  ;;  %s4031_s14 = smov [#allocation20]  }
  0xf2   : > { %p3874_p2 = scmp.ne.s32.totalorder %s4436_s5, %s3873_s1  ;;  %s3878_s20 = sshll.u32 %s4031_s14, 4  ;;  %s3879_s20 = int_to_ptr.vmem [resolvable:$false] %s3878_s20 }
  0xf3   : > { %s3880_s26 = scalar_lea.vmem %s3879_s20, 1024  ;;  %p3881_p7 = scmp.lt.s32.totalorder %s4436_s5, %s3879_s20 }
  0xf4   : > { %p3876_p3 = pnand %p3874_p2, %p4197_p4  ;;  %p3882_p8 = scmp.lt.s32.totalorder %s3880_s26, %s3873_s1 }
  0xf6   : > { %p3877_p9 = pneg %p3876_p3  ;;  %p3883_p6 = por %p3882_p8, %p3881_p7 }
  0xf8   : > { %p3884_p13 = pnand %p3883_p6, %p3877_p9 }
  0xfa   : > { %3887 = shalt.err (!%p3884_p13)
}
  0xfb   : > { %3549 = dma.hbm_to_vmem [thread:$0]  (!%p5165_p10), %s4434_s12, 512, %s4436_s5, %s511_s29, %s5160_s16, %s5160_s16, %s5159_s23  }
  0xfc   : > { %p5167_p4 = scmp.ne.s32.totalorder %s5157_s17, 0 }
  0xfd   : > { %s4468_s24 = sand.u32 (!%p5167_p4), 1, %s4002_s10   ;;  %p5168_p12 = scmp.ne.s32.totalorder (!%p5167_p4), %s5145_s21, 0 }
  0xfe   : > { %536 = sbr.rel (%p5167_p4) target bundleno = 1259 (0x4eb), region = 52  ;;  %s4471_s18 = sshll.u32 (!%p5167_p4), %s4468_s24, 4 }
  0xff   : > { %s539_s28 = scalar_lea.sflag (!%p5167_p4), [#allocation9], %s4468_s24  ;;  %s4475_s8 = scalar_lea.vmem (!%p5167_p4), [#allocation8], %s4471_s18 }
 0x105   : > { %3969 = dma.done.wait (%p5168_p12), %s539_s28, 256  }
 0x106   : > { %3971 = vsyncadd (%p5168_p12), %s539_s28, 4294967040  ;;  %s547_s25 = sand.u32 1, %s4126_s15   ;;  %s4483_s23 = scalar_lea.vmem [#allocation11], %s4471_s18 }
 0x107   : > { %s548_s17 = scalar_lea.sflag [#allocation12], %s547_s25 }
 0x108   : > { %3973 = dma.done.wait (%p5168_p12), %s548_s17, 512  }
 0x109   : > { %3975 = vsyncadd (%p5168_p12), %s548_s17, 4294966784  ;;  %s4490_s16 = scalar_lea.vmem [#allocation13], %s4471_s18  ;;  %s566_s12 = scalar_lea.sflag [#allocation15], %s547_s25 }
 0x10a   : > { %s569_s19 = scalar_lea.vmem [#allocation14], %s4471_s18 }
 0x10b   : > { %3977 = dma.done.wait (%p5168_p12), %s566_s12, 320  }
 0x10c   : > { %3979 = vsyncadd (%p5168_p12), %s566_s12, 4294966976  ;;  %s3309_s15 = sshll.u32 %s4468_s24, 2  ;;  %s3310_s5 = sshll.u32 %s4468_s24, 3 }
 0x10d   : > { %s4499_s29 = scalar_lea.vmem [#allocation16], %s3309_s15  ;;  %s584_s22 = scalar_lea.sflag [#allocation18], %s547_s25 }
 0x10e   : > { %s587_s3 = scalar_lea.vmem [#allocation17], %s3310_s5 }
 0x10f   : > { %3981 = dma.done.wait (%p5168_p12), %s584_s22, 144  }
 0x110   : > { %3983 = vsyncadd (%p5168_p12), %s584_s22, 4294967152  ;;  %s3311_s30 = sshll.u32 %s4468_s24, 5  ;;  %s595_s11 = scalar_lea.vmem [#allocation19], %s4468_s24 }
 0x111   : > { %s601_s9 = scalar_lea.sflag [#allocation21], %s4468_s24  ;;  %s4510_s27 = scalar_lea.vmem [#allocation20], %s3311_s30 }
 0x112   : > { %3985 = dma.done.wait (%p5168_p12), %s601_s9, 512  }
 0x113   : > { %3987 = vsyncadd (%p5168_p12), %s601_s9, 4294966784  ;;  %v4032_v0 = vmov 0.0   ;;  %vm4033_vm0 = vmmov 0   ;;  %v4034_v1 = vmov 0   ;;  %vm740_vm1 = vcmask 228352   ;;  %v716_v6 = vld [vmem:[%s587_s3] sm:$0xff] }
 0x114   : > { %3409 = vmatprep.subr.bf16.mxu0 %v4032_v0  ;;  %3415 = vmatprep.subr.bf16.mxu1 %v4032_v0  ;;  %v736_v2 = vld [vmem:[%s4483_s23] sm:$0xf]  ;;  %v737_v3 = vld [vmem:[%s4483_s23 + $0x4] sm:$0xf]  ;;  %v738_v7 = vld [vmem:[%s4483_s23 + $0x8] sm:$0xf] }
 0x115   : > { %3411 = vmatprep.mubr.msk.bf16.mxu0 %vm4033_vm0, %v4032_v0  ;;  %3417 = vmatprep.mubr.msk.bf16.mxu1 %vm4033_vm0, %v4032_v0  ;;  %v745_v4 = vsel %vm740_vm1, %v736_v2, 0  ;;  %v791_v5 = vsel %vm740_vm1, %v737_v3, 0  ;;  %v739_v8 = vld [vmem:[%s4483_s23 + $0xc] sm:$0xf]  ;;  %v732_v9 = vld [vmem:[%s4475_s8] sm:$0xf] }
 0x116   : > { %3622 = vset.pattern.permute.xlu0 %v4034_v1  ;;  %3623 = vset.pattern.permute.xlu1 %v4034_v1  ;;  %v733_v10 = vld [vmem:[%s4475_s8 + $0x4] sm:$0xf]  ;;  %v837_v11 = vsel %vm740_vm1, %v738_v7, 0  ;;  %v883_v12 = vsel %vm740_vm1, %v739_v8, 0  ;;  %v734_v13 = vld [vmem:[%s4475_s8 + $0x8] sm:$0xf] }
 0x117   : > { %3410 = vmatpush3.bf16.xpose.msra.mxu0 %v745_v4  ;;  %3416 = vmatpush3.bf16.xpose.msra.mxu1 %v791_v5  ;;  %v735_v14 = vld [vmem:[%s4475_s8 + $0xc] sm:$0xf]  ;;  %vm685_vm2 = vcmask 7168   ;;  %v4035_v15 = vmov -inf   ;;  %v3314_v16 = vld [vmem:[%s595_s11] ss:$0 sm:$0xff] }
 0x118   : > { %3421 = vmatprep.subr.bf16.mxu0 %v4032_v0  ;;  %3427 = vmatprep.subr.bf16.mxu1 %v4032_v0  ;;  %686 = vst.msk [vmem:[#allocation2] sm:$0xff] %vm685_vm2, %v4035_v15  ;;  %687 = vst.msk [vmem:[#allocation2 + $0x8] sm:$0xff] %vm685_vm2, %v4035_v15  ;;  %v925_v19 = vld [vmem:[%s569_s19] sm:$0xff]   ;;  %v3335_v34 = vld [vmem:[%s569_s19 + $0x8] sm:$0xff]   ;;  %vm938_vm3 = vcmask 64512   ;;  %vm975_vm4 = vcmask 1043456  }
 0x119   : > { %720 = vperm.xlu0 %3622, %v716_v6   ;;  %688 = vst.msk [vmem:[#allocation2 + $0x10] sm:$0xff] %vm685_vm2, %v4035_v15  ;;  %689 = vst.msk [vmem:[#allocation2 + $0x18] sm:$0xff] %vm685_vm2, %v4035_v15  ;;  %v926_v21 = vunpack.c.l.bf16 %v925_v19  ;;  %v1222_v22 = vunpack.c.h.bf16 %v925_v19  ;;  %v3320_v24 = vld [vmem:[%s4499_s29] ss:$0 sm:$0xff]  ;;  %v3328_v26 = vld [vmem:[%s4499_s29 + $0x1] ss:$0 sm:$0xff]  ;;  %v1517_v39 = vunpack.c.l.bf16 %v3335_v34  ;;  %v1813_v40 = vunpack.c.h.bf16 %v3335_v34 }
 0x11a   : > { %690 = vst.msk [vmem:[#allocation3] sm:$0xff] %vm685_vm2, %v4032_v0  ;;  %691 = vst.msk [vmem:[#allocation3 + $0x8] sm:$0xff] %vm685_vm2, %v4032_v0  ;;  %v3337_v46 = vld [vmem:[%s4499_s29 + $0x2] ss:$0 sm:$0xff]  ;;  %v3346_v48 = vld [vmem:[%s4499_s29 + $0x3] ss:$0 sm:$0xff] }
 0x11b   : > { %692 = vst.msk [vmem:[#allocation3 + $0x10] sm:$0xff] %vm685_vm2, %v4032_v0  ;;  %693 = vst.msk [vmem:[#allocation3 + $0x18] sm:$0xff] %vm685_vm2, %v4032_v0  ;;  %vm1211_vm5 = vcmask 0   ;;  %v3329_v34 = vld [vmem:[%s4490_s16 + $0x4] sm:$0xf]  ;;  %vm1127_vm6 = vcmask 57344  }
 0x11c   : > { %vm1128_vm7 = vsmask.f32 256  ;;  %vm1424_vm8 = vsmask.f32 7938  ;;  %vm1719_vm11 = vcmask 58369   ;;  %vm694_vm15 = vcmask 326656  }
 0x11d   : > { %vm4709_vm9 = vmand %vm1127_vm6, %vm1128_vm7  ;;  %vm1720_vm12 = vsmask.f32 1280  ;;  %vm2015_vm14 = vsmask.f32 7942  ;;  %696 = vst.msk [vmem:[#allocation4 + $0x8] sm:$0xff] %vm694_vm15, %v4032_v0  ;;  %s4038_s21 = smov 40  }
 0x11e   : > { %3412 = vmatmul.mubr.msk.bf16.vlgmr.msra.gmra.mrb[0].mxu0 %vm740_vm1, %v732_v9  ;;  %3418 = vmatmul.mubr.msk.bf16.vlgmr.msra.gmra.mrb[0].mxu1 %vm740_vm1, %v733_v10  ;;  %vm4747_vm10 = vmand %vm1127_vm6, %vm1424_vm8  ;;  %695 = vst.msk [vmem:[#allocation4] sm:$0xff] %vm694_vm15, %v4032_v0  ;;  %vm699_vm6 = vcmask 60416   ;;  %s4039_s1 = smov 80   ;;  %s4040_s14 = smov 120  }
 0x11f   : > { %3422 = vmatpush3.bf16.xpose.msra.mxu0 %v837_v11  ;;  %3428 = vmatpush3.bf16.xpose.msra.mxu1 %v883_v12  ;;  %v937_v63 = vld [vmem:[#allocation2] sm:$0xff]  ;;  %v1235_v1 = vld [vmem:[#allocation2 + $0x8] sm:$0xff]  ;;  %v4036_v11 = vmov 1966171168   ;;  %vm4793_vm13 = vmand %vm1719_vm11, %vm1720_vm12  ;;  %697 = vst.msk [vmem:[#allocation4 + $0x10] sm:$0xff] %vm694_vm15, %v4032_v0  ;;  %s4996_s20 = scalar_lea.vmem [#allocation23], %s3311_s30 }
 0x120   : > { %3423 = vmatprep.mubr.msk.bf16.mxu0 %vm4033_vm0, %v4032_v0  ;;  %3429 = vmatprep.mubr.msk.bf16.mxu1 %vm4033_vm0, %v4032_v0  ;;  %v1530_v10 = vld [vmem:[#allocation2 + $0x10] sm:$0xff]  ;;  %v1024_v12 = vunpack.c.l.s4 %v4036_v11  ;;  %698 = vst.msk [vmem:[#allocation4 + $0x18] sm:$0xff] %vm694_vm15, %v4032_v0  ;;  %s5177_s26 = sld [smem:[#allocation34_spill]]  ;;  %s670_s28 = scalar_lea.vmem [#allocation22], %s4471_s18 }
 0x121   : > { %3433 = vmatprep.subr.bf16.mxu0 %v4032_v0  ;;  %3439 = vmatprep.subr.bf16.mxu1 %v4032_v0  ;;  %700 = vst.msk [vmem:[#allocation7] sm:$0xf] %vm699_vm6, %v4032_v0  ;;  %701 = vst.msk [vmem:[#allocation7 + $0x4] sm:$0xf] %vm699_vm6, %v4032_v0  ;;  %s2976_s8 = sshll.u32 %s670_s28, 4  ;;  %s5178_s25 = sld [smem:[#allocation37_spill]]  ;;  %s5018_s8 = int_to_ptr.vmem [resolvable:$true] %s2976_s8 }
 0x122   : > { %702 = vst.msk [vmem:[#allocation7 + $0x8] sm:$0xf] %vm699_vm6, %v4032_v0  ;;  %703 = vst.msk [vmem:[#allocation7 + $0xc] sm:$0xf] %vm699_vm6, %v4032_v0  ;;  %s5179_s12 = sld [smem:[#allocation43_spill]]  ;;  %s2955_s18 = scalar_lea.sflag [#allocation10], %s4468_s24 }
 0x123   : > { %704 = vst.msk [vmem:[#allocation7 + $0x10] sm:$0xf] %vm699_vm6, %v4032_v0  ;;  %705 = vst.msk [vmem:[#allocation7 + $0x14] sm:$0xf] %vm699_vm6, %v4032_v0  ;;  %s3888_s5 = scalar_lea.vmem %s5018_s8, 256  ;;  %s4041_s29 = smov [#allocation22]  }
 0x124   : > { %706 = vst.msk [vmem:[#allocation7 + $0x18] sm:$0xf] %vm699_vm6, %v4032_v0  ;;  %707 = vst.msk [vmem:[#allocation7 + $0x1c] sm:$0xf] %vm699_vm6, %v4032_v0  ;;  %p3889_p10 = scmp.ne.s32.totalorder %s5018_s8, %s3888_s5  ;;  %s3892_s22 = sshll.u32 %s4041_s29, 4  ;;  %s3893_s22 = int_to_ptr.vmem [resolvable:$false] %s3892_s22 }
 0x125   : > { %s3894_s3 = scalar_lea.vmem %s3893_s22, 512  ;;  %p3895_p0 = scmp.lt.s32.totalorder %s5018_s8, %s3893_s22 }
 0x126   : > { %3424 = vmatmul.mubr.msk.bf16.vlgmr.msra.gmra.mrb[4].mxu0 %vm740_vm1, %v734_v13  ;;  %3430 = vmatmul.mubr.msk.bf16.vlgmr.msra.gmra.mrb[4].mxu1 %vm740_vm1, %v735_v14  ;;  %v1026_v13 = vlaneseq  ;;  %vm4835_vm1 = vmand %vm1719_vm11, %vm2015_vm14  ;;  %s3375_s17 = sshll.u32 %s5177_s26, 8  ;;  %p3896_p2 = scmp.lt.s32.totalorder %s3894_s3, %s3888_s5 }
 0x127   : > { %3435 = vmatprep.mubr.msk.bf16.mxu0 %vm4033_vm0, %v4032_v0  ;;  %3441 = vmatprep.mubr.msk.bf16.mxu1 %vm4033_vm0, %v4032_v0  ;;  %p5181_p1 = scmp.ne.s32.totalorder %s5178_s25, 0 }
 0x128   : > { %s5180_s19 = smov %s5179_s12  ;;  %s5016_s15 = scalar_lea.hbm %s5179_s12, %s3375_s17 }
 0x129   : > { %p3890_p11 = pnand %p3889_p10, %p5181_p1  ;;  %p3897_p3 = por %p3896_p2, %p3895_p0 }
 0x12b   : > { %p3891_p5 = pneg %p3890_p11 }
 0x12d   : > { %p3898_p9 = pnand %p3897_p3, %p3891_p5 }
 0x198   : > { %v721_v17 = vpop.permute.xlu0 %720 }
 0x199   : > { %v729_v18 = vmul.f32 %v3314_v16, %v721_v17  ;;  %v1826_v16 = vld [vmem:[#allocation2 + $0x18] sm:$0xff]  ;;  %v1025_v17 = vunpack.c.0.s8 %v1024_v12 }
 0x19b   : > { %v3315_v20 = vadd.f32 -1.0, %v729_v18  ;;  %v4590_v18 = vshrl.u32 %v1026_v13, 7 }
 0x19d   : > { %v731_v27 = vmul.f32 100000.0, %v3315_v20 }
 0x1f1   : > { %v781_v23 = vpop.f32.mrb[0].mxu0  ;;  %v827_v25 = vpop.f32.mrb[0].mxu1 }
 0x1f2   : > { %v927_v28 = vadd.f32 %v926_v21, %v781_v23  ;;  %v3413_v29 = vpop.f32.mrb[1].mxu0  ;;  %v1223_v30 = vadd.f32 %v1222_v22, %v827_v25  ;;  %v3419_v31 = vpop.f32.mrb[1].mxu1  ;;  %v4594_v23 = vsub.s32 %v1025_v17, %v4590_v18  ;;  %v971_v25 = vld [vmem:[%s4490_s16] sm:$0xf] }
 0x1f3   : > { %v784_v32 = vpop.f32.mrb[2].mxu0  ;;  %v830_v33 = vpop.f32.mrb[2].mxu1 }
 0x1f4   : > { %v935_v35 = vadd.f32 %v3320_v24, %v927_v28  ;;  %v1232_v36 = vadd.f32 %v3328_v26, %v1223_v30  ;;  %v3414_v37 = vpop.f32.mrb[3].mxu0  ;;  %v3420_v38 = vpop.f32.mrb[3].mxu1  ;;  %v977_v26 = vsel %vm975_vm4, %v971_v25, 0 }
 0x1f5   : > { %3434 = vmatpush3.bf16.msra.mxu0 %v977_v26  ;;  %v1275_v38 = vsel %vm975_vm4, %v3329_v34, 0 }
 0x1f6   : > { %v4570_v41 = vadd.f32 %v935_v35, %v731_v27  ;;  %v4572_v42 = vadd.f32 %v1232_v36, %v731_v27  ;;  %3445 = vmatprep.subr.bf16.mxu0 %v4032_v0  ;;  %3440 = vmatpush3.bf16.msra.mxu1 %v1275_v38 }
 0x1f7   : > { %3451 = vmatprep.subr.bf16.mxu1 %v4032_v0 }
 0x1f8   : > { %v939_v43 = vsel %vm938_vm3, %v4570_v41, -inf  ;;  %v1236_v44 = vsel %vm938_vm3, %v4572_v42, -inf }
 0x1f9   : > { %v873_v45 = vpop.f32.mrb[4].mxu0  ;;  %v919_v47 = vpop.f32.mrb[4].mxu1  ;;  %940 = vmax.xlane.f32.xlu0 %v939_v43  ;;  %1237 = vmax.xlane.f32.xlu1 %v1236_v44 }
 0x1fa   : > { %v1518_v49 = vadd.f32 %v1517_v39, %v873_v45  ;;  %v1814_v50 = vadd.f32 %v1813_v40, %v919_v47  ;;  %v3425_v51 = vpop.f32.mrb[5].mxu0  ;;  %v3431_v52 = vpop.f32.mrb[5].mxu1 }
 0x1fb   : > { %v876_v53 = vpop.f32.mrb[6].mxu0  ;;  %v922_v54 = vpop.f32.mrb[6].mxu1 }
 0x1fc   : > { %v1527_v55 = vadd.f32 %v3337_v46, %v1518_v49  ;;  %v1823_v56 = vadd.f32 %v3346_v48, %v1814_v50  ;;  %v3426_v57 = vpop.f32.mrb[7].mxu0  ;;  %v3432_v58 = vpop.f32.mrb[7].mxu1 }
 0x1fe   : > { %v4580_v59 = vadd.f32 %v1527_v55, %v731_v27  ;;  %v4584_v61 = vadd.f32 %v1823_v56, %v731_v27 }
 0x200   : > { %v1531_v60 = vsel %vm938_vm3, %v4580_v59, -inf  ;;  %v1827_v62 = vsel %vm938_vm3, %v4584_v61, -inf }
 0x201   : > { %1532 = vmax.xlane.f32.xlu1 %v1531_v60 }
 0x205   : > { %1828 = vmax.xlane.f32.xlu1 %v1827_v62 }
 0x286   : > { %v941_v2 = vpop.xlane.xlu0 %940  ;;  %v1238_v3 = vpop.xlane.xlu1 %1237 }
 0x287   : > { %v942_v4 = vmax.f32 %v937_v63, %v941_v2  ;;  %v1239_v5 = vmax.f32 %v1235_v1, %v1238_v3 }
 0x289   : > { %v943_v6 = vsub.f32 %v937_v63, %v942_v4  ;;  %962 = vst.msk [vmem:[#allocation2] sm:$0xff] %vm685_vm2, %v942_v4  ;;  %948 = vperm.xlu1 %3623, %v942_v4   ;;  %v1240_v7 = vsub.f32 %v1235_v1, %v1239_v5  ;;  %1259 = vst.msk [vmem:[#allocation2 + $0x8] sm:$0xff] %vm685_vm2, %v1239_v5 }
 0x28b   : > { %v944_v8 = vmul.f32 1.442695, %v943_v6  ;;  %v1241_v9 = vmul.f32 1.442695, %v1240_v7 }
 0x28d   : > { %3624 = vpow2.f32 %v944_v8  ;;  %1245 = vperm.xlu1 %3623, %v1239_v5  }
 0x28e   : > { %3626 = vpow2.f32 %v1241_v9  ;;  %v1533_v14 = vpop.xlane.xlu1 %1532 }
 0x28f   : > { %v1534_v15 = vmax.f32 %v1530_v10, %v1533_v14 }
 0x291   : > { %v1535_v19 = vsub.f32 %v1530_v10, %v1534_v15  ;;  %1554 = vst.msk [vmem:[#allocation2 + $0x10] sm:$0xff] %vm685_vm2, %v1534_v15  ;;  %1540 = vperm.xlu1 %3623, %v1534_v15  }
 0x292   : > { %v1829_v20 = vpop.xlane.xlu1 %1828 }
 0x293   : > { %v1536_v21 = vmul.f32 1.442695, %v1535_v19  ;;  %v1830_v22 = vmax.f32 %v1826_v16, %v1829_v20 }
 0x295   : > { %3628 = vpow2.f32 %v1536_v21  ;;  %v1831_v24 = vsub.f32 %v1826_v16, %v1830_v22  ;;  %1850 = vst.msk [vmem:[#allocation2 + $0x18] sm:$0xff] %vm685_vm2, %v1830_v22  ;;  %1836 = vperm.xlu0 %3622, %v1830_v22  }
 0x297   : > { %v4599_v27 = vpop.eup %3624  ;;  %v1832_v28 = vmul.f32 1.442695, %v1831_v24 }
 0x298   : > { %v4601_v29 = vpop.eup %3626  ;;  %v1161_v30 = vrot.slane %v4599_v27, %v4594_v23  ;;  %v1154_v31 = vcombine.high %v4599_v27, %v4599_v27 }
 0x299   : > { %3630 = vpow2.f32 %v1832_v28  ;;  %v1457_v32 = vrot.slane %v4601_v29, %v4594_v23  ;;  %v1450_v33 = vcombine.high %v4601_v29, %v4601_v29 }
 0x29a   : > { %v1177_v35 = vrot.slane %v1161_v30, %v4594_v23  ;;  %v1169_v36 = vcombine.high %v1161_v30, %v1161_v30  ;;  %v1168_v37 = vrot.slane %v1154_v31, %v4594_v23 }
 0x29b   : > { %v1473_v39 = vrot.slane %v1457_v32, %v4594_v23  ;;  %v1465_v40 = vcombine.high %v1457_v32, %v1457_v32  ;;  %v1464_v46 = vrot.slane %v1450_v33, %v4594_v23 }
 0x29c   : > { %1212 = vst.msk [vmem:[#allocation6] sm:$0x1] %vm1211_vm5, %v1177_v35  ;;  %v1199_v43 = vcombine.high %v1177_v35, %v1177_v35  ;;  %v1191_v44 = vrot.slane %v1169_v36, %v4594_v23  ;;  %v1184_v45 = vrot.slane %v1168_v37, %v4594_v23  ;;  %v1170_v49 = vcombine.high %v1168_v37, %v1168_v37 }
 0x29d   : > { %1507 = vst.msk [vmem:[#allocation6 + $0x1] sm:$0x1] %vm1211_vm5, %v1473_v39  ;;  %v1495_v47 = vcombine.high %v1473_v39, %v1473_v39  ;;  %v1487_v48 = vrot.slane %v1465_v40, %v4594_v23  ;;  %v1480_v51 = vrot.slane %v1464_v46, %v4594_v23  ;;  %v1466_v52 = vcombine.high %v1464_v46, %v1464_v46 }
 0x29e   : > { %1214 = vst.msk [vmem:[#allocation6 + $0x8] sm:$0x1] %vm1211_vm5, %v1199_v43  ;;  %v1201_v50 = vcombine.high %v1191_v44, %v1191_v44  ;;  %1213 = vst.msk [vmem:[#allocation6 + $0x4] sm:$0x1] %vm1211_vm5, %v1191_v44  ;;  %v1200_v53 = vcombine.high %v1184_v45, %v1184_v45  ;;  %v1198_v56 = vrot.slane %v1170_v49, %v4594_v23  ;;  %v4037_v43 = vmov 857870592  }
 0x29f   : > { %1216 = vst.msk [vmem:[#allocation6 + $0x10] sm:$0x1] %vm1211_vm5, %v1184_v45  ;;  %v4628_v54 = vpop.eup %3628  ;;  %1509 = vst.msk [vmem:[#allocation6 + $0x9] sm:$0x1] %vm1211_vm5, %v1495_v47  ;;  %v1497_v55 = vcombine.high %v1487_v48, %v1487_v48  ;;  %v1494_v60 = vrot.slane %v1466_v52, %v4594_v23  ;;  %v1496_v62 = vcombine.high %v1480_v51, %v1480_v51  ;;  %v1064_v44 = vunpack.c.l.s4 %v4037_v43  ;;  %v3338_v45 = vld [vmem:[%s4490_s16 + $0x8] sm:$0xf] }
 0x2a0   : > { %1508 = vst.msk [vmem:[#allocation6 + $0x5] sm:$0x1] %vm1211_vm5, %v1487_v48  ;;  %v1753_v57 = vrot.slane %v4628_v54, %v4594_v23  ;;  %1215 = vst.msk [vmem:[#allocation6 + $0xc] sm:$0x1] %vm1211_vm5, %v1201_v50  ;;  %v1746_v58 = vcombine.high %v4628_v54, %v4628_v54  ;;  %v1202_v63 = vcombine.high %v1198_v56, %v1198_v56  ;;  %v3347_v50 = vld [vmem:[%s4490_s16 + $0xc] sm:$0xf] }
 0x2a1   : > { %1511 = vst.msk [vmem:[#allocation6 + $0x11] sm:$0x1] %vm1211_vm5, %v1480_v51  ;;  %1218 = vst.msk [vmem:[#allocation6 + $0x18] sm:$0x1] %vm1211_vm5, %v1200_v53  ;;  %v1498_v4 = vcombine.high %v1494_v60, %v1494_v60  ;;  %v1065_v51 = vunpack.c.0.s8 %v1064_v44  ;;  %v1866_v52 = vsel %vm975_vm4, %v3347_v50, 0 }
 0x2a2   : > { %1510 = vst.msk [vmem:[#allocation6 + $0xd] sm:$0x1] %vm1211_vm5, %v1497_v55  ;;  %1217 = vst.msk [vmem:[#allocation6 + $0x14] sm:$0x1] %vm1211_vm5, %v1198_v56  ;;  %v1769_v1 = vrot.slane %v1753_v57, %v4594_v23  ;;  %v1761_v2 = vcombine.high %v1753_v57, %v1753_v57  ;;  %v1760_v3 = vrot.slane %v1746_v58, %v4594_v23  ;;  %v708_v58 = vld [vmem:[%s4510_s27] sm:$0xf] }
 0x2a3   : > { %1512 = vst.msk [vmem:[#allocation6 + $0x15] sm:$0x1] %vm1211_vm5, %v1494_v60  ;;  %1513 = vst.msk [vmem:[#allocation6 + $0x19] sm:$0x1] %vm1211_vm5, %v1496_v62  ;;  %v4647_v5 = vpop.eup %3630  ;;  %v4697_v60 = vsub.s32 %v1065_v51, %v4590_v18  ;;  %v4705_v18 = vsel %vm975_vm4, %v708_v58, 0 }
 0x2a4   : > { %1219 = vst.msk [vmem:[#allocation6 + $0x1c] sm:$0x1] %vm1211_vm5, %v1202_v63  ;;  %1803 = vst.msk [vmem:[#allocation6 + $0x2] sm:$0x1] %vm1211_vm5, %v1769_v1  ;;  %v2048_v6 = vrot.slane %v4647_v5, %v4594_v23  ;;  %v1791_v7 = vcombine.high %v1769_v1, %v1769_v1  ;;  %v1783_v8 = vrot.slane %v1761_v2, %v4594_v23  ;;  %v1151_v44 = vld [vmem:[#allocation5 + $0xe] sm:$0x1] }
 0x2a5   : > { %v1776_v9 = vrot.slane %v1760_v3, %v4594_v23  ;;  %1514 = vst.msk [vmem:[#allocation6 + $0x1d] sm:$0x1] %vm1211_vm5, %v1498_v4  ;;  %v2041_v10 = vcombine.high %v4647_v5, %v4647_v5  ;;  %v1762_v11 = vcombine.high %v1760_v3, %v1760_v3 }
 0x2a6   : > { %v2064_v12 = vrot.slane %v2048_v6, %v4594_v23  ;;  %1805 = vst.msk [vmem:[#allocation6 + $0xa] sm:$0x1] %vm1211_vm5, %v1791_v7  ;;  %v1793_v13 = vcombine.high %v1783_v8, %v1783_v8  ;;  %v2056_v14 = vcombine.high %v2048_v6, %v2048_v6  ;;  %1804 = vst.msk [vmem:[#allocation6 + $0x6] sm:$0x1] %vm1211_vm5, %v1783_v8 }
 0x2a7   : > { %1807 = vst.msk [vmem:[#allocation6 + $0x12] sm:$0x1] %vm1211_vm5, %v1776_v9  ;;  %v1792_v15 = vcombine.high %v1776_v9, %v1776_v9  ;;  %v2055_v16 = vrot.slane %v2041_v10, %v4594_v23  ;;  %v1790_v17 = vrot.slane %v1762_v11, %v4594_v23  ;;  %v1130_v10 = vld [vmem:[#allocation5] sm:$0x1] }
 0x2a8   : > { %2098 = vst.msk [vmem:[#allocation6 + $0x3] sm:$0x1] %vm1211_vm5, %v2064_v12  ;;  %v2086_v19 = vcombine.high %v2064_v12, %v2064_v12  ;;  %1806 = vst.msk [vmem:[#allocation6 + $0xe] sm:$0x1] %vm1211_vm5, %v1793_v13  ;;  %v2078_v20 = vrot.slane %v2056_v14, %v4594_v23 }
 0x2a9   : > { %1809 = vst.msk [vmem:[#allocation6 + $0x1a] sm:$0x1] %vm1211_vm5, %v1792_v15  ;;  %v2071_v21 = vrot.slane %v2055_v16, %v4594_v23  ;;  %v1794_v22 = vcombine.high %v1790_v17, %v1790_v17  ;;  %v2057_v24 = vcombine.high %v2055_v16, %v2055_v16  ;;  %1808 = vst.msk [vmem:[#allocation6 + $0x16] sm:$0x1] %vm1211_vm5, %v1790_v17 }
 0x2aa   : > { %2100 = vst.msk [vmem:[#allocation6 + $0xb] sm:$0x1] %vm1211_vm5, %v2086_v19  ;;  %v2088_v25 = vcombine.high %v2078_v20, %v2078_v20  ;;  %2099 = vst.msk [vmem:[#allocation6 + $0x7] sm:$0x1] %vm1211_vm5, %v2078_v20  ;;  %v1133_v20 = vld [vmem:[#allocation5 + $0x2] sm:$0x1] }
 0x2ab   : > { %2102 = vst.msk [vmem:[#allocation6 + $0x13] sm:$0x1] %vm1211_vm5, %v2071_v21  ;;  %1810 = vst.msk [vmem:[#allocation6 + $0x1e] sm:$0x1] %vm1211_vm5, %v1794_v22  ;;  %v2085_v26 = vrot.slane %v2057_v24, %v4594_v23  ;;  %v2087_v28 = vcombine.high %v2071_v21, %v2071_v21  ;;  %v1136_v21 = vld [vmem:[#allocation5 + $0x4] sm:$0x1] }
 0x2ac   : > { %2101 = vst.msk [vmem:[#allocation6 + $0xf] sm:$0x1] %vm1211_vm5, %v2088_v25  ;;  %v1142_v22 = vld [vmem:[#allocation5 + $0x8] sm:$0x1] }
 0x2ad   : > { %v2089_v30 = vcombine.high %v2085_v26, %v2085_v26  ;;  %2103 = vst.msk [vmem:[#allocation6 + $0x17] sm:$0x1] %vm1211_vm5, %v2085_v26  ;;  %2104 = vst.msk [vmem:[#allocation6 + $0x1b] sm:$0x1] %vm1211_vm5, %v2087_v28 }
 0x2af   : > { %2105 = vst.msk [vmem:[#allocation6 + $0x1f] sm:$0x1] %vm1211_vm5, %v2089_v30  ;;  %v1139_v30 = vld [vmem:[#allocation5 + $0x6] sm:$0x1] }
 0x308   : > { %v949_v31 = vpop.permute.xlu1 %948 }
 0x309   : > { %v951_v32 = vsub.f32 %v4570_v41, %v949_v31  ;;  %v1145_v31 = vld [vmem:[#allocation5 + $0xa] sm:$0x1] }
 0x30b   : > { %v952_v33 = vmul.f32 1.442695, %v951_v32  ;;  %v1148_v32 = vld [vmem:[#allocation5 + $0xc] sm:$0x1] }
 0x30c   : > { %v1246_v34 = vpop.permute.xlu1 %1245 }
 0x30d   : > { %3632 = vpow2.f32 %v952_v33  ;;  %v1248_v35 = vsub.f32 %v4572_v42, %v1246_v34  ;;  %v1570_v42 = vsel %vm975_vm4, %v3338_v45, 0 }
 0x30f   : > { %v1249_v36 = vmul.f32 1.442695, %v1248_v35 }
 0x310   : > { %v1541_v37 = vpop.permute.xlu1 %1540 }
 0x311   : > { %3634 = vpow2.f32 %v1249_v36  ;;  %v1543_v38 = vsub.f32 %v4580_v59, %v1541_v37 }
 0x313   : > { %v1544_v46 = vmul.f32 1.442695, %v1543_v38 }
 0x314   : > { %v1837_v39 = vpop.permute.xlu0 %1836 }
 0x315   : > { %v1839_v40 = vsub.f32 %v4584_v61, %v1837_v39  ;;  %3636 = vpow2.f32 %v1544_v46 }
 0x317   : > { %v3633_v47 = vpop.eup %3632  ;;  %v1840_v41 = vmul.f32 1.442695, %v1839_v40 }
 0x318   : > { %v956_v48 = vsel %vm938_vm3, %v3633_v47, 0.0  ;;  %v963_v49 = vpack.c.bf16 %v3633_v47, %v3633_v47 }
 0x319   : > { %957 = vadd.xlane.f32.xlu1 %v956_v48  ;;  %3638 = vpow2.f32 %v1840_v41 }
 0x31a   : > { %3436 = vmatmul.mubr.msk.bf16.vlgmr.msra.gmra.mrb[8].mxu0 %vm938_vm3, %v963_v49  ;;  %v1029_v59 = vrot.slane %v963_v49, %v4594_v23 }
 0x31b   : > { %v3635_v61 = vpop.eup %3634  ;;  %3446 = vmatpush3.bf16.msra.mxu0 %v1570_v42  ;;  %3447 = vmatprep.mubr.msk.bf16.mxu0 %vm4033_vm0, %v4032_v0 }
 0x31c   : > { %v1030_v53 = vcombine.high %v1029_v59, %v1029_v59  ;;  %v1037_v55 = vrot.slane %v1029_v59, %v4594_v23  ;;  %v1254_v56 = vsel %vm938_vm3, %v3635_v61, 0.0  ;;  %v1260_v57 = vpack.c.bf16 %v3635_v61, %v3635_v61  ;;  %3457 = vmatprep.subr.bf16.mxu0 %v4032_v0 }
 0x31d   : > { %1255 = vadd.xlane.f32.xlu0 %v1254_v56 }
 0x31e   : > { %v1044_v62 = vrot.slane %v1030_v53, %v4594_v23  ;;  %v1045_v63 = vcombine.high %v1037_v55, %v1037_v55  ;;  %v1048_v1 = vunpack.i.h.s16 %v1037_v55  ;;  %v3322_v2 = vpack.i.b16 %v1037_v55, %v1037_v55  ;;  %3442 = vmatmul.mubr.msk.bf16.vlgmr.msra.gmra.mrb[8].mxu1 %vm938_vm3, %v1260_v57 }
 0x31f   : > { %v1326_v3 = vrot.slane %v1260_v57, %v4594_v23  ;;  %3452 = vmatpush3.bf16.msra.mxu1 %v1866_v52  ;;  %3453 = vmatprep.mubr.msk.bf16.mxu1 %vm4033_vm0, %v4032_v0  ;;  %v3637_v33 = vpop.eup %3636 }
 0x320   : > { %v1046_v4 = vcombine.high %v1044_v62, %v1044_v62  ;;  %v1050_v6 = vunpack.i.h.s16 %v1044_v62  ;;  %v1052_v7 = vunpack.i.h.s16 %v1045_v63  ;;  %v1056_v8 = vpack.i.b16 %v1048_v1, %v1048_v1  ;;  %3463 = vmatprep.subr.bf16.mxu1 %v4032_v0 }
 0x321   : > { %v3323_v11 = vpack.i.b16 %v1044_v62, %v1044_v62  ;;  %v3324_v12 = vpack.i.b16 %v1045_v63, %v1045_v63  ;;  %v1069_v13 = vrot.slane %v3322_v2, %v4697_v60  ;;  %v1327_v14 = vcombine.high %v1326_v3, %v1326_v3  ;;  %v1725_v62 = vld [vmem:[#allocation5 + $0x2] sm:$0x2] }
 0x322   : > { %v1054_v15 = vunpack.i.h.s16 %v1046_v4  ;;  %v1058_v16 = vpack.i.b16 %v1050_v6, %v1050_v6  ;;  %v1060_v17 = vpack.i.b16 %v1052_v7, %v1052_v7  ;;  %v3325_v19 = vpack.i.b16 %v1046_v4, %v1046_v4 }
 0x323   : > { %v1076_v24 = vrot.slane %v1056_v8, %v4697_v60  ;;  %v1083_v25 = vrot.slane %v3323_v11, %v4697_v60  ;;  %v1097_v26 = vrot.slane %v3324_v12, %v4697_v60  ;;  %v1131_v28 = vsel %vm4709_vm9, %v1069_v13, %v1130_v10  ;;  %v4723_v38 = vpop.eup %3638 }
 0x324   : > { %v1062_v34 = vpack.i.b16 %v1054_v15, %v1054_v15  ;;  %v1090_v35 = vrot.slane %v1058_v16, %v4697_v60  ;;  %v1104_v36 = vrot.slane %v1060_v17, %v4697_v60  ;;  %v1111_v37 = vrot.slane %v3325_v19, %v4697_v60  ;;  %1132 = vst [vmem:[#allocation5] sm:$0x1] %v1131_v28 }
 0x325   : > { %v1134_v39 = vsel %vm4709_vm9, %v1076_v24, %v1133_v20  ;;  %v1137_v40 = vsel %vm4709_vm9, %v1083_v25, %v1136_v21  ;;  %v1143_v43 = vsel %vm4709_vm9, %v1097_v26, %v1142_v22  ;;  %v1334_v45 = vrot.slane %v1326_v3, %v4594_v23 }
 0x326   : > { %v1118_v46 = vrot.slane %v1062_v34, %v4697_v60  ;;  %1135 = vst [vmem:[#allocation5 + $0x2] sm:$0x1] %v1134_v39  ;;  %1138 = vst [vmem:[#allocation5 + $0x4] sm:$0x1] %v1137_v40  ;;  %v1140_v47 = vsel %vm4709_vm9, %v1090_v35, %v1139_v30  ;;  %v1146_v41 = vsel %vm4709_vm9, %v1104_v36, %v1145_v31  ;;  %v1549_v61 = vsel %vm938_vm3, %v3637_v33, 0.0 }
 0x327   : > { %1144 = vst [vmem:[#allocation5 + $0x8] sm:$0x1] %v1143_v43  ;;  %v1149_v48 = vsel %vm4709_vm9, %v1111_v37, %v1148_v32  ;;  %1141 = vst [vmem:[#allocation5 + $0x6] sm:$0x1] %v1140_v47  ;;  %v1341_v49 = vrot.slane %v1327_v14, %v4594_v23  ;;  %v1342_v42 = vcombine.high %v1334_v45, %v1334_v45  ;;  %v1345_v50 = vunpack.i.h.s16 %v1334_v45  ;;  %v709_v14 = vld [vmem:[%s4510_s27 + $0x4] sm:$0xf] }
 0x328   : > { %1147 = vst [vmem:[#allocation5 + $0xa] sm:$0x1] %v1146_v41  ;;  %1150 = vst [vmem:[#allocation5 + $0xc] sm:$0x1] %v1149_v48  ;;  %v3331_v51 = vpack.i.b16 %v1334_v45, %v1334_v45  ;;  %v1152_v59 = vsel %vm4709_vm9, %v1118_v46, %v1151_v44  ;;  %v1555_v52 = vpack.c.bf16 %v3637_v33, %v3637_v33  ;;  %v1845_v53 = vsel %vm938_vm3, %v4723_v38, 0.0 }
 0x329   : > { %1153 = vst [vmem:[#allocation5 + $0xe] sm:$0x1] %v1152_v59  ;;  %v1343_v55 = vcombine.high %v1341_v49, %v1341_v49  ;;  %v1347_v56 = vunpack.i.h.s16 %v1341_v49  ;;  %v1349_v57 = vunpack.i.h.s16 %v1342_v42  ;;  %v1353_v58 = vpack.i.b16 %v1345_v50, %v1345_v50  ;;  %1550 = vadd.xlane.f32.xlu1 %v1549_v61  ;;  %1846 = vadd.xlane.f32.xlu0 %v1845_v53  ;;  %v1728_v53 = vld [vmem:[#allocation5 + $0x4] sm:$0x2] }
 0x32a   : > { %v3332_v63 = vpack.i.b16 %v1341_v49, %v1341_v49  ;;  %v3333_v1 = vpack.i.b16 %v1342_v42, %v1342_v42  ;;  %v1366_v2 = vrot.slane %v3331_v51, %v4697_v60  ;;  %3448 = vmatmul.mubr.msk.bf16.vlgmr.msra.gmra.mrb[12].mxu0 %vm938_vm3, %v1555_v52  ;;  %v1621_v3 = vrot.slane %v1555_v52, %v4594_v23  ;;  %v1722_v52 = vld [vmem:[#allocation5] sm:$0x2] }
 0x32b   : > { %v1351_v4 = vunpack.i.h.s16 %v1343_v55  ;;  %v1355_v6 = vpack.i.b16 %v1347_v56, %v1347_v56  ;;  %v1357_v7 = vpack.i.b16 %v1349_v57, %v1349_v57  ;;  %v3334_v8 = vpack.i.b16 %v1343_v55, %v1343_v55  ;;  %v1426_v9 = vld [vmem:[#allocation5] sm:$0x1]  ;;  %3458 = vmatpush3.bf16.msra.mxu0 %v4705_v18  ;;  %3459 = vmatprep.mubr.msk.bf16.mxu0 %vm4033_vm0, %v4032_v0 }
 0x32c   : > { %v1373_v10 = vrot.slane %v1353_v58, %v4697_v60  ;;  %v1380_v11 = vrot.slane %v3332_v63, %v4697_v60  ;;  %v1394_v12 = vrot.slane %v3333_v1, %v4697_v60  ;;  %v1427_v13 = vsel %vm4747_vm10, %v1366_v2, %v1426_v9  ;;  %3469 = vmatprep.subr.bf16.mxu0 %v4032_v0  ;;  %v1731_v63 = vld [vmem:[#allocation5 + $0x6] sm:$0x2] }
 0x32d   : > { %v1359_v15 = vpack.i.b16 %v1351_v4, %v1351_v4  ;;  %v1387_v16 = vrot.slane %v1355_v6, %v4697_v60  ;;  %v1401_v18 = vrot.slane %v1357_v7, %v4697_v60  ;;  %v1408_v17 = vrot.slane %v3334_v8, %v4697_v60  ;;  %1428 = vst [vmem:[#allocation5] sm:$0x1] %v1427_v13  ;;  %v1429_v19 = vld [vmem:[#allocation5 + $0x2] sm:$0x1]  ;;  %v1432_v20 = vld [vmem:[#allocation5 + $0x4] sm:$0x1] }
 0x32e   : > { %v1438_v21 = vld [vmem:[#allocation5 + $0x8] sm:$0x1]  ;;  %v1430_v22 = vsel %vm4747_vm10, %v1373_v10, %v1429_v19  ;;  %v1433_v24 = vsel %vm4747_vm10, %v1380_v11, %v1432_v20  ;;  %v1435_v25 = vld [vmem:[#allocation5 + $0x6] sm:$0x1]  ;;  %v1622_v31 = vcombine.high %v1621_v3, %v1621_v3  ;;  %v1629_v37 = vrot.slane %v1621_v3, %v4594_v23  ;;  %v1734_v6 = vld [vmem:[#allocation5 + $0x8] sm:$0x2] }
 0x32f   : > { %v1439_v26 = vsel %vm4747_vm10, %v1394_v12, %v1438_v21  ;;  %v1441_v28 = vld [vmem:[#allocation5 + $0xa] sm:$0x1]  ;;  %v1444_v30 = vld [vmem:[#allocation5 + $0xc] sm:$0x1]  ;;  %v1415_v32 = vrot.slane %v1359_v15, %v4697_v60  ;;  %1431 = vst [vmem:[#allocation5 + $0x2] sm:$0x1] %v1430_v22  ;;  %v1436_v33 = vsel %vm4747_vm10, %v1387_v16, %v1435_v25  ;;  %v1851_v40 = vpack.c.bf16 %v4723_v38, %v4723_v38 }
 0x330   : > { %1434 = vst [vmem:[#allocation5 + $0x4] sm:$0x1] %v1433_v24  ;;  %1440 = vst [vmem:[#allocation5 + $0x8] sm:$0x1] %v1439_v26  ;;  %v1442_v34 = vsel %vm4747_vm10, %v1401_v18, %v1441_v28  ;;  %v1445_v35 = vsel %vm4747_vm10, %v1408_v17, %v1444_v30  ;;  %v1447_v36 = vld [vmem:[#allocation5 + $0xe] sm:$0x1]  ;;  %v1636_v39 = vrot.slane %v1622_v31, %v4594_v23  ;;  %v1640_v47 = vunpack.i.h.s16 %v1629_v37 }
 0x331   : > { %1437 = vst [vmem:[#allocation5 + $0x6] sm:$0x1] %v1436_v33  ;;  %1443 = vst [vmem:[#allocation5 + $0xa] sm:$0x1] %v1442_v34  ;;  %v2164_v43 = vsel %vm975_vm4, %v709_v14, 0  ;;  %v1448_v44 = vsel %vm4747_vm10, %v1415_v32, %v1447_v36  ;;  %v1637_v45 = vcombine.high %v1629_v37, %v1629_v37  ;;  %3454 = vmatmul.mubr.msk.bf16.vlgmr.msra.gmra.mrb[12].mxu1 %vm938_vm3, %v1851_v40 }
 0x332   : > { %1446 = vst [vmem:[#allocation5 + $0xc] sm:$0x1] %v1445_v35  ;;  %1449 = vst [vmem:[#allocation5 + $0xe] sm:$0x1] %v1448_v44  ;;  %v1638_v46 = vcombine.high %v1636_v39, %v1636_v39  ;;  %v1642_v41 = vunpack.i.h.s16 %v1636_v39  ;;  %v3340_v48 = vpack.i.b16 %v1629_v37, %v1629_v37  ;;  %v3341_v49 = vpack.i.b16 %v1636_v39, %v1636_v39  ;;  %v1740_v7 = vld [vmem:[#allocation5 + $0xc] sm:$0x2] }
 0x333   : > { %v1917_v42 = vrot.slane %v1851_v40, %v4594_v23  ;;  %3464 = vmatpush3.bf16.msra.mxu1 %v2164_v43  ;;  %3465 = vmatprep.mubr.msk.bf16.mxu1 %vm4033_vm0, %v4032_v0  ;;  %v1644_v38 = vunpack.i.h.s16 %v1637_v45  ;;  %v1648_v51 = vpack.i.b16 %v1640_v47, %v1640_v47  ;;  %v3342_v55 = vpack.i.b16 %v1637_v45, %v1637_v45  ;;  %v1737_v12 = vld [vmem:[#allocation5 + $0xa] sm:$0x2]  ;;  %v1743_v13 = vld [vmem:[#allocation5 + $0xe] sm:$0x2] }
 0x334   : > { %v1646_v50 = vunpack.i.h.s16 %v1638_v46  ;;  %v1650_v59 = vpack.i.b16 %v1642_v41, %v1642_v41  ;;  %3475 = vmatprep.subr.bf16.mxu1 %v4032_v0  ;;  %v3343_v56 = vpack.i.b16 %v1638_v46, %v1638_v46  ;;  %v1661_v57 = vrot.slane %v3340_v48, %v4697_v60 }
 0x335   : > { %v1675_v58 = vrot.slane %v3341_v49, %v4697_v60  ;;  %v1652_v1 = vpack.i.b16 %v1644_v38, %v1644_v38  ;;  %v1668_v3 = vrot.slane %v1648_v51, %v4697_v60  ;;  %v1689_v8 = vrot.slane %v3342_v55, %v4697_v60 }
 0x336   : > { %v1654_v2 = vpack.i.b16 %v1646_v50, %v1646_v50  ;;  %v1682_v4 = vrot.slane %v1650_v59, %v4697_v60  ;;  %v1703_v9 = vrot.slane %v3343_v56, %v4697_v60  ;;  %v1723_v10 = vsel %vm4793_vm13, %v1661_v57, %v1722_v52  ;;  %v2482_v56 = vld [vmem:[#allocation6] sm:$0xf] }
 0x337   : > { %v1729_v11 = vsel %vm4793_vm13, %v1675_v58, %v1728_v53  ;;  %v1696_v14 = vrot.slane %v1652_v1, %v4697_v60  ;;  %1724 = vst [vmem:[#allocation5] sm:$0x2] %v1723_v10  ;;  %v1726_v16 = vsel %vm4793_vm13, %v1668_v3, %v1725_v62  ;;  %v1735_v17 = vsel %vm4793_vm13, %v1689_v8, %v1734_v6  ;;  %v2484_v8 = vld [vmem:[#allocation6 + $0x8] sm:$0xf]  ;;  %v2483_v10 = vld [vmem:[#allocation6 + $0x4] sm:$0xf] }
 0x338   : > { %v1710_v15 = vrot.slane %v1654_v2, %v4697_v60  ;;  %1730 = vst [vmem:[#allocation5 + $0x4] sm:$0x2] %v1729_v11  ;;  %v1732_v18 = vsel %vm4793_vm13, %v1682_v4, %v1731_v63  ;;  %1727 = vst [vmem:[#allocation5 + $0x2] sm:$0x2] %v1726_v16  ;;  %v1741_v19 = vsel %vm4793_vm13, %v1703_v9, %v1740_v7  ;;  %v711_v9 = vld [vmem:[%s4510_s27 + $0xc] sm:$0xf] }
 0x339   : > { %1733 = vst [vmem:[#allocation5 + $0x6] sm:$0x2] %v1732_v18  ;;  %v1918_v20 = vcombine.high %v1917_v42, %v1917_v42  ;;  %v1925_v21 = vrot.slane %v1917_v42, %v4594_v23  ;;  %1736 = vst [vmem:[#allocation5 + $0x8] sm:$0x2] %v1735_v17  ;;  %v1738_v22 = vsel %vm4793_vm13, %v1696_v14, %v1737_v12  ;;  %v2256_v14 = vsel %vm975_vm4, %v711_v9, 0 }
 0x33a   : > { %1742 = vst [vmem:[#allocation5 + $0xc] sm:$0x2] %v1741_v19  ;;  %v1744_v24 = vsel %vm4793_vm13, %v1710_v15, %v1743_v13  ;;  %1265 = vperm.xlu1 %3623, %v4601_v29   ;;  %1739 = vst [vmem:[#allocation5 + $0xa] sm:$0x2] %v1738_v22  ;;  %v2485_v13 = vld [vmem:[#allocation6 + $0xc] sm:$0xf] }
 0x33b   : > { %1745 = vst [vmem:[#allocation5 + $0xe] sm:$0x2] %v1744_v24  ;;  %v1932_v25 = vrot.slane %v1918_v20, %v4594_v23  ;;  %v1933_v26 = vcombine.high %v1925_v21, %v1925_v21  ;;  %v1936_v28 = vunpack.i.h.s16 %v1925_v21  ;;  %v3349_v30 = vpack.i.b16 %v1925_v21, %v1925_v21  ;;  %v2489_v16 = vld [vmem:[#allocation6 + $0x1c] sm:$0xf]  ;;  %v712_v18 = vld [vmem:[%s4510_s27 + $0x10] sm:$0xf] }
 0x33c   : > { %v2486_v17 = vld [vmem:[#allocation6 + $0x10] sm:$0xf]  ;;  %v2302_v20 = vsel %vm975_vm4, %v712_v18, 0  ;;  %v2487_v22 = vld [vmem:[#allocation6 + $0x14] sm:$0xf] }
 0x33d   : > { %v1934_v31 = vcombine.high %v1932_v25, %v1932_v25  ;;  %v1938_v32 = vunpack.i.h.s16 %v1932_v25  ;;  %v1940_v33 = vunpack.i.h.s16 %v1933_v26  ;;  %v1944_v34 = vpack.i.b16 %v1936_v28, %v1936_v28  ;;  %v713_v19 = vld [vmem:[%s4510_s27 + $0x14] sm:$0xf]  ;;  %v2488_v28 = vld [vmem:[#allocation6 + $0x18] sm:$0xf] }
 0x33e   : > { %v3350_v36 = vpack.i.b16 %v1932_v25, %v1932_v25  ;;  %v3351_v37 = vpack.i.b16 %v1933_v26, %v1933_v26  ;;  %v1957_v39 = vrot.slane %v3349_v30, %v4697_v60  ;;  %1856 = vperm.xlu1 %3623, %v4647_v5   ;;  %v2017_v46 = vld [vmem:[#allocation5] sm:$0x2]  ;;  %v2348_v24 = vsel %vm975_vm4, %v713_v19, 0  ;;  %v714_v26 = vld [vmem:[%s4510_s27 + $0x18] sm:$0xf] }
 0x33f   : > { %v1942_v40 = vunpack.i.h.s16 %v1934_v31  ;;  %v1946_v43 = vpack.i.b16 %v1938_v32, %v1938_v32  ;;  %v1948_v44 = vpack.i.b16 %v1940_v33, %v1940_v33  ;;  %v3352_v45 = vpack.i.b16 %v1934_v31, %v1934_v31  ;;  %v2023_v47 = vld [vmem:[#allocation5 + $0x4] sm:$0x2]  ;;  %967 = vperm.xlu0 %3622, %v4599_v27   ;;  %v2020_v38 = vld [vmem:[#allocation5 + $0x2] sm:$0x2]  ;;  %v715_v30 = vld [vmem:[%s4510_s27 + $0x1c] sm:$0xf] }
 0x340   : > { %v1964_v41 = vrot.slane %v1944_v34, %v4697_v60  ;;  %v1971_v48 = vrot.slane %v3350_v36, %v4697_v60  ;;  %v1985_v49 = vrot.slane %v3351_v37, %v4697_v60  ;;  %v2018_v42 = vsel %vm4835_vm1, %v1957_v39, %v2017_v46  ;;  %v2026_v50 = vld [vmem:[#allocation5 + $0x6] sm:$0x2]  ;;  %v2029_v53 = vld [vmem:[#allocation5 + $0x8] sm:$0x2] }
 0x341   : > { %v1950_v51 = vpack.i.b16 %v1942_v40, %v1942_v40  ;;  %v1978_v59 = vrot.slane %v1946_v43, %v4697_v60  ;;  %v1992_v61 = vrot.slane %v1948_v44, %v4697_v60  ;;  %v1999_v52 = vrot.slane %v3352_v45, %v4697_v60  ;;  %2019 = vst [vmem:[#allocation5] sm:$0x2] %v2018_v42  ;;  %v2035_v55 = vld [vmem:[#allocation5 + $0xc] sm:$0x2]  ;;  %v2032_v63 = vld [vmem:[#allocation5 + $0xa] sm:$0x2] }
 0x342   : > { %v2021_v57 = vsel %vm4835_vm1, %v1964_v41, %v2020_v38  ;;  %v2024_v58 = vsel %vm4835_vm1, %v1971_v48, %v2023_v47  ;;  %v2030_v62 = vsel %vm4835_vm1, %v1985_v49, %v2029_v53  ;;  %v2038_v1 = vld [vmem:[#allocation5 + $0xe] sm:$0x2]  ;;  %2500 = vperm.xlu1 %3623, %v2482_v56   ;;  %v2394_v31 = vsel %vm975_vm4, %v714_v26, 0  ;;  %v954_v37 = vld [vmem:[#allocation3] sm:$0xff]  ;;  %v1547_v41 = vld [vmem:[#allocation3 + $0x10] sm:$0xff] }
 0x343   : > { %v2006_v2 = vrot.slane %v1950_v51, %v4697_v60  ;;  %2022 = vst [vmem:[#allocation5 + $0x2] sm:$0x2] %v2021_v57  ;;  %2025 = vst [vmem:[#allocation5 + $0x4] sm:$0x2] %v2024_v58  ;;  %v2027_v3 = vsel %vm4835_vm1, %v1978_v59, %v2026_v50  ;;  %v2033_v4 = vsel %vm4835_vm1, %v1992_v61, %v2032_v63  ;;  %1560 = vperm.xlu0 %3622, %v4628_v54   ;;  %v710_v60 = vld [vmem:[%s4510_s27 + $0x8] sm:$0xf] }
 0x344   : > { %2031 = vst [vmem:[#allocation5 + $0x8] sm:$0x2] %v2030_v62  ;;  %v2036_v6 = vsel %vm4835_vm1, %v1999_v52, %v2035_v55  ;;  %2028 = vst [vmem:[#allocation5 + $0x6] sm:$0x2] %v2027_v3  ;;  %v2210_v11 = vsel %vm975_vm4, %v710_v60, 0  ;;  %v2440_v33 = vsel %vm975_vm4, %v715_v30, 0  ;;  %v955_v39 = vmul.f32 %v4599_v27, %v954_v37 }
 0x345   : > { %2034 = vst [vmem:[#allocation5 + $0xa] sm:$0x2] %v2033_v4  ;;  %2037 = vst [vmem:[#allocation5 + $0xc] sm:$0x2] %v2036_v6  ;;  %v2039_v7 = vsel %vm4835_vm1, %v2006_v2, %v2038_v1  ;;  %v1252_v43 = vld [vmem:[#allocation3 + $0x8] sm:$0xff]  ;;  %v1843_v48 = vld [vmem:[#allocation3 + $0x18] sm:$0xff]  ;;  %v1548_v42 = vmul.f32 %v4628_v54, %v1547_v41 }
 0x346   : > { %2040 = vst [vmem:[#allocation5 + $0xe] sm:$0x2] %v2039_v7  ;;  %2510 = vperm.xlu1 %3623, %v2484_v8   ;;  %v1253_v45 = vmul.f32 %v4601_v29, %v1252_v43  ;;  %v1844_v27 = vmul.f32 %v4647_v5, %v1843_v48 }
 0x347   : > { %2505 = vperm.xlu0 %3622, %v2483_v10  }
 0x348   : > { %v2106_v12 = vld [vmem:[#allocation5] sm:$0x3] }
 0x349   : > { %3460 = vmatmul.mubr.msk.bf16.vlgmr.msra.gmra.mrb[16].mxu0 %vm938_vm3, %v2106_v12 }
 0x34a   : > { %v2107_v15 = vld [vmem:[#allocation5 + $0x2] sm:$0x3]  ;;  %3470 = vmatpush3.bf16.msra.mxu0 %v2210_v11  ;;  %2515 = vperm.xlu1 %3623, %v2485_v13   ;;  %v2108_v21 = vld [vmem:[#allocation5 + $0x4] sm:$0x3] }
 0x34b   : > { %3466 = vmatmul.mubr.msk.bf16.vlgmr.msra.gmra.mrb[16].mxu1 %vm938_vm3, %v2107_v15  ;;  %3471 = vmatprep.mubr.msk.bf16.mxu0 %vm4033_vm0, %v4032_v0  ;;  %v2109_v25 = vld [vmem:[#allocation5 + $0x6] sm:$0x3]  ;;  %v2110_v32 = vld [vmem:[#allocation5 + $0x8] sm:$0x3] }
 0x34c   : > { %3476 = vmatpush3.bf16.msra.mxu1 %v2256_v14  ;;  %3477 = vmatprep.mubr.msk.bf16.mxu1 %vm4033_vm0, %v4032_v0  ;;  %v2111_v34 = vld [vmem:[#allocation5 + $0xa] sm:$0x3]  ;;  %v2112_v35 = vld [vmem:[#allocation5 + $0xc] sm:$0x3] }
 0x34d   : > { %2535 = vperm.xlu0 %3622, %v2489_v16   ;;  %3481 = vmatprep.subr.bf16.mxu0 %v4032_v0  ;;  %v2113_v36 = vld [vmem:[#allocation5 + $0xe] sm:$0x3] }
 0x34e   : > { %2520 = vperm.xlu1 %3623, %v2486_v17   ;;  %3487 = vmatprep.subr.bf16.mxu1 %v4032_v0 }
 0x351   : > { %3472 = vmatmul.mubr.msk.bf16.vlgmr.msra.gmra.mrb[20].mxu0 %vm938_vm3, %v2108_v21 }
 0x352   : > { %3482 = vmatpush3.bf16.msra.mxu0 %v2302_v20  ;;  %2525 = vperm.xlu1 %3623, %v2487_v22  }
 0x353   : > { %3478 = vmatmul.mubr.msk.bf16.vlgmr.msra.gmra.mrb[20].mxu1 %vm938_vm3, %v2109_v25  ;;  %3483 = vmatprep.mubr.msk.bf16.mxu0 %vm4033_vm0, %v4032_v0 }
 0x354   : > { %3488 = vmatpush3.bf16.msra.mxu1 %v2348_v24  ;;  %3489 = vmatprep.mubr.msk.bf16.mxu1 %vm4033_vm0, %v4032_v0 }
 0x355   : > { %3493 = vmatprep.subr.bf16.mxu0 %v4032_v0  ;;  %3499 = vmatprep.subr.bf16.mxu1 %v4032_v0 }
 0x356   : > { %2530 = vperm.xlu1 %3623, %v2488_v28  }
 0x359   : > { %3484 = vmatmul.mubr.msk.bf16.vlgmr.msra.gmra.mrb[24].mxu0 %vm938_vm3, %v2110_v32 }
 0x35a   : > { %3494 = vmatpush3.bf16.msra.mxu0 %v2394_v31  ;;  %3495 = vmatprep.mubr.msk.bf16.mxu0 %vm4033_vm0, %v4032_v0 }
 0x35b   : > { %3490 = vmatmul.mubr.msk.bf16.vlgmr.msra.gmra.mrb[24].mxu1 %vm938_vm3, %v2111_v34 }
 0x35c   : > { %3500 = vmatpush3.bf16.msra.mxu1 %v2440_v33  ;;  %3501 = vmatprep.mubr.msk.bf16.mxu1 %vm4033_vm0, %v4032_v0  ;;  %vm2875_vm0 = vcmask 654336  }
 0x361   : > { %3496 = vmatmul.mubr.msk.bf16.vlgmr.msra.gmra.mrb[28].mxu0 %vm938_vm3, %v2112_v35 }
 0x363   : > { %3502 = vmatmul.mubr.msk.bf16.vlgmr.msra.gmra.mrb[28].mxu1 %vm938_vm3, %v2113_v36  ;;  %vm2880_vm3 = vcmask 261120  }
 0x3a6   : > { %v958_v40 = vpop.xlane.xlu1 %957 }
 0x3a7   : > { %v959_v44 = vadd.f32 %v958_v40, %v955_v39 }
 0x3a9   : > { %961 = vst.msk [vmem:[#allocation3] sm:$0xff] %vm685_vm2, %v959_v44 }
 0x3aa   : > { %v1256_v46 = vpop.xlane.xlu0 %1255 }
 0x3ab   : > { %v1257_v47 = vadd.f32 %v1256_v46, %v1253_v45 }
 0x3ad   : > { %1258 = vst.msk [vmem:[#allocation3 + $0x8] sm:$0xff] %vm685_vm2, %v1257_v47 }
 0x3b0   : > { %v2566_v0 = vld [vmem:[#allocation3] sm:$0xff] }
 0x3b1   : > { %3640 = vrcp.f32 %v2566_v0 }
 0x3b4   : > { %v2640_v49 = vld [vmem:[#allocation3 + $0x8] sm:$0xff] }
 0x3b5   : > { %3642 = vrcp.f32 %v2640_v49 }
 0x3b6   : > { %v1551_v38 = vpop.xlane.xlu1 %1550  ;;  %v1847_v50 = vpop.xlane.xlu0 %1846 }
 0x3b7   : > { %v1552_v51 = vadd.f32 %v1551_v38, %v1548_v42  ;;  %v1848_v59 = vadd.f32 %v1847_v50, %v1844_v27 }
 0x3b9   : > { %1553 = vst.msk [vmem:[#allocation3 + $0x10] sm:$0xff] %vm685_vm2, %v1552_v51  ;;  %1849 = vst.msk [vmem:[#allocation3 + $0x18] sm:$0xff] %vm685_vm2, %v1848_v59  ;;  %vm2877_vm2 = vcmask 982016  }
 0x3bb   : > { %v3641_v29 = vpop.eup %3640 }
 0x3bc   : > { %2571 = vperm.xlu1 %3623, %v3641_v29   ;;  %v2575_v61 = vcombine.high %v3641_v29, %v3641_v29  ;;  %v2582_v52 = vrot.slane %v3641_v29, %v4594_v23  ;;  %v964_v29 = vld [vmem:[#allocation4] sm:$0xff] }
 0x3be   : > { %v2598_v53 = vrot.slane %v2582_v52, %v4594_v23  ;;  %v2590_v55 = vcombine.high %v2582_v52, %v2582_v52  ;;  %v2589_v54 = vrot.slane %v2575_v61, %v4594_v23  ;;  %v968_v61 = vpop.permute.xlu0 %967 }
 0x3bf   : > { %v3643_v5 = vpop.eup %3642  ;;  %v970_v52 = vmul.f32 %v968_v61, %v964_v29 }
 0x3c0   : > { %v2649_v56 = vcombine.high %v3643_v5, %v3643_v5  ;;  %2645 = vperm.xlu0 %3622, %v3643_v5   ;;  %v2714_v57 = vld [vmem:[#allocation3 + $0x10] sm:$0xff]  ;;  %v2788_v58 = vld [vmem:[#allocation3 + $0x18] sm:$0xff]  ;;  %2632 = vst.msk [vmem:[#allocation6] sm:$0x1] %vm1211_vm5, %v2598_v53  ;;  %v2656_v62 = vrot.slane %v3643_v5, %v4594_v23  ;;  %v2612_v63 = vrot.slane %v2590_v55, %v4594_v23  ;;  %v1266_v55 = vpop.permute.xlu1 %1265 }
 0x3c1   : > { %v2620_v1 = vcombine.high %v2598_v53, %v2598_v53  ;;  %3644 = vrcp.f32 %v2714_v57  ;;  %v2605_v2 = vrot.slane %v2589_v54, %v4594_v23  ;;  %v2591_v3 = vcombine.high %v2589_v54, %v2589_v54  ;;  %v1262_v53 = vld [vmem:[#allocation4 + $0x8] sm:$0xff] }
 0x3c2   : > { %3646 = vrcp.f32 %v2788_v58  ;;  %v2672_v4 = vrot.slane %v2656_v62, %v4594_v23  ;;  %2633 = vst.msk [vmem:[#allocation6 + $0x4] sm:$0x1] %vm1211_vm5, %v2612_v63  ;;  %v2664_v6 = vcombine.high %v2656_v62, %v2656_v62  ;;  %v2622_v60 = vcombine.high %v2612_v63, %v2612_v63 }
 0x3c3   : > { %2634 = vst.msk [vmem:[#allocation6 + $0x8] sm:$0x1] %vm1211_vm5, %v2620_v1  ;;  %2636 = vst.msk [vmem:[#allocation6 + $0x10] sm:$0x1] %vm1211_vm5, %v2605_v2  ;;  %v2663_v7 = vrot.slane %v2649_v56, %v4594_v23  ;;  %v2619_v8 = vrot.slane %v2591_v3, %v4594_v23  ;;  %v2621_v11 = vcombine.high %v2605_v2, %v2605_v2 }
 0x3c4   : > { %2706 = vst.msk [vmem:[#allocation6 + $0x1] sm:$0x1] %vm1211_vm5, %v2672_v4  ;;  %v2686_v9 = vrot.slane %v2664_v6, %v4594_v23  ;;  %v2694_v10 = vcombine.high %v2672_v4, %v2672_v4  ;;  %2635 = vst.msk [vmem:[#allocation6 + $0xc] sm:$0x1] %vm1211_vm5, %v2622_v60  ;;  %v1268_v58 = vmul.f32 %v1266_v55, %v1262_v53  ;;  %v1557_v6 = vld [vmem:[#allocation4 + $0x10] sm:$0xff]  ;;  %v1561_v60 = vpop.permute.xlu0 %1560 }
 0x3c5   : > { %v2679_v12 = vrot.slane %v2663_v7, %v4594_v23  ;;  %2637 = vst.msk [vmem:[#allocation6 + $0x14] sm:$0x1] %vm1211_vm5, %v2619_v8  ;;  %v2665_v13 = vcombine.high %v2663_v7, %v2663_v7  ;;  %v2623_v14 = vcombine.high %v2619_v8, %v2619_v8  ;;  %2638 = vst.msk [vmem:[#allocation6 + $0x18] sm:$0x1] %vm1211_vm5, %v2621_v11 }
 0x3c6   : > { %2707 = vst.msk [vmem:[#allocation6 + $0x5] sm:$0x1] %vm1211_vm5, %v2686_v9  ;;  %2708 = vst.msk [vmem:[#allocation6 + $0x9] sm:$0x1] %vm1211_vm5, %v2694_v10  ;;  %v2696_v15 = vcombine.high %v2686_v9, %v2686_v9  ;;  %v1563_v7 = vmul.f32 %v1561_v60, %v1557_v6 }
 0x3c7   : > { %2710 = vst.msk [vmem:[#allocation6 + $0x11] sm:$0x1] %vm1211_vm5, %v2679_v12  ;;  %v2693_v16 = vrot.slane %v2665_v13, %v4594_v23  ;;  %v2695_v18 = vcombine.high %v2679_v12, %v2679_v12  ;;  %2639 = vst.msk [vmem:[#allocation6 + $0x1c] sm:$0x1] %vm1211_vm5, %v2623_v14  ;;  %v1853_v13 = vld [vmem:[#allocation4 + $0x18] sm:$0xff]  ;;  %v1857_v14 = vpop.permute.xlu1 %1856 }
 0x3c8   : > { %2709 = vst.msk [vmem:[#allocation6 + $0xd] sm:$0x1] %vm1211_vm5, %v2696_v15  ;;  %v1859_v15 = vmul.f32 %v1857_v14, %v1853_v13 }
 0x3c9   : > { %2711 = vst.msk [vmem:[#allocation6 + $0x15] sm:$0x1] %vm1211_vm5, %v2693_v16  ;;  %2712 = vst.msk [vmem:[#allocation6 + $0x19] sm:$0x1] %vm1211_vm5, %v2695_v18  ;;  %v2697_v17 = vcombine.high %v2693_v16, %v2693_v16 }
 0x3cb   : > { %v3645_v19 = vpop.eup %3644  ;;  %2713 = vst.msk [vmem:[#allocation6 + $0x1d] sm:$0x1] %vm1211_vm5, %v2697_v17 }
 0x3cc   : > { %v3647_v20 = vpop.eup %3646  ;;  %v2723_v21 = vcombine.high %v3645_v19, %v3645_v19  ;;  %2719 = vperm.xlu1 %3623, %v3645_v19   ;;  %v2730_v22 = vrot.slane %v3645_v19, %v4594_v23 }
 0x3cd   : > { %v2797_v24 = vcombine.high %v3647_v20, %v3647_v20  ;;  %2793 = vperm.xlu0 %3622, %v3647_v20   ;;  %v2804_v25 = vrot.slane %v3647_v20, %v4594_v23 }
 0x3ce   : > { %v2746_v26 = vrot.slane %v2730_v22, %v4594_v23  ;;  %v2738_v28 = vcombine.high %v2730_v22, %v2730_v22  ;;  %v2737_v30 = vrot.slane %v2723_v21, %v4594_v23  ;;  %v2501_v21 = vpop.permute.xlu1 %2500 }
 0x3cf   : > { %v2820_v31 = vrot.slane %v2804_v25, %v4594_v23  ;;  %v2812_v32 = vcombine.high %v2804_v25, %v2804_v25  ;;  %v2811_v33 = vrot.slane %v2797_v24, %v4594_v23  ;;  %v2490_v24 = vld [vmem:[#allocation7] sm:$0xf]  ;;  %v2491_v25 = vld [vmem:[#allocation7 + $0x4] sm:$0xf] }
 0x3d0   : > { %2780 = vst.msk [vmem:[#allocation6 + $0x2] sm:$0x1] %vm1211_vm5, %v2746_v26  ;;  %v2760_v34 = vrot.slane %v2738_v28, %v4594_v23  ;;  %v2768_v35 = vcombine.high %v2746_v26, %v2746_v26  ;;  %v2753_v36 = vrot.slane %v2737_v30, %v4594_v23  ;;  %v2739_v37 = vcombine.high %v2737_v30, %v2737_v30  ;;  %v2506_v26 = vpop.permute.xlu0 %2505 }
 0x3d1   : > { %2854 = vst.msk [vmem:[#allocation6 + $0x3] sm:$0x1] %vm1211_vm5, %v2820_v31  ;;  %v2834_v39 = vrot.slane %v2812_v32, %v4594_v23  ;;  %v2842_v40 = vcombine.high %v2820_v31, %v2820_v31  ;;  %v2827_v43 = vrot.slane %v2811_v33, %v4594_v23  ;;  %v2813_v44 = vcombine.high %v2811_v33, %v2811_v33 }
 0x3d2   : > { %2781 = vst.msk [vmem:[#allocation6 + $0x6] sm:$0x1] %vm1211_vm5, %v2760_v34  ;;  %2782 = vst.msk [vmem:[#allocation6 + $0xa] sm:$0x1] %vm1211_vm5, %v2768_v35  ;;  %v2770_v45 = vcombine.high %v2760_v34, %v2760_v34  ;;  %v2767_v46 = vrot.slane %v2739_v37, %v4594_v23  ;;  %v2769_v47 = vcombine.high %v2753_v36, %v2753_v36  ;;  %v2511_v22 = vpop.permute.xlu1 %2510 }
 0x3d3   : > { %2784 = vst.msk [vmem:[#allocation6 + $0x12] sm:$0x1] %vm1211_vm5, %v2753_v36  ;;  %2855 = vst.msk [vmem:[#allocation6 + $0x7] sm:$0x1] %vm1211_vm5, %v2834_v39  ;;  %v2844_v0 = vcombine.high %v2834_v39, %v2834_v39  ;;  %v2841_v41 = vrot.slane %v2813_v44, %v4594_v23  ;;  %v2843_v48 = vcombine.high %v2827_v43, %v2827_v43 }
 0x3d4   : > { %2856 = vst.msk [vmem:[#allocation6 + $0xb] sm:$0x1] %vm1211_vm5, %v2842_v40  ;;  %2858 = vst.msk [vmem:[#allocation6 + $0x13] sm:$0x1] %vm1211_vm5, %v2827_v43  ;;  %v2771_v49 = vcombine.high %v2767_v46, %v2767_v46  ;;  %v2538_v28 = vmul.f32 %v2501_v21, %v2490_v24  ;;  %v2539_v31 = vmul.f32 %v2506_v26, %v2491_v25  ;;  %v2492_v43 = vld [vmem:[#allocation7 + $0x8] sm:$0xf] }
 0x3d5   : > { %2783 = vst.msk [vmem:[#allocation6 + $0xe] sm:$0x1] %vm1211_vm5, %v2770_v45  ;;  %2785 = vst.msk [vmem:[#allocation6 + $0x16] sm:$0x1] %vm1211_vm5, %v2767_v46  ;;  %v2845_v42 = vcombine.high %v2841_v41, %v2841_v41  ;;  %v2493_v46 = vld [vmem:[#allocation7 + $0xc] sm:$0xf] }
 0x3d6   : > { %2786 = vst.msk [vmem:[#allocation6 + $0x1a] sm:$0x1] %vm1211_vm5, %v2769_v47  ;;  %2857 = vst.msk [vmem:[#allocation6 + $0xf] sm:$0x1] %vm1211_vm5, %v2844_v0  ;;  %v2516_v32 = vpop.permute.xlu1 %2515  ;;  %v2540_v47 = vmul.f32 %v2511_v22, %v2492_v43 }
 0x3d7   : > { %2859 = vst.msk [vmem:[#allocation6 + $0x17] sm:$0x1] %vm1211_vm5, %v2841_v41  ;;  %2860 = vst.msk [vmem:[#allocation6 + $0x1b] sm:$0x1] %vm1211_vm5, %v2843_v48  ;;  %v2541_v48 = vmul.f32 %v2516_v32, %v2493_v46 }
 0x3d8   : > { %2787 = vst.msk [vmem:[#allocation6 + $0x1e] sm:$0x1] %vm1211_vm5, %v2771_v49  ;;  %2861 = vst.msk [vmem:[#allocation6 + $0x1f] sm:$0x1] %vm1211_vm5, %v2845_v42  ;;  %v2890_v23 = vld [vmem:[#allocation6] sm:$0xf] }
 0x3d9   : > { %2900 = vperm.xlu0 %3622, %v2890_v23  }
 0x3da   : > { %v2891_v27 = vld [vmem:[#allocation6 + $0x4] sm:$0xf]  ;;  %v2521_v0 = vpop.permute.xlu1 %2520 }
 0x3db   : > { %2905 = vperm.xlu1 %3623, %v2891_v27   ;;  %v2892_v38 = vld [vmem:[#allocation6 + $0x8] sm:$0xf]  ;;  %v2894_v51 = vld [vmem:[#allocation6 + $0x10] sm:$0xf] }
 0x3dd   : > { %2910 = vperm.xlu0 %3622, %v2892_v38   ;;  %v2893_v50 = vld [vmem:[#allocation6 + $0xc] sm:$0xf] }
 0x3de   : > { %v2895_v59 = vld [vmem:[#allocation6 + $0x14] sm:$0xf]  ;;  %v2526_v53 = vpop.permute.xlu1 %2525 }
 0x3df   : > { %2915 = vperm.xlu1 %3623, %v2893_v50  }
 0x3e1   : > { %2920 = vperm.xlu0 %3622, %v2894_v51  }
 0x3e3   : > { %2925 = vperm.xlu1 %3623, %v2895_v59   ;;  %v2494_v59 = vld [vmem:[#allocation7 + $0x10] sm:$0xf] }
 0x3e4   : > { %v2542_v55 = vmul.f32 %v2521_v0, %v2494_v59 }
 0x3ed   : > { %v1013_v54 = vpop.f32.mrb[8].mxu0 }
 0x3ee   : > { %v1019_v5 = vadd.f32 %v1013_v54, %v970_v52  ;;  %v3437_v56 = vpop.f32.mrb[9].mxu0  ;;  %v2495_v52 = vld [vmem:[#allocation7 + $0x14] sm:$0xf] }
 0x3ef   : > { %v1016_v57 = vpop.f32.mrb[10].mxu0 }
 0x3f0   : > { %1021 = vst.msk [vmem:[#allocation4] sm:$0xff] %vm694_vm15, %v1019_v5  ;;  %v3438_v62 = vpop.f32.mrb[11].mxu0  ;;  %v2543_v5 = vmul.f32 %v2526_v53, %v2495_v52 }
 0x3f1   : > { %v1311_v63 = vpop.f32.mrb[8].mxu1 }
 0x3f2   : > { %v1317_v1 = vadd.f32 %v1311_v63, %v1268_v58  ;;  %v3443_v2 = vpop.f32.mrb[9].mxu1 }
 0x3f3   : > { %v1314_v3 = vpop.f32.mrb[10].mxu1 }
 0x3f4   : > { %1318 = vst.msk [vmem:[#allocation4 + $0x8] sm:$0xff] %vm694_vm15, %v1317_v1  ;;  %v3444_v4 = vpop.f32.mrb[11].mxu1  ;;  %v2496_v3 = vld [vmem:[#allocation7 + $0x18] sm:$0xf] }
 0x3f5   : > { %v2531_v4 = vpop.permute.xlu1 %2530 }
 0x3fb   : > { %v2642_v21 = vld [vmem:[#allocation4 + $0x8] sm:$0xff] }
 0x3fd   : > { %v1606_v8 = vpop.f32.mrb[12].mxu0 }
 0x3fe   : > { %v1612_v9 = vadd.f32 %v1606_v8, %v1563_v7  ;;  %v3449_v10 = vpop.f32.mrb[13].mxu0  ;;  %v2497_v7 = vld [vmem:[#allocation7 + $0x1c] sm:$0xf]  ;;  %v2536_v8 = vpop.permute.xlu0 %2535 }
 0x3ff   : > { %v1609_v11 = vpop.f32.mrb[14].mxu0 }
 0x400   : > { %1613 = vst.msk [vmem:[#allocation4 + $0x10] sm:$0xff] %vm694_vm15, %v1612_v9  ;;  %v3450_v12 = vpop.f32.mrb[15].mxu0  ;;  %v2544_v9 = vmul.f32 %v2531_v4, %v2496_v3  ;;  %v2545_v11 = vmul.f32 %v2536_v8, %v2497_v7 }
 0x404   : > { %v1902_v16 = vpop.f32.mrb[12].mxu1 }
 0x405   : > { %v1908_v18 = vadd.f32 %v1902_v16, %v1859_v15  ;;  %v3455_v17 = vpop.f32.mrb[13].mxu1 }
 0x406   : > { %v1905_v19 = vpop.f32.mrb[14].mxu1 }
 0x407   : > { %1909 = vst.msk [vmem:[#allocation4 + $0x18] sm:$0xff] %vm694_vm15, %v1908_v18  ;;  %v3456_v20 = vpop.f32.mrb[15].mxu1  ;;  %v2716_v26 = vld [vmem:[#allocation4 + $0x10] sm:$0xff] }
 0x41c   : > { %v2154_v30 = vpop.f32.mrb[16].mxu0 }
 0x41d   : > { %v2546_v33 = vadd.f32 %v2538_v28, %v2154_v30  ;;  %v3461_v34 = vpop.f32.mrb[17].mxu0 }
 0x41e   : > { %v2157_v35 = vpop.f32.mrb[18].mxu0  ;;  %v2200_v36 = vpop.f32.mrb[16].mxu1  ;;  %v2896_v34 = vld [vmem:[#allocation6 + $0x18] sm:$0xf] }
 0x41f   : > { %2555 = vst.msk [vmem:[#allocation7] sm:$0xf] %vm699_vm6, %v2546_v33  ;;  %v2547_v37 = vadd.f32 %v2539_v31, %v2200_v36  ;;  %v3462_v39 = vpop.f32.mrb[19].mxu0  ;;  %v3467_v40 = vpop.f32.mrb[17].mxu1  ;;  %v2790_v31 = vld [vmem:[#allocation4 + $0x18] sm:$0xff] }
 0x420   : > { %v2203_v44 = vpop.f32.mrb[18].mxu1  ;;  %v2897_v35 = vld [vmem:[#allocation6 + $0x1c] sm:$0xf] }
 0x421   : > { %2556 = vst.msk [vmem:[#allocation7 + $0x4] sm:$0xf] %vm699_vm6, %v2547_v37  ;;  %v3468_v45 = vpop.f32.mrb[19].mxu1 }
 0x424   : > { %v2246_v41 = vpop.f32.mrb[20].mxu0 }
 0x425   : > { %v2548_v49 = vadd.f32 %v2540_v47, %v2246_v41  ;;  %v3473_v42 = vpop.f32.mrb[21].mxu0 }
 0x426   : > { %v2249_v23 = vpop.f32.mrb[22].mxu0  ;;  %v2292_v27 = vpop.f32.mrb[20].mxu1  ;;  %v2882_v36 = vld [vmem:[#allocation7] sm:$0xf] }
 0x427   : > { %2557 = vst.msk [vmem:[#allocation7 + $0x8] sm:$0xf] %vm699_vm6, %v2548_v49  ;;  %v2549_v38 = vadd.f32 %v2541_v48, %v2292_v27  ;;  %v3474_v50 = vpop.f32.mrb[23].mxu0  ;;  %v3479_v51 = vpop.f32.mrb[21].mxu1 }
 0x428   : > { %v2295_v29 = vpop.f32.mrb[22].mxu1  ;;  %v2883_v40 = vld [vmem:[#allocation7 + $0x4] sm:$0xf]  ;;  %v2568_v51 = vld [vmem:[#allocation4] sm:$0xff] }
 0x429   : > { %2558 = vst.msk [vmem:[#allocation7 + $0xc] sm:$0xf] %vm699_vm6, %v2549_v38  ;;  %v3480_v61 = vpop.f32.mrb[23].mxu1 }
 0x42c   : > { %v2338_v54 = vpop.f32.mrb[24].mxu0 }
 0x42d   : > { %v2550_v56 = vadd.f32 %v2542_v55, %v2338_v54  ;;  %v3485_v57 = vpop.f32.mrb[25].mxu0 }
 0x42e   : > { %v2341_v58 = vpop.f32.mrb[26].mxu0  ;;  %v2384_v62 = vpop.f32.mrb[24].mxu1  ;;  %v2884_v45 = vld [vmem:[#allocation7 + $0x8] sm:$0xf] }
 0x42f   : > { %2559 = vst.msk [vmem:[#allocation7 + $0x10] sm:$0xf] %vm699_vm6, %v2550_v56  ;;  %v2551_v63 = vadd.f32 %v2543_v5, %v2384_v62  ;;  %v3486_v1 = vpop.f32.mrb[27].mxu0  ;;  %v3491_v2 = vpop.f32.mrb[25].mxu1 }
 0x430   : > { %v2387_v6 = vpop.f32.mrb[26].mxu1  ;;  %v2885_v0 = vld [vmem:[#allocation7 + $0xc] sm:$0xf] }
 0x431   : > { %2560 = vst.msk [vmem:[#allocation7 + $0x14] sm:$0xf] %vm699_vm6, %v2551_v63  ;;  %v3492_v60 = vpop.f32.mrb[27].mxu1 }
 0x434   : > { %v2430_v10 = vpop.f32.mrb[28].mxu0 }
 0x435   : > { %v2552_v12 = vadd.f32 %v2544_v9, %v2430_v10  ;;  %v3497_v13 = vpop.f32.mrb[29].mxu0 }
 0x436   : > { %v2433_v14 = vpop.f32.mrb[30].mxu0  ;;  %v2476_v15 = vpop.f32.mrb[28].mxu1  ;;  %v2886_v49 = vld [vmem:[#allocation7 + $0x10] sm:$0xf] }
 0x437   : > { %2561 = vst.msk [vmem:[#allocation7 + $0x18] sm:$0xf] %vm699_vm6, %v2552_v12  ;;  %v2553_v16 = vadd.f32 %v2545_v11, %v2476_v15  ;;  %v3498_v18 = vpop.f32.mrb[31].mxu0  ;;  %v3503_v17 = vpop.f32.mrb[29].mxu1 }
 0x438   : > { %v2479_v19 = vpop.f32.mrb[30].mxu1  ;;  %v2887_v27 = vld [vmem:[#allocation7 + $0x14] sm:$0xf] }
 0x439   : > { %2562 = vst.msk [vmem:[#allocation7 + $0x1c] sm:$0xf] %vm699_vm6, %v2553_v16  ;;  %v3504_v20 = vpop.f32.mrb[31].mxu1 }
 0x43b   : > { %v2572_v25 = vpop.permute.xlu1 %2571 }
 0x43c   : > { %v2574_v29 = vmul.f32 %v2572_v25, %v2568_v51 }
 0x43f   : > { %v2646_v22 = vpop.permute.xlu0 %2645 }
 0x440   : > { %v2648_v24 = vmul.f32 %v2646_v22, %v2642_v21 }
 0x442   : > { %2863 = vrot.lane.b32.xlu1 %v2648_v24, %s4038_s21 }
 0x44b   : > { %v2720_v28 = vpop.permute.xlu1 %2719 }
 0x44c   : > { %v2722_v30 = vmul.f32 %v2720_v28, %v2716_v26  ;;  %v2794_v32 = vpop.permute.xlu0 %2793 }
 0x44d   : > { %v2796_v33 = vmul.f32 %v2794_v32, %v2790_v31 }
 0x44e   : > { %2867 = vrot.lane.b32.xlu0 %v2722_v30, %s4039_s1 }
 0x44f   : > { %2871 = vrot.lane.b32.xlu1 %v2796_v33, %s4040_s14 }
 0x452   : > { %2930 = vperm.xlu0 %3622, %v2896_v34  }
 0x453   : > { %2935 = vperm.xlu1 %3623, %v2897_v35  }
 0x458   : > { %v2901_v37 = vpop.permute.xlu0 %2900 }
 0x459   : > { %v2938_v39 = vmul.f32 %v2901_v37, %v2882_v36 }
 0x45a   : > { %v2906_v43 = vpop.permute.xlu1 %2905 }
 0x45b   : > { %2946 = vst.msk [vmem:[%s4996_s20] sm:$0xf] %vm699_vm6, %v2938_v39  ;;  %v2939_v44 = vmul.f32 %v2906_v43, %v2883_v40 }
 0x45c   : > { %v2911_v46 = vpop.permute.xlu0 %2910 }
 0x45d   : > { %2947 = vst.msk [vmem:[%s4996_s20 + $0x4] sm:$0xf] %vm699_vm6, %v2939_v44  ;;  %v2940_v47 = vmul.f32 %v2911_v46, %v2884_v45 }
 0x45e   : > { %v2916_v41 = vpop.permute.xlu1 %2915 }
 0x45f   : > { %2948 = vst.msk [vmem:[%s4996_s20 + $0x8] sm:$0xf] %vm699_vm6, %v2940_v47  ;;  %v2941_v48 = vmul.f32 %v2916_v41, %v2885_v0 }
 0x460   : > { %v2921_v42 = vpop.permute.xlu0 %2920 }
 0x461   : > { %2949 = vst.msk [vmem:[%s4996_s20 + $0xc] sm:$0xf] %vm699_vm6, %v2941_v48  ;;  %v2942_v23 = vmul.f32 %v2921_v42, %v2886_v49 }
 0x462   : > { %v2926_v38 = vpop.permute.xlu1 %2925 }
 0x463   : > { %2950 = vst.msk [vmem:[%s4996_s20 + $0x10] sm:$0xf] %vm699_vm6, %v2942_v23  ;;  %v2943_v50 = vmul.f32 %v2926_v38, %v2887_v27 }
 0x465   : > { %2951 = vst.msk [vmem:[%s4996_s20 + $0x14] sm:$0xf] %vm699_vm6, %v2943_v50 }
 0x4b4   : > { %v2864_v59 = vpop.permute.xlu1 %2863 }
 0x4b5   : > { %v2874_v61 = vsel %vm694_vm15, %v2574_v29, %v2864_v59 }
 0x4c0   : > { %v2868_v52 = vpop.permute.xlu0 %2867 }
 0x4c1   : > { %v2876_v53 = vsel %vm2875_vm0, %v2874_v61, %v2868_v52  ;;  %v2872_v55 = vpop.permute.xlu1 %2871 }
 0x4c2   : > { %v2878_v54 = vsel %vm2877_vm2, %v2876_v53, %v2872_v55  ;;  %2881 = vst.msk [vmem:[%s670_s28 + $0x8] sm:$0xff] %vm2880_vm3, %v2872_v55 }
 0x4c3   : > { %2879 = vst [vmem:[%s670_s28] sm:$0xff] %v2878_v54 }
 0x4c4   : > { %3901 = shalt.err (!%p3898_p9)
}
 0x4c5   : > { %s3902_s30 = scalar_lea.hbm %s5016_s15, 256  ;;  %s3906_s27 = scalar_lea.hbm %s5180_s19, 512 }
 0x4c6   : > { %p3903_p7 = scmp.ne.s32.totalorder %s5016_s15, %s3902_s30  ;;  %p3907_p13 = scmp.lt.u32.totalorder %s5016_s15, %s5180_s19 }
 0x4c7   : > { %p3908_p4 = scmp.lt.u32.totalorder %s3906_s27, %s3902_s30  ;;  %p3910_p10 = scmp.lt.u32.totalorder %s3902_s30, %s5016_s15 }
 0x4c8   : > { %p3904_p8 = pnand %p3903_p7, %p5181_p1 }
 0x4c9   : > { %p3909_p12 = por %p3908_p4, %p3907_p13 }
 0x4ca   : > { %p3905_p6 = pneg %p3904_p8 }
 0x4cb   : > { %p3911_p11 = por %p3910_p10, %p3909_p12 }
 0x4cd   : > { %p3912_p5 = pnand %p3911_p11, %p3905_p6 }
 0x4cf   : > { %3915 = shalt.err (!%p3912_p5)
}
 0x4d0   : > { %3521 = dma.vmem_to_hbm [thread:$0]  (%p5181_p1), %s5018_s8, 256, %s5016_s15, %s2955_s18   ;;  %v2888_v5 = vld [vmem:[#allocation7 + $0x18] sm:$0xf]  ;;  %v2889_v58 = vld [vmem:[#allocation7 + $0x1c] sm:$0xf] }
 0x4d1   : > { %s3376_s14 = sshll.u32 %s5177_s26, 9  ;;  %s2991_s28 = sshll.u32 %s4996_s20, 4  ;;  %v2931_v56 = vpop.permute.xlu0 %2930  ;;  %s5049_s28 = int_to_ptr.vmem [resolvable:$true] %s2991_s28 }
 0x4d2   : > { %v2944_v57 = vmul.f32 %v2931_v56, %v2888_v5  ;;  %v2936_v62 = vpop.permute.xlu1 %2935  ;;  %s5182_s16 = sld [smem:[#allocation44_spill]]  ;;  %s2960_s26 = scalar_lea.sflag [#allocation24], %s4468_s24 }
 0x4d3   : > { %v2945_v63 = vmul.f32 %v2936_v62, %v2889_v58  ;;  %s3916_s8 = scalar_lea.vmem %s5049_s28, 512  ;;  %s4042_s15 = smov [#allocation23]  }
 0x4d4   : > { %2952 = vst.msk [vmem:[%s4996_s20 + $0x18] sm:$0xf] %vm699_vm6, %v2944_v57  ;;  %p3917_p0 = scmp.ne.s32.totalorder %s5049_s28, %s3916_s8  ;;  %s3920_s18 = sshll.u32 %s4042_s15, 4  ;;  %s3921_s18 = int_to_ptr.vmem [resolvable:$false] %s3920_s18 }
 0x4d5   : > { %2953 = vst.msk [vmem:[%s4996_s20 + $0x1c] sm:$0xf] %vm699_vm6, %v2945_v63  ;;  %s3922_s5 = scalar_lea.vmem %s3921_s18, 1024  ;;  %p3923_p9 = scmp.lt.s32.totalorder %s5049_s28, %s3921_s18 }
 0x4d6   : > { %p3918_p2 = pnand %p3917_p0, %p5181_p1  ;;  %p3924_p7 = scmp.lt.s32.totalorder %s3922_s5, %s3916_s8 }
 0x4d8   : > { %s5047_s12 = scalar_lea.hbm %s5182_s16, %s3376_s14  ;;  %p3919_p3 = pneg %p3918_p2 }
 0x4d9   : > { %p3925_p8 = por %p3924_p7, %p3923_p9 }
 0x4db   : > { %p3926_p6 = pnand %p3925_p8, %p3919_p3 }
 0x4dd   : > { %3929 = shalt.err (!%p3926_p6)
}
 0x4de   : > { %s3930_s20 = scalar_lea.hbm %s5047_s12, 512  ;;  %s3934_s3 = scalar_lea.hbm %s5182_s16, 1024 }
 0x4df   : > { %p3931_p13 = scmp.ne.s32.totalorder %s5047_s12, %s3930_s20  ;;  %p3935_p10 = scmp.lt.u32.totalorder %s5047_s12, %s5182_s16 }
 0x4e0   : > { %p3936_p11 = scmp.lt.u32.totalorder %s3934_s3, %s3930_s20  ;;  %p3938_p0 = scmp.lt.u32.totalorder %s3930_s20, %s5047_s12 }
 0x4e1   : > { %p3932_p4 = pnand %p3931_p13, %p5181_p1 }
 0x4e2   : > { %p3937_p5 = por %p3936_p11, %p3935_p10 }
 0x4e3   : > { %p3933_p12 = pneg %p3932_p4 }
 0x4e4   : > { %p3939_p2 = por %p3938_p0, %p3937_p5 }
 0x4e6   : > { %p3940_p3 = pnand %p3939_p2, %p3933_p12 }
 0x4e8   : > { %3943 = shalt.err (!%p3940_p3)
}
 0x4e9   : > { %s4043_s9 = smov 64   ;;  %s4044_s27 = smov 4  }
 0x4ea   : > { %3522 = dma.vmem_to_hbm [thread:$0]  (%p5181_p1), %s5049_s28, 512, %s5047_s12, %s2960_s26, %s4043_s9, %s4043_s9, %s4044_s27  }
 0x4eb PF: > { %s5183_s21 = sld [smem:[#allocation32_spill]]  ;;  %s5184_s1 = sld [smem:[#allocation39_spill]] }
 0x4ec   : > { %s5185_s14 = sld [smem:[#allocation35_spill]] }
 0x4f1   : > { %s3006_s17 = sand.u32 1, %s5183_s21   ;;  %p5186_p9 = scmp.ne.s32.totalorder %s5184_s1, 0 }
 0x4f2   : > { %p5187_p7 = scmp.ge.s32.totalorder %s5185_s14, 2  ;;  %s3007_s23 = scalar_lea.sflag [#allocation10], %s3006_s17 }
 0x4f4   : > { %p3551_p8 = pnand %p5187_p7, %p5186_p9 }
 0x4f6   : > { %3989 = dma.done.wait (!%p3551_p8), %s3007_s23, 256  }
 0x4f7   : > { %3991 = vsyncadd (!%p3551_p8), %s3007_s23, 4294967040  ;;  %s3016_s8 = scalar_lea.sflag [#allocation24], %s3006_s17 }
 0x4f8   : > { %3993 = dma.done.wait (!%p3551_p8), %s3016_s8, 512  }
 0x4f9   : > { %3995 = vsyncadd (!%p3551_p8), %s3016_s8, 4294966784  ;;  %s41_s14 = sadd.s32 1, %s5185_s14   ;;  %s5188_s24 = sld [smem:[#allocation33_spill]] }
 0x4fa   : > { %p38_p6 = scmp.ge.s32.totalorder %s41_s14, 4   ;;  %s5189_s11 = sld [smem:[#allocation38_spill]] }
 0x4fb   : > { %s5190_s25 = sld [smem:[#allocation36_spill]]  ;;  %s5191_s30 = smov %s4002_s10 }
 0x4fc   : > { %s5193_s12 = smov %s4014_s13  ;;  %40 = sbr.rel (!%p38_p6) target bundleno = 22 (0x16), region = 225 }
 0x4ff   : > { %s5192_s10 = smov %s5188_s24 }
 0x501   : > { %s5194_s13 = smov %s5190_s25 }
 0x503   :  { %3021 = vsyncpa [#allocation9], 1 }
 0x504   :  { %3023 = vsyncpa [#allocation9 + $0x1], 1 }
 0x505   :  { %3024 = vsyncpa [#allocation12], 1 }
 0x506   :  { %3026 = vsyncpa [#allocation12 + $0x1], 1 }
 0x507   :  { %3027 = vsyncpa [#allocation15], 1 }
 0x508   :  { %3029 = vsyncpa [#allocation15 + $0x1], 1 }
 0x509   :  { %3030 = vsyncpa [#allocation18], 1 }
 0x50a   :  { %3032 = vsyncpa [#allocation18 + $0x1], 1 }
 0x50b   :  { %3033 = vsyncpa [#allocation21], 1 }
 0x50c   :  { %3035 = vsyncpa [#allocation21 + $0x1], 1 }
 0x50d   :  { %3036 = vsyncpa [#allocation10], 1 }
 0x50e   :  { %3038 = vsyncpa [#allocation10 + $0x1], 1 }
 0x50f   :  { %3039 = vsyncpa [#allocation24], 1 }
 0x510   :  { %3041 = vsyncpa [#allocation24 + $0x1], 1 }

// kernel: structure_module_forward.22
= control target key start
LH: loop header
LB: loop body
LE: loop exit
PB: predicated region body
PF: predicated region fallthrough
CT: control target
= control target key end

     0   :  { %v287_v0 = vmov 0   ;;  %vm149_vm0 = vcmask 785408   ;;  %vm198_vm1 = vcmask 261120   ;;  %s404_s1 = inlined_call_operand.vmem [shape: bf16[224,32], index: 1, kind: input, shape index: {}]   ;;  %s405_s0 = inlined_call_operand.vmem [shape: f32[16,224], index: 0, kind: input, shape index: {}]   ;;  %s406_s2 = inlined_call_operand.vmem [shape: f32[1,32], index: 2, kind: input, shape index: {}]   ;;  %s407_s3 = inlined_call_operand.vmem [shape: f32[16,32], index: 3, kind: input, shape index: {}]   ;;  %s408_s4 = inlined_call_operand.vmem [shape: f32[1,32], index: 4, kind: input, shape index: {}]   ;;  %s409_s5 = inlined_call_operand.vmem [shape: f32[1,32], index: 5, kind: input, shape index: {}]   ;;  %s410_s6 = inlined_call_operand.vmem [shape: f32[16,32], index: 6, kind: output, shape index: {}]  }
   0x1   :  { %153 = vmatprep.subr.bf16.mxu0 %v287_v0  ;;  %v269_v1 = vld [vmem:[%s404_s1] sm:$0xff]   ;;  %v270_v2 = vld [vmem:[%s404_s1 + $0x8] sm:$0xff]   ;;  %v271_v3 = vld [vmem:[%s404_s1 + $0x10] sm:$0xff]  }
   0x2   :  { %154 = vmatpush1.bf16.msra.mxu0 %v269_v1  ;;  %v272_v4 = vld [vmem:[%s404_s1 + $0x18] sm:$0xff]   ;;  %v273_v5 = vld [vmem:[%s404_s1 + $0x20] sm:$0xff]   ;;  %v25_v6 = vld [vmem:[%s405_s0 + $0x8] sm:$0xff] }
   0x3   :  { %155 = vmatprep.subr.bf16.mxu0 %v287_v0  ;;  %v27_v7 = vld [vmem:[%s405_s0 + $0x18] sm:$0xff]  ;;  %v274_v9 = vld [vmem:[%s404_s1 + $0x28] sm:$0xff]   ;;  %v275_v10 = vld [vmem:[%s404_s1 + $0x30] sm:$0xff]  }
   0x4   :  { %v29_v8 = vpack.c.bf16 %v27_v7, %v25_v6  ;;  %v276_v11 = vld [vmem:[%s404_s1 + $0x38] sm:$0xff]   ;;  %v277_v12 = vld [vmem:[%s404_s1 + $0x40] sm:$0xff]   ;;  %v278_v13 = vld [vmem:[%s404_s1 + $0x48] sm:$0xff]  }
   0x5   :  { %v279_v14 = vld [vmem:[%s404_s1 + $0x50] sm:$0xff]   ;;  %v280_v15 = vld [vmem:[%s404_s1 + $0x58] sm:$0xff]   ;;  %v281_v16 = vld [vmem:[%s404_s1 + $0x60] sm:$0xff]  }
   0x6   :  { %156 = vmatpush1.bf16.msra.mxu0 %v270_v2  ;;  %265 = vmatprep.mubr.msk.bf16.mxu0 %vm149_vm0, %v29_v8  ;;  %v282_v17 = vld [vmem:[%s404_s1 + $0x68] sm:$0xff]   ;;  %v24_v18 = vld [vmem:[%s405_s0] sm:$0xff]  ;;  %v26_v19 = vld [vmem:[%s405_s0 + $0x10] sm:$0xff] }
   0x7   :  { %157 = vmatprep.subr.bf16.mxu0 %v287_v0  ;;  %v28_v20 = vpack.c.bf16 %v26_v19, %v24_v18  ;;  %v250_v21 = vld [vmem:[%s406_s2] ss:$0 sm:$0xff]  ;;  %v195_v27 = vld [vmem:[%s407_s3 + $0x8] sm:$0xff] }
   0x8   :  { %v194_v23 = vld [vmem:[%s407_s3] sm:$0xff] }
   0x9   :  { %v266_v51 = vld [vmem:[%s408_s4] ss:$0 sm:$0xff] }
   0xa   :  { %158 = vmatpush1.bf16.msra.mxu0 %v271_v3  ;;  %v267_v53 = vld [vmem:[%s409_s5] ss:$0 sm:$0xff] }
   0xb   :  { %159 = vmatprep.subr.bf16.mxu0 %v287_v0 }
   0xe   :  { %160 = vmatpush1.bf16.msra.mxu0 %v272_v4 }
   0xf   :  { %161 = vmatprep.subr.bf16.mxu0 %v287_v0 }
  0x12   :  { %162 = vmatpush1.bf16.msra.mxu0 %v273_v5 }
  0x13   :  { %163 = vmatprep.subr.bf16.mxu0 %v287_v0 }
  0x16   :  { %164 = vmatpush1.bf16.msra.mxu0 %v274_v9 }
  0x17   :  { %165 = vmatprep.subr.bf16.mxu0 %v287_v0 }
  0x1a   :  { %166 = vmatpush1.bf16.msra.mxu0 %v275_v10 }
  0x1b   :  { %167 = vmatprep.subr.bf16.mxu0 %v287_v0 }
  0x1e   :  { %168 = vmatpush1.bf16.msra.mxu0 %v276_v11 }
  0x1f   :  { %169 = vmatprep.subr.bf16.mxu0 %v287_v0 }
  0x22   :  { %170 = vmatpush1.bf16.msra.mxu0 %v277_v12 }
  0x23   :  { %171 = vmatprep.subr.bf16.mxu0 %v287_v0 }
  0x26   :  { %172 = vmatpush1.bf16.msra.mxu0 %v278_v13 }
  0x27   :  { %173 = vmatprep.subr.bf16.mxu0 %v287_v0 }
  0x2a   :  { %174 = vmatpush1.bf16.msra.mxu0 %v279_v14 }
  0x2b   :  { %175 = vmatprep.subr.bf16.mxu0 %v287_v0 }
  0x2e   :  { %176 = vmatpush1.bf16.msra.mxu0 %v280_v15 }
  0x2f   :  { %177 = vmatprep.subr.bf16.mxu0 %v287_v0 }
  0x32   :  { %178 = vmatpush1.bf16.msra.mxu0 %v281_v16 }
  0x33   :  { %179 = vmatprep.subr.bf16.mxu0 %v287_v0 }
  0x36   :  { %180 = vmatpush1.bf16.msra.mxu0 %v282_v17 }
  0x39   :  { %186 = vmatmul.mubr.bf16.vlgmr.msra.gmra.mrb[0].mxu0 %v28_v20 }
 0x10c   :  { %v187_v22 = vpop.f32.mrb[0].mxu0 }
 0x10d   :  { %v188_v24 = vadd.f32 %v250_v21, %v187_v22  ;;  %v189_v25 = vpop.f32.mrb[1].mxu0 }
 0x10e   :  { %v190_v26 = vpop.f32.mrb[2].mxu0 }
 0x10f   :  { %v191_v28 = vadd.f32 %v250_v21, %v190_v26  ;;  %v192_v29 = vpop.f32.mrb[3].mxu0  ;;  %v196_v30 = vadd.f32 %v194_v23, %v188_v24 }
 0x111   :  { %v199_v31 = vsel %vm198_vm1, %v196_v30, 0.0  ;;  %v197_v32 = vadd.f32 %v195_v27, %v191_v28 }
 0x112   :  { %200 = vadd.xlane.f32.xlu0 %v199_v31 }
 0x113   :  { %v202_v33 = vsel %vm198_vm1, %v197_v32, 0.0 }
 0x116   :  { %203 = vadd.xlane.f32.xlu0 %v202_v33 }
 0x19f   :  { %v201_v34 = vpop.xlane.xlu0 %200 }
 0x1a0   :  { %v206_v35 = vmul.f32 0.03125, %v201_v34 }
 0x1a2   :  { %v208_v36 = vsub.f32 %v196_v30, %v206_v35 }
 0x1a3   :  { %v204_v37 = vpop.xlane.xlu0 %203 }
 0x1a4   :  { %v207_v38 = vmul.f32 0.03125, %v204_v37  ;;  %v210_v39 = vmul.f32 %v208_v36, %v208_v36 }
 0x1a6   :  { %v209_v40 = vsub.f32 %v197_v32, %v207_v38  ;;  %v212_v41 = vsel %vm198_vm1, %v210_v39, 0.0 }
 0x1a7   :  { %213 = vadd.xlane.f32.xlu1 %v212_v41 }
 0x1a8   :  { %v211_v42 = vmul.f32 %v209_v40, %v209_v40 }
 0x1aa   :  { %v215_v43 = vsel %vm198_vm1, %v211_v42, 0.0 }
 0x1ab   :  { %216 = vadd.xlane.f32.xlu1 %v215_v43 }
 0x234   :  { %v214_v44 = vpop.xlane.xlu1 %213 }
 0x235   :  { %v218_v45 = vmul.f32 0.03125, %v214_v44 }
 0x237   :  { %v220_v46 = vadd.f32 1e-05, %v218_v45 }
 0x238   :  { %v217_v47 = vpop.xlane.xlu1 %216 }
 0x239   :  { %283 = vrsqrt.f32 %v220_v46  ;;  %v219_v48 = vmul.f32 0.03125, %v217_v47 }
 0x23b   :  { %v221_v49 = vadd.f32 1e-05, %v219_v48 }
 0x23d   :  { %285 = vrsqrt.f32 %v221_v49 }
 0x243   :  { %v284_v50 = vpop.eup %283 }
 0x244   :  { %v224_v52 = vmul.f32 %v284_v50, %v208_v36 }
 0x246   :  { %v233_v54 = vmul.f32 %v266_v51, %v224_v52 }
 0x247   :  { %v286_v55 = vpop.eup %285 }
 0x248   :  { %v242_v56 = vadd.f32 %v267_v53, %v233_v54  ;;  %v225_v57 = vmul.f32 %v286_v55, %v209_v40 }
 0x24a   :  { %244 = vst.msk [vmem:[%s410_s6] sm:$0xff] %vm198_vm1, %v242_v56  ;;  %v234_v58 = vmul.f32 %v266_v51, %v225_v57 }
 0x24c   :  { %v243_v59 = vadd.f32 %v267_v53, %v234_v58 }
 0x24e   :  { %245 = vst.msk [vmem:[%s410_s6 + $0x8] sm:$0xff] %vm198_vm1, %v243_v59 }

// kernel: structure_module_forward.23
= control target key start
LH: loop header
LB: loop body
LE: loop exit
PB: predicated region body
PF: predicated region fallthrough
CT: control target
= control target key end

     0   :  { %v356_v0 = vmov 0.0   ;;  %vm357_vm0 = vmmov 0   ;;  %vm59_vm1 = vcmask 261120   ;;  %s462_s1 = inlined_call_operand.vmem [shape: bf16[32,32], index: 1, kind: input, shape index: {}]   ;;  %s463_s0 = inlined_call_operand.vmem [shape: f32[16,32], index: 0, kind: input, shape index: {}]   ;;  %s464_s3 = inlined_call_operand.vmem [shape: bf16[32,32], index: 3, kind: input, shape index: {}]   ;;  %s465_s2 = inlined_call_operand.vmem [shape: f32[1,32], index: 2, kind: input, shape index: {}]   ;;  %s466_s5 = inlined_call_operand.vmem [shape: bf16[32,32], index: 5, kind: input, shape index: {}]   ;;  %s467_s4 = inlined_call_operand.vmem [shape: f32[1,32], index: 4, kind: input, shape index: {}]   ;;  %s468_s6 = inlined_call_operand.vmem [shape: f32[1,32], index: 6, kind: input, shape index: {}]   ;;  %s469_s7 = inlined_call_operand.vmem [shape: f32[1,32], index: 7, kind: input, shape index: {}]   ;;  %s470_s8 = inlined_call_operand.vmem [shape: f32[1,32], index: 8, kind: input, shape index: {}]   ;;  %s471_s9 = inlined_call_operand.vmem [shape: f32[16,32], index: 9, kind: output, shape index: {}]  }
   0x1   :  { %320 = vmatprep.subr.bf16.mxu0 %v356_v0  ;;  %v346_v1 = vld [vmem:[%s462_s1] sm:$0xff]   ;;  %324 = vmatprep.mubr.msk.bf16.mxu0 %vm357_vm0, %v356_v0  ;;  %v347_v2 = vld [vmem:[%s462_s1 + $0x8] sm:$0xff]  }
   0x2   :  { %328 = vmatprep.subr.bf16.mxu1 %v356_v0  ;;  %332 = vmatprep.mubr.msk.bf16.mxu1 %vm357_vm0, %v356_v0  ;;  %v33_v3 = vld [vmem:[%s463_s0] sm:$0xff]  ;;  %v34_v4 = vld [vmem:[%s463_s0 + $0x8] sm:$0xff] }
   0x3   :  { %321 = vmatpush3.bf16.msra.mxu0 %v346_v1  ;;  %v35_v5 = vpack.c.bf16 %v34_v4, %v33_v3  ;;  %v348_v6 = vld [vmem:[%s464_s3] sm:$0xff]   ;;  %v349_v7 = vld [vmem:[%s464_s3 + $0x8] sm:$0xff]  }
   0x4   :  { %322 = vmatprep.subr.bf16.mxu0 %v356_v0  ;;  %329 = vmatpush3.bf16.msra.mxu1 %v348_v6  ;;  %v297_v8 = vld [vmem:[%s465_s2] ss:$0 sm:$0xff]  ;;  %v351_v19 = vld [vmem:[%s466_s5 + $0x8] sm:$0xff]  }
   0x5   :  { %330 = vmatprep.subr.bf16.mxu1 %v356_v0  ;;  %v350_v18 = vld [vmem:[%s466_s5] sm:$0xff]  }
   0x6   :  { %v301_v20 = vld [vmem:[%s467_s4] ss:$0 sm:$0xff] }
   0x7   :  { %323 = vmatpush3.bf16.msra.mxu0 %v347_v2  ;;  %v305_v30 = vld [vmem:[%s468_s6] ss:$0 sm:$0xff] }
   0x8   :  { %336 = vmatprep.subr.bf16.mxu0 %v356_v0  ;;  %331 = vmatpush3.bf16.msra.mxu1 %v349_v7  ;;  %v309_v58 = vld [vmem:[%s469_s7] ss:$0 sm:$0xff] }
   0x9   :  { %v310_v60 = vld [vmem:[%s470_s8] ss:$0 sm:$0xff] }
   0xa   :  { %325 = vmatmul.mubr.msk.bf16.vlgmr.msra.gmra.mrb[0].mxu0 %vm59_vm1, %v35_v5 }
   0xb   :  { %340 = vmatprep.mubr.msk.bf16.mxu0 %vm357_vm0, %v356_v0  ;;  %337 = vmatpush3.bf16.msra.mxu0 %v350_v18 }
   0xc   :  { %338 = vmatprep.subr.bf16.mxu0 %v356_v0 }
   0xf   :  { %339 = vmatpush3.bf16.msra.mxu0 %v351_v19 }
  0xdd   :  { %v97_v9 = vpop.f32.mrb[0].mxu0 }
  0xde   :  { %v98_v10 = vadd.f32 %v297_v8, %v97_v9  ;;  %v326_v11 = vpop.f32.mrb[1].mxu0 }
  0xdf   :  { %v100_v12 = vpop.f32.mrb[2].mxu0 }
  0xe0   :  { %v101_v13 = vadd.f32 %v297_v8, %v100_v12  ;;  %v327_v14 = vpop.f32.mrb[3].mxu0  ;;  %v104_v15 = vmax.f32 %v98_v10, 0.0 }
  0xe2   :  { %v105_v16 = vmax.f32 %v101_v13, 0.0 }
  0xe4   :  { %v106_v17 = vpack.c.bf16 %v105_v16, %v104_v15 }
  0xe6   :  { %333 = vmatmul.mubr.msk.bf16.vlgmr.msra.gmra.mrb[0].mxu1 %vm59_vm1, %v106_v17 }
 0x1b9   :  { %v167_v21 = vpop.f32.mrb[0].mxu1 }
 0x1ba   :  { %v168_v22 = vadd.f32 %v301_v20, %v167_v21  ;;  %v334_v23 = vpop.f32.mrb[1].mxu1 }
 0x1bb   :  { %v170_v24 = vpop.f32.mrb[2].mxu1 }
 0x1bc   :  { %v171_v25 = vadd.f32 %v301_v20, %v170_v24  ;;  %v335_v26 = vpop.f32.mrb[3].mxu1  ;;  %v174_v27 = vmax.f32 %v168_v22, 0.0 }
 0x1be   :  { %v175_v28 = vmax.f32 %v171_v25, 0.0 }
 0x1c0   :  { %v176_v29 = vpack.c.bf16 %v175_v28, %v174_v27 }
 0x1c2   :  { %341 = vmatmul.mubr.msk.bf16.vlgmr.msra.gmra.mrb[4].mxu0 %vm59_vm1, %v176_v29 }
 0x295   :  { %v237_v31 = vpop.f32.mrb[4].mxu0 }
 0x296   :  { %v238_v32 = vadd.f32 %v305_v30, %v237_v31  ;;  %v342_v33 = vpop.f32.mrb[5].mxu0 }
 0x297   :  { %v240_v34 = vpop.f32.mrb[6].mxu0 }
 0x298   :  { %v241_v35 = vadd.f32 %v305_v30, %v240_v34  ;;  %v343_v36 = vpop.f32.mrb[7].mxu0  ;;  %v244_v37 = vadd.f32 %v238_v32, %v33_v3 }
 0x29a   :  { %v246_v38 = vsel %vm59_vm1, %v244_v37, 0.0  ;;  %v245_v39 = vadd.f32 %v241_v35, %v34_v4 }
 0x29b   :  { %247 = vadd.xlane.f32.xlu0 %v246_v38 }
 0x29c   :  { %v249_v40 = vsel %vm59_vm1, %v245_v39, 0.0 }
 0x29f   :  { %250 = vadd.xlane.f32.xlu0 %v249_v40 }
 0x328   :  { %v248_v41 = vpop.xlane.xlu0 %247 }
 0x329   :  { %v253_v42 = vmul.f32 0.03125, %v248_v41 }
 0x32b   :  { %v255_v43 = vsub.f32 %v244_v37, %v253_v42 }
 0x32c   :  { %v251_v44 = vpop.xlane.xlu0 %250 }
 0x32d   :  { %v254_v45 = vmul.f32 0.03125, %v251_v44  ;;  %v257_v46 = vmul.f32 %v255_v43, %v255_v43 }
 0x32f   :  { %v256_v47 = vsub.f32 %v245_v39, %v254_v45  ;;  %v259_v48 = vsel %vm59_vm1, %v257_v46, 0.0 }
 0x330   :  { %260 = vadd.xlane.f32.xlu1 %v259_v48 }
 0x331   :  { %v258_v49 = vmul.f32 %v256_v47, %v256_v47 }
 0x333   :  { %v262_v50 = vsel %vm59_vm1, %v258_v49, 0.0 }
 0x334   :  { %263 = vadd.xlane.f32.xlu1 %v262_v50 }
 0x3bd   :  { %v261_v51 = vpop.xlane.xlu1 %260 }
 0x3be   :  { %v265_v52 = vmul.f32 0.03125, %v261_v51 }
 0x3c0   :  { %v267_v53 = vadd.f32 1e-05, %v265_v52 }
 0x3c1   :  { %v264_v54 = vpop.xlane.xlu1 %263 }
 0x3c2   :  { %352 = vrsqrt.f32 %v267_v53  ;;  %v266_v55 = vmul.f32 0.03125, %v264_v54 }
 0x3c4   :  { %v268_v56 = vadd.f32 1e-05, %v266_v55 }
 0x3c6   :  { %354 = vrsqrt.f32 %v268_v56 }
 0x3cc   :  { %v353_v57 = vpop.eup %352 }
 0x3cd   :  { %v271_v59 = vmul.f32 %v353_v57, %v255_v43 }
 0x3cf   :  { %v280_v61 = vmul.f32 %v309_v58, %v271_v59 }
 0x3d0   :  { %v355_v62 = vpop.eup %354 }
 0x3d1   :  { %v289_v63 = vadd.f32 %v310_v60, %v280_v61  ;;  %v272_v0 = vmul.f32 %v355_v62, %v256_v47 }
 0x3d3   :  { %291 = vst.msk [vmem:[%s471_s9] sm:$0xff] %vm59_vm1, %v289_v63  ;;  %v281_v1 = vmul.f32 %v309_v58, %v272_v0 }
 0x3d5   :  { %v290_v2 = vadd.f32 %v310_v60, %v281_v1 }
 0x3d7   :  { %292 = vst.msk [vmem:[%s471_s9 + $0x8] sm:$0xff] %vm59_vm1, %v290_v2 }

// kernel: structure_module_forward.24
= control target key start
LH: loop header
LB: loop body
LE: loop exit
PB: predicated region body
PF: predicated region fallthrough
CT: control target
= control target key end

     0   :  { %v112_v0 = vmov 0.0   ;;  %vm113_vm0 = vmmov 0   ;;  %vm41_vm1 = vcmask 261120   ;;  %vm86_vm2 = vcmask 48128   ;;  %s155_s1 = inlined_call_operand.vmem [shape: bf16[32,6], index: 1, kind: input, shape index: {}]   ;;  %s156_s0 = inlined_call_operand.vmem [shape: f32[16,32], index: 0, kind: input, shape index: {}]   ;;  %s157_s2 = inlined_call_operand.vmem [shape: f32[1,6], index: 2, kind: input, shape index: {}]   ;;  %s158_s3 = inlined_call_operand.vmem [shape: f32[16,6], index: 3, kind: output, shape index: {}]  }
   0x1   :  { %100 = vmatprep.subr.bf16.mxu0 %v112_v0  ;;  %v110_v1 = vld [vmem:[%s155_s1] sm:$0xff]   ;;  %104 = vmatprep.mubr.msk.bf16.mxu0 %vm113_vm0, %v112_v0  ;;  %v111_v2 = vld [vmem:[%s155_s1 + $0x8] sm:$0xff]  }
   0x2   :  { %101 = vmatpush3.bf16.msra.mxu0 %v110_v1  ;;  %v15_v3 = vld [vmem:[%s156_s0] sm:$0xff]  ;;  %v16_v4 = vld [vmem:[%s156_s0 + $0x8] sm:$0xff] }
   0x3   :  { %102 = vmatprep.subr.bf16.mxu0 %v112_v0  ;;  %v17_v5 = vpack.c.bf16 %v16_v4, %v15_v3  ;;  %v93_v6 = vld [vmem:[%s157_s2] ss:$0 sm:$0xff] }
   0x6   :  { %103 = vmatpush3.bf16.msra.mxu0 %v111_v2 }
   0x9   :  { %105 = vmatmul.mubr.msk.bf16.vlgmr.msra.gmra.mrb[0].mxu0 %vm41_vm1, %v17_v5 }
  0xdc   :  { %v79_v7 = vpop.f32.mrb[0].mxu0 }
  0xdd   :  { %v80_v8 = vadd.f32 %v93_v6, %v79_v7  ;;  %v106_v9 = vpop.f32.mrb[1].mxu0 }
  0xde   :  { %v82_v10 = vpop.f32.mrb[2].mxu0 }
  0xdf   :  { %87 = vst.msk [vmem:[%s158_s3] sm:$0xff] %vm86_vm2, %v80_v8  ;;  %v83_v11 = vadd.f32 %v93_v6, %v82_v10  ;;  %v107_v12 = vpop.f32.mrb[3].mxu0 }
  0xe1   :  { %88 = vst.msk [vmem:[%s158_s3 + $0x8] sm:$0xff] %vm86_vm2, %v83_v11 }

// kernel: structure_module_forward.31
= control target key start
LH: loop header
LB: loop body
LE: loop exit
PB: predicated region body
PF: predicated region fallthrough
CT: control target
= control target key end

     0   :  { %v619_v0 = vmov 0.0   ;;  %vm620_vm0 = vmmov 0   ;;  %vm72_vm1 = vcmask 261120   ;;  %vm209_vm2 = vcmask 130048   ;;  %s780_s2 = inlined_call_operand.vmem [shape: bf16[32,16], index: 2, kind: input, shape index: {}]   ;;  %s781_s4 = inlined_call_operand.vmem [shape: bf16[32,16], index: 4, kind: input, shape index: {}]   ;;  %s782_s0 = inlined_call_operand.vmem [shape: f32[16,32], index: 0, kind: input, shape index: {}]   ;;  %s783_s1 = inlined_call_operand.vmem [shape: f32[16,32], index: 1, kind: input, shape index: {}]   ;;  %s784_s6 = inlined_call_operand.vmem [shape: bf16[2,16,16], index: 6, kind: input, shape index: {}]   ;;  %s785_s3 = inlined_call_operand.vmem [shape: f32[1,16], index: 3, kind: input, shape index: {}]   ;;  %s786_s5 = inlined_call_operand.vmem [shape: f32[1,16], index: 5, kind: input, shape index: {}]   ;;  %s787_s8 = inlined_call_operand.vmem [shape: bf16[2,16,16], index: 8, kind: input, shape index: {}]   ;;  %s788_s7 = inlined_call_operand.vmem [shape: f32[2,1,16], index: 7, kind: input, shape index: {}]   ;;  %s789_s9 = inlined_call_operand.vmem [shape: f32[2,1,16], index: 9, kind: input, shape index: {}]   ;;  %s790_s10 = inlined_call_operand.vmem [shape: bf16[16,14], index: 10, kind: input, shape index: {}]   ;;  %s791_s11 = inlined_call_operand.vmem [shape: f32[1,14], index: 11, kind: input, shape index: {}]   ;;  %s792_s12 = inlined_call_operand.vmem [shape: f32[16,14], index: 12, kind: output, shape index: {}]  }
   0x1   :  { %562 = vmatprep.subr.bf16.mxu0 %v619_v0  ;;  %570 = vmatprep.subr.bf16.mxu1 %v619_v0  ;;  %v610_v1 = vld [vmem:[%s780_s2] sm:$0xff]   ;;  %v612_v3 = vld [vmem:[%s780_s2 + $0x8] sm:$0xff]   ;;  %vm510_vm3 = vcmask 113664  }
   0x2   :  { %v611_v2 = vld [vmem:[%s781_s4] sm:$0xff]   ;;  %566 = vmatprep.mubr.msk.bf16.mxu0 %vm620_vm0, %v619_v0  ;;  %574 = vmatprep.mubr.msk.bf16.mxu1 %vm620_vm0, %v619_v0  ;;  %v613_v4 = vld [vmem:[%s781_s4 + $0x8] sm:$0xff]  }
   0x3   :  { %563 = vmatpush3.bf16.msra.mxu0 %v610_v1  ;;  %571 = vmatpush3.bf16.msra.mxu1 %v611_v2  ;;  %v42_v5 = vld [vmem:[%s782_s0] sm:$0xff]  ;;  %v43_v6 = vld [vmem:[%s782_s0 + $0x8] sm:$0xff] }
   0x4   :  { %564 = vmatprep.subr.bf16.mxu0 %v619_v0  ;;  %572 = vmatprep.subr.bf16.mxu1 %v619_v0  ;;  %v44_v7 = vld [vmem:[%s783_s1] sm:$0xff]  ;;  %v46_v8 = vmax.f32 %v42_v5, 0.0  ;;  %v47_v9 = vmax.f32 %v43_v6, 0.0  ;;  %v45_v10 = vld [vmem:[%s783_s1 + $0x8] sm:$0xff] }
   0x5   :  { %v117_v11 = vmax.f32 %v44_v7, 0.0  ;;  %v118_v12 = vmax.f32 %v45_v10, 0.0  ;;  %v614_v15 = vld [vmem:[%s784_s6] sm:$0xff]   ;;  %v616_v46 = vld [vmem:[%s784_s6 + $0x8] sm:$0xff]  }
   0x6   :  { %v48_v13 = vpack.c.bf16 %v47_v9, %v46_v8  ;;  %v517_v16 = vld [vmem:[%s785_s3] ss:$0 sm:$0xff]  ;;  %v617_v59 = vld [vmem:[%s787_s8 + $0x8] sm:$0xff]   ;;  %v534_v60 = vld [vmem:[%s788_s7 + $0x1] ss:$0 sm:$0xff] }
   0x7   :  { %565 = vmatpush3.bf16.msra.mxu0 %v612_v3  ;;  %573 = vmatpush3.bf16.msra.mxu1 %v613_v4  ;;  %v119_v14 = vpack.c.bf16 %v118_v12, %v117_v11  ;;  %v524_v21 = vld [vmem:[%s786_s5] ss:$0 sm:$0xff]  ;;  %v540_v7 = vld [vmem:[%s789_s9 + $0x1] ss:$0 sm:$0xff] }
   0x8   :  { %578 = vmatprep.subr.bf16.mxu0 %v619_v0  ;;  %584 = vmatprep.subr.bf16.mxu1 %v619_v0  ;;  %v615_v35 = vld [vmem:[%s787_s8] sm:$0xff]  }
   0x9   :  { %v525_v36 = vld [vmem:[%s788_s7] ss:$0 sm:$0xff] }
   0xa   :  { %567 = vmatmul.mubr.msk.bf16.vlgmr.msra.gmra.mrb[0].mxu0 %vm72_vm1, %v48_v13  ;;  %575 = vmatmul.mubr.msk.bf16.vlgmr.msra.gmra.mrb[0].mxu1 %vm72_vm1, %v119_v14  ;;  %v528_v47 = vld [vmem:[%s789_s9] ss:$0 sm:$0xff] }
   0xb   :  { %580 = vmatprep.mubr.msk.bf16.mxu0 %vm620_vm0, %v619_v0  ;;  %586 = vmatprep.mubr.msk.bf16.mxu1 %vm620_vm0, %v619_v0 }
   0xc   :  { %579 = vmatpush3.bf16.msra.mxu0 %v614_v15  ;;  %585 = vmatpush3.bf16.msra.mxu1 %v615_v35 }
   0xd   :  { %590 = vmatprep.subr.bf16.mxu0 %v619_v0  ;;  %596 = vmatprep.subr.bf16.mxu1 %v619_v0 }
  0xdd   :  { %v110_v17 = vpop.f32.mrb[0].mxu0  ;;  %v173_v19 = vpop.f32.mrb[0].mxu1 }
  0xde   :  { %v111_v18 = vadd.f32 %v517_v16, %v110_v17  ;;  %v568_v20 = vpop.f32.mrb[1].mxu0  ;;  %v576_v22 = vpop.f32.mrb[1].mxu1 }
  0xdf   :  { %v113_v23 = vpop.f32.mrb[2].mxu0  ;;  %v176_v26 = vpop.f32.mrb[2].mxu1 }
  0xe0   :  { %v180_v24 = vadd.f32 %v173_v19, %v111_v18  ;;  %v114_v25 = vadd.f32 %v517_v16, %v113_v23  ;;  %v569_v27 = vpop.f32.mrb[3].mxu0  ;;  %v577_v28 = vpop.f32.mrb[3].mxu1  ;;  %v543_v19 = vld [vmem:[%s791_s11] ss:$0 sm:$0xff] }
  0xe2   :  { %v189_v29 = vadd.f32 %v524_v21, %v180_v24  ;;  %v181_v30 = vadd.f32 %v176_v26, %v114_v25 }
  0xe4   :  { %v190_v31 = vadd.f32 %v524_v21, %v181_v30  ;;  %v191_v32 = vmax.f32 %v189_v29, 0.0 }
  0xe6   :  { %v192_v33 = vmax.f32 %v190_v31, 0.0 }
  0xe8   :  { %v193_v34 = vpack.c.bf16 %v192_v33, %v191_v32 }
  0xea   :  { %581 = vmatmul.mubr.msk.bf16.vlgmr.msra.gmra.mrb[4].mxu0 %vm209_vm2, %v193_v34 }
  0xeb   :  { %592 = vmatprep.mubr.msk.bf16.mxu0 %vm620_vm0, %v619_v0  ;;  %591 = vmatpush3.bf16.msra.mxu0 %v616_v46 }
  0xec   :  { %602 = vmatprep.subr.bf16.mxu0 %v619_v0 }
 0x1bd   :  { %v247_v37 = vpop.f32.mrb[4].mxu0 }
 0x1be   :  { %v248_v38 = vadd.f32 %v525_v36, %v247_v37  ;;  %v582_v39 = vpop.f32.mrb[5].mxu0 }
 0x1bf   :  { %v250_v40 = vpop.f32.mrb[6].mxu0 }
 0x1c0   :  { %v251_v41 = vadd.f32 %v525_v36, %v250_v40  ;;  %v583_v42 = vpop.f32.mrb[7].mxu0  ;;  %v254_v43 = vmax.f32 %v248_v38, 0.0 }
 0x1c2   :  { %v255_v44 = vmax.f32 %v251_v41, 0.0 }
 0x1c4   :  { %v256_v45 = vpack.c.bf16 %v255_v44, %v254_v43 }
 0x1c6   :  { %587 = vmatmul.mubr.msk.bf16.vlgmr.msra.gmra.mrb[4].mxu1 %vm209_vm2, %v256_v45 }
 0x1c7   :  { %598 = vmatprep.mubr.msk.bf16.mxu1 %vm620_vm0, %v619_v0  ;;  %597 = vmatpush3.bf16.msra.mxu1 %v617_v59 }
 0x299   :  { %v309_v48 = vpop.f32.mrb[4].mxu1 }
 0x29a   :  { %v310_v49 = vadd.f32 %v528_v47, %v309_v48  ;;  %v588_v50 = vpop.f32.mrb[5].mxu1 }
 0x29b   :  { %v312_v51 = vpop.f32.mrb[6].mxu1 }
 0x29c   :  { %v316_v52 = vadd.f32 %v310_v49, %v189_v29  ;;  %v313_v53 = vadd.f32 %v528_v47, %v312_v51  ;;  %v589_v54 = vpop.f32.mrb[7].mxu1 }
 0x29e   :  { %v317_v55 = vadd.f32 %v313_v53, %v190_v31  ;;  %v318_v56 = vmax.f32 %v316_v52, 0.0 }
 0x2a0   :  { %v319_v57 = vmax.f32 %v317_v55, 0.0 }
 0x2a2   :  { %v320_v58 = vpack.c.bf16 %v319_v57, %v318_v56 }
 0x2a4   :  { %593 = vmatmul.mubr.msk.bf16.vlgmr.msra.gmra.mrb[8].mxu0 %vm209_vm2, %v320_v58 }
 0x2a5   :  { %604 = vmatprep.mubr.msk.bf16.mxu0 %vm620_vm0, %v619_v0  ;;  %v618_v0 = vld [vmem:[%s790_s10] sm:$0xff]  }
 0x2a6   :  { %603 = vmatpush3.bf16.msra.mxu0 %v618_v0 }
 0x377   :  { %v375_v61 = vpop.f32.mrb[8].mxu0 }
 0x378   :  { %v376_v62 = vadd.f32 %v534_v60, %v375_v61  ;;  %v594_v63 = vpop.f32.mrb[9].mxu0 }
 0x379   :  { %v378_v1 = vpop.f32.mrb[10].mxu0 }
 0x37a   :  { %v379_v2 = vadd.f32 %v534_v60, %v378_v1  ;;  %v595_v3 = vpop.f32.mrb[11].mxu0  ;;  %v382_v4 = vmax.f32 %v376_v62, 0.0 }
 0x37c   :  { %v383_v5 = vmax.f32 %v379_v2, 0.0 }
 0x37e   :  { %v384_v6 = vpack.c.bf16 %v383_v5, %v382_v4 }
 0x380   :  { %599 = vmatmul.mubr.msk.bf16.vlgmr.msra.gmra.mrb[8].mxu1 %vm209_vm2, %v384_v6 }
 0x453   :  { %v439_v8 = vpop.f32.mrb[8].mxu1 }
 0x454   :  { %v440_v9 = vadd.f32 %v540_v7, %v439_v8  ;;  %v600_v10 = vpop.f32.mrb[9].mxu1 }
 0x455   :  { %v442_v11 = vpop.f32.mrb[10].mxu1 }
 0x456   :  { %v446_v12 = vadd.f32 %v440_v9, %v316_v52  ;;  %v443_v13 = vadd.f32 %v540_v7, %v442_v11  ;;  %v601_v14 = vpop.f32.mrb[11].mxu1 }
 0x458   :  { %v447_v15 = vadd.f32 %v443_v13, %v317_v55  ;;  %v448_v16 = vmax.f32 %v446_v12, 0.0 }
 0x45a   :  { %v449_v17 = vmax.f32 %v447_v15, 0.0 }
 0x45c   :  { %v450_v18 = vpack.c.bf16 %v449_v17, %v448_v16 }
 0x45e   :  { %605 = vmatmul.mubr.msk.bf16.vlgmr.msra.gmra.mrb[12].mxu0 %vm209_vm2, %v450_v18 }
 0x531   :  { %v503_v20 = vpop.f32.mrb[12].mxu0 }
 0x532   :  { %v504_v21 = vadd.f32 %v543_v19, %v503_v20  ;;  %v606_v22 = vpop.f32.mrb[13].mxu0 }
 0x533   :  { %v506_v23 = vpop.f32.mrb[14].mxu0 }
 0x534   :  { %511 = vst.msk [vmem:[%s792_s12] sm:$0xff] %vm510_vm3, %v504_v21  ;;  %v507_v24 = vadd.f32 %v543_v19, %v506_v23  ;;  %v607_v25 = vpop.f32.mrb[15].mxu0 }
 0x536   :  { %512 = vst.msk [vmem:[%s792_s12 + $0x8] sm:$0xff] %vm510_vm3, %v507_v24 }

</bundles_post_ra>
